<compile_context>
chip_gen: v7x
topology: tpu7x:2x2x1
jax: 0.10.0
libtpu: 0.0.40
codegen_flags: <defaults>
</compile_context>

<pallas_src>
import functools

import jax
import jax.numpy as jnp
import numpy as np
from jax import lax
from jax.experimental import pallas as pl
from jax.experimental.pallas import tpu as pltpu


# ----------------------------------------------------------------------------
# In-kernel helpers (pure value math in the flat-lane layout)
# ----------------------------------------------------------------------------
def _conv3x3_relu(apf, w_ref, b_ref, masks, wd):
    """3x3 'SAME' conv + bias + ReLU.

    apf:    (Cin, wd*wd + 2*wd + 2) zero-padded flat activation (value).
            real data occupies lanes [wd+1, wd+1 + wd*wd).
    w_ref:  (3, 3, Cout, Cin) ref   (torch OIHW transposed to HWOI)
    b_ref:  (Cout, 1) ref
    masks:  (2, wd*wd) value; row0 = (col != 0), row1 = (col != wd-1), as 1./0.
    returns (Cout, wd*wd) f32
    """
    npix = wd * wd
    cin = apf.shape[0]
    acc = None
    for dj in range(3):                       # group taps by horizontal offset
        part = None
        for di in range(3):
            off = di * wd + dj                # static lane offset of this tap
            sl = apf[:, off:off + npix]       # (Cin, npix)
            wt = w_ref[di, dj]                # (Cout, Cin)
            if cin == 1:
                contrib = wt * sl             # VPU outer product (avoid K=1 MXU)
            else:
                contrib = jnp.dot(wt, sl, preferred_element_type=jnp.float32)
            part = contrib if part is None else part + contrib
        if dj == 0:                           # left-neighbour taps wrap at col 0
            part = part * masks[0:1, :]
        elif dj == 2:                         # right-neighbour taps wrap at col wd-1
            part = part * masks[1:2, :]
        acc = part if acc is None else acc + part
    return jnp.maximum(acc + b_ref[...], 0.0)   # bias added once, fused ReLU


def _maxpool2x2(a, wd, sel_ref):
    """2x2 / stride-2 max pool fused with a 0/1 selection (+re-pad) matmul.

    a:       (C, wd*wd) post-ReLU activation (value)
    sel_ref: (wd*wd, n_out_cols) ref; one 1.0 per valid pooled pixel column.
    returns  (C, n_out_cols) f32
    """
    c, npix = a.shape
    ext = jnp.concatenate([a, jnp.zeros((c, wd + 1), jnp.float32)], axis=1)
    m = jnp.maximum(
        jnp.maximum(ext[:, 0:npix], ext[:, 1:npix + 1]),
        jnp.maximum(ext[:, wd:wd + npix], ext[:, wd + 1:wd + 1 + npix]))
    # m[:, p] = max of the 2x2 block whose top-left flat index is p; the
    # selection matmul keeps only valid top-left positions (and re-pads).
    return jnp.dot(m, sel_ref[...], preferred_element_type=jnp.float32)


# ----------------------------------------------------------------------------
# Fused forward kernel (one grid step = one image)
# ----------------------------------------------------------------------------
def fused_forward_kernel(x_ref, w1_ref, b1_ref, w2_ref, b2_ref, w3_ref, b3_ref,
                         w4_ref, b4_ref, wfc_ref, bfc_ref,
                         sel1_ref, sel2_ref, m28_ref, m14_ref, o_ref,
                         *, w1d, w2d, hidden):
    m28 = m28_ref[...]
    m14 = m14_ref[...]

    # ---- conv block 1 (28 x 28) ------------------------------------------
    apf = x_ref[0].astype(jnp.float32)                       # (Cin, 842)
    a = _conv3x3_relu(apf, w1_ref, b1_ref, m28, w1d)          # (hidden, 784)
    pad1 = jnp.zeros((hidden, w1d + 1), jnp.float32)
    apf = jnp.concatenate([pad1, a, pad1], axis=1)            # (hidden, 842)
    a = _conv3x3_relu(apf, w2_ref, b2_ref, m28, w1d)          # (hidden, 784)
    apf = _maxpool2x2(a, w1d, sel1_ref)                       # (hidden, 226) pre-padded

    # ---- conv block 2 (14 x 14) ------------------------------------------
    a = _conv3x3_relu(apf, w3_ref, b3_ref, m14, w2d)          # (hidden, 196)
    pad2 = jnp.zeros((hidden, w2d + 1), jnp.float32)
    apf = jnp.concatenate([pad2, a, pad2], axis=1)            # (hidden, 226)
    a = _conv3x3_relu(apf, w4_ref, b4_ref, m14, w2d)          # (hidden, 196)
    p = _maxpool2x2(a, w2d, sel2_ref)                         # (hidden, 49)

    # ---- classifier: channel-major flatten + Linear -----------------------
    feat = jnp.concatenate([p[c:c + 1, :] for c in range(hidden)], axis=1)  # (1, hidden*49)
    logits = jnp.dot(feat, wfc_ref[...],
                     preferred_element_type=jnp.float32) + bfc_ref[...]     # (1, O)
    o_ref[...] = logits[None]


# ----------------------------------------------------------------------------
# Host-side constants (pool selection matrices, column-wrap masks)
# ----------------------------------------------------------------------------
def _pool_select_matrix(wd, pad_out):
    wo = wd // 2
    npix, nout = wd * wd, wo * wo
    s = np.zeros((npix, nout + 2 * pad_out), np.float32)
    for qi in range(wo):
        for qj in range(wo):
            s[2 * qi * wd + 2 * qj, pad_out + qi * wo + qj] = 1.0
    return jnp.asarray(s)


def _col_masks(wd):
    col = np.arange(wd * wd) % wd
    return jnp.asarray(np.stack([(col != 0), (col != wd - 1)]).astype(np.float32))


# ----------------------------------------------------------------------------
# Wrapper
# ----------------------------------------------------------------------------
def numbers_model_forward(x_nchw, params):
    B, cin, H, W = x_nchw.shape
    hidden = params["w1"].shape[0]
    out_dim = params["wfc"].shape[0]
    w1d, w2d = W, W // 2                    # 28, 14
    n1, n2 = w1d * w1d, w2d * w2d           # 784, 196
    L1 = n1 + 2 * w1d + 2                   # 842
    L2 = n2 + 2 * w2d + 2                   # 226
    nf = (w2d // 2) ** 2                    # 49

    # Tiny one-pass glue: flat-pad the input, re-layout weights, build constants.
    xf = jnp.pad(x_nchw.reshape(B, cin, n1).astype(jnp.float32),
                 ((0, 0), (0, 0), (w1d + 1, w1d + 1)))              # (B, cin, 842)
    to_hwoi = lambda w: jnp.transpose(w, (2, 3, 0, 1)).astype(jnp.float32)
    to_col = lambda b: b.reshape(-1, 1).astype(jnp.float32)
    w1, w2 = to_hwoi(params["w1"]), to_hwoi(params["w2"])
    w3, w4 = to_hwoi(params["w3"]), to_hwoi(params["w4"])
    b1, b2 = to_col(params["b1"]), to_col(params["b2"])
    b3, b4 = to_col(params["b3"]), to_col(params["b4"])
    wfc = params["wfc"].astype(jnp.float32).T                       # (hidden*49, O)
    bfc = params["bfc"].reshape(1, out_dim).astype(jnp.float32)

    sel1 = _pool_select_matrix(w1d, pad_out=w2d + 1)                # (784, 226)
    sel2 = _pool_select_matrix(w2d, pad_out=0)                      # (196, 49)
    m28 = _col_masks(w1d)                                           # (2, 784)
    m14 = _col_masks(w2d)                                           # (2, 196)

    def full(*shape):
        return pl.BlockSpec(shape, lambda b, _s=len(shape): (0,) * _s)

    kernel = functools.partial(fused_forward_kernel,
                               w1d=w1d, w2d=w2d, hidden=hidden)
    out = pl.pallas_call(
        kernel,
        out_shape=jax.ShapeDtypeStruct((B, 1, out_dim), jnp.float32),
        grid=(B,),
        in_specs=[
            pl.BlockSpec((1, cin, L1), lambda b: (b, 0, 0)),
            full(3, 3, hidden, cin), full(hidden, 1),
            full(3, 3, hidden, hidden), full(hidden, 1),
            full(3, 3, hidden, hidden), full(hidden, 1),
            full(3, 3, hidden, hidden), full(hidden, 1),
            full(hidden * nf, out_dim), full(1, out_dim),
            full(n1, L2), full(n2, nf),
            full(2, n1), full(2, n2),
        ],
        out_specs=pl.BlockSpec((1, 1, out_dim), lambda b: (b, 0, 0)),
        compiler_params=pltpu.CompilerParams(dimension_semantics=("parallel",)),
    )(xf, w1, b1, w2, b2, w3, b3, w4, b4, wfc, bfc, sel1, sel2, m28, m14)
    return out.reshape(B, out_dim)


# ----------------------------------------------------------------------------
# Deterministic parameter init (PyTorch weight layouts)
# ----------------------------------------------------------------------------
def init_params(key, in_ch, hidden, out_classes):
    ks = jax.random.split(key, 10)
    cw = lambda k, co, ci: 0.1 * jax.random.normal(k, (co, ci, 3, 3), jnp.float32)
    vec = lambda k, n: 0.1 * jax.random.normal(k, (n,), jnp.float32)
    return {
        "w1": cw(ks[0], hidden, in_ch), "b1": vec(ks[1], hidden),
        "w2": cw(ks[2], hidden, hidden), "b2": vec(ks[3], hidden),
        "w3": cw(ks[4], hidden, hidden), "b3": vec(ks[5], hidden),
        "w4": cw(ks[6], hidden, hidden), "b4": vec(ks[7], hidden),
        "wfc": 0.1 * jax.random.normal(ks[8], (out_classes, hidden * 49), jnp.float32),
        "bfc": vec(ks[9], out_classes),
    }


# ----------------------------------------------------------------------------
# Pure-JAX reference (for correctness check)
# ----------------------------------------------------------------------------
def reference_forward(x, params):
    def conv_relu(x, w, b):
        y = lax.conv_general_dilated(
            x, w, window_strides=(1, 1), padding="SAME",
            dimension_numbers=("NCHW", "OIHW", "NCHW"))
        return jnp.maximum(y + b[None, :, None, None], 0.0)

    def pool(x):
        return lax.reduce_window(x, -jnp.inf, lax.max,
                                 (1, 1, 2, 2), (1, 1, 2, 2), "VALID")

    x = conv_relu(x, params["w1"], params["b1"])
    x = conv_relu(x, params["w2"], params["b2"])
    x = pool(x)
    x = conv_relu(x, params["w3"], params["b3"])
    x = conv_relu(x, params["w4"], params["b4"])
    x = pool(x)
    x = x.reshape(x.shape[0], -1)
    return x @ params["wfc"].T + params["bfc"]


if __name__ == "__main__":
    key = jax.random.PRNGKey(0)
    k_x, k_p = jax.random.split(key)

    B, IN_CH, HIDDEN, OUT = 2, 1, 8, 10
    x = jax.random.normal(k_x, (B, IN_CH, 28, 28), jnp.float32)   # NCHW like PyTorch
    params = init_params(k_p, IN_CH, HIDDEN, OUT)

    out = jax.block_until_ready(numbers_model_forward(x, params))
    ref = jax.block_until_ready(reference_forward(x, params))

    assert out.shape == (B, OUT), out.shape
    np.testing.assert_allclose(np.asarray(out), np.asarray(ref), rtol=1e-3, atol=1e-3)
    print("KERNEL_OK")
</pallas_src>

<mosaic_0001>
module attributes {stable_mosaic.version = 11 : i64} {
  func.func @fused_forward_kernel(%arg0: i32, %arg1: memref<1x1x842xf32, #tpu.memory_space<vmem>>, %arg2: memref<3x3x8x1xf32, #tpu.memory_space<vmem>>, %arg3: memref<8x1xf32, #tpu.memory_space<vmem>>, %arg4: memref<3x3x8x8xf32, #tpu.memory_space<vmem>>, %arg5: memref<8x1xf32, #tpu.memory_space<vmem>>, %arg6: memref<3x3x8x8xf32, #tpu.memory_space<vmem>>, %arg7: memref<8x1xf32, #tpu.memory_space<vmem>>, %arg8: memref<3x3x8x8xf32, #tpu.memory_space<vmem>>, %arg9: memref<8x1xf32, #tpu.memory_space<vmem>>, %arg10: memref<392x10xf32, #tpu.memory_space<vmem>>, %arg11: memref<1x10xf32, #tpu.memory_space<vmem>>, %arg12: memref<784x226xf32, #tpu.memory_space<vmem>>, %arg13: memref<196x49xf32, #tpu.memory_space<vmem>>, %arg14: memref<2x784xf32, #tpu.memory_space<vmem>>, %arg15: memref<2x196xf32, #tpu.memory_space<vmem>>, %arg16: memref<1x1x10xf32, #tpu.memory_space<vmem>>) attributes {dimension_semantics = [#tpu.dimension_semantics<parallel>], iteration_bounds = array<i64: 2>, scalar_prefetch = 0 : i64, scratch_operands = 0 : i64, tpu.core_type = #tpu.core_type<tc>, window_params = [{transform_indices = @transform_0, window_bounds = array<i64: 1, 1, 842>}, {pipeline_mode = #tpu.pipeline_mode<synchronous>, transform_indices = @transform_1, window_bounds = array<i64: 3, 3, 8, 1>}, {pipeline_mode = #tpu.pipeline_mode<synchronous>, transform_indices = @transform_2, window_bounds = array<i64: 8, 1>}, {pipeline_mode = #tpu.pipeline_mode<synchronous>, transform_indices = @transform_3, window_bounds = array<i64: 3, 3, 8, 8>}, {pipeline_mode = #tpu.pipeline_mode<synchronous>, transform_indices = @transform_4, window_bounds = array<i64: 8, 1>}, {pipeline_mode = #tpu.pipeline_mode<synchronous>, transform_indices = @transform_5, window_bounds = array<i64: 3, 3, 8, 8>}, {pipeline_mode = #tpu.pipeline_mode<synchronous>, transform_indices = @transform_6, window_bounds = array<i64: 8, 1>}, {pipeline_mode = #tpu.pipeline_mode<synchronous>, transform_indices = @transform_7, window_bounds = array<i64: 3, 3, 8, 8>}, {pipeline_mode = #tpu.pipeline_mode<synchronous>, transform_indices = @transform_8, window_bounds = array<i64: 8, 1>}, {pipeline_mode = #tpu.pipeline_mode<synchronous>, transform_indices = @transform_9, window_bounds = array<i64: 392, 10>}, {pipeline_mode = #tpu.pipeline_mode<synchronous>, transform_indices = @transform_10, window_bounds = array<i64: 1, 10>}, {pipeline_mode = #tpu.pipeline_mode<synchronous>, transform_indices = @transform_11, window_bounds = array<i64: 784, 226>}, {pipeline_mode = #tpu.pipeline_mode<synchronous>, transform_indices = @transform_12, window_bounds = array<i64: 196, 49>}, {pipeline_mode = #tpu.pipeline_mode<synchronous>, transform_indices = @transform_13, window_bounds = array<i64: 2, 784>}, {pipeline_mode = #tpu.pipeline_mode<synchronous>, transform_indices = @transform_14, window_bounds = array<i64: 2, 196>}, {transform_indices = @transform_15, window_bounds = array<i64: 1, 1, 10>}]} {
    %c0 = arith.constant 0 : index
    %c0_0 = arith.constant 0 : index
    %0 = vector.load %arg14[%c0, %c0_0] : memref<2x784xf32, #tpu.memory_space<vmem>>, vector<2x784xf32>
    %c0_1 = arith.constant 0 : index
    %c0_2 = arith.constant 0 : index
    %1 = vector.load %arg15[%c0_1, %c0_2] : memref<2x196xf32, #tpu.memory_space<vmem>>, vector<2x196xf32>
    %c0_3 = arith.constant 0 : index
    %c0_4 = arith.constant 0 : index
    %c0_5 = arith.constant 0 : index
    %2 = vector.load %arg1[%c0_3, %c0_4, %c0_5] : memref<1x1x842xf32, #tpu.memory_space<vmem>>, vector<1x1x842xf32>
    %3 = vector.shape_cast %2 : vector<1x1x842xf32> to vector<1x842xf32>
    %4 = vector.extract_strided_slice %3 {offsets = [0, 0], sizes = [1, 784], strides = [1, 1]} : vector<1x842xf32> to vector<1x784xf32>
    %c0_6 = arith.constant 0 : index
    %c0_7 = arith.constant 0 : index
    %c0_8 = arith.constant 0 : index
    %c0_9 = arith.constant 0 : index
    %5 = vector.load %arg2[%c0_6, %c0_7, %c0_8, %c0_9] : memref<3x3x8x1xf32, #tpu.memory_space<vmem>>, vector<1x1x8x1xf32>
    %6 = vector.shape_cast %5 : vector<1x1x8x1xf32> to vector<8x1xf32>
    %7 = vector.broadcast %6 : vector<8x1xf32> to vector<8x784xf32>
    %8 = vector.broadcast %4 : vector<1x784xf32> to vector<8x784xf32>
    %9 = arith.mulf %7, %8 : vector<8x784xf32>
    %10 = vector.extract_strided_slice %3 {offsets = [0, 28], sizes = [1, 784], strides = [1, 1]} : vector<1x842xf32> to vector<1x784xf32>
    %c1 = arith.constant 1 : index
    %c0_10 = arith.constant 0 : index
    %c0_11 = arith.constant 0 : index
    %c0_12 = arith.constant 0 : index
    %11 = vector.load %arg2[%c1, %c0_10, %c0_11, %c0_12] : memref<3x3x8x1xf32, #tpu.memory_space<vmem>>, vector<1x1x8x1xf32>
    %12 = vector.shape_cast %11 : vector<1x1x8x1xf32> to vector<8x1xf32>
    %13 = vector.broadcast %12 : vector<8x1xf32> to vector<8x784xf32>
    %14 = vector.broadcast %10 : vector<1x784xf32> to vector<8x784xf32>
    %15 = arith.mulf %13, %14 : vector<8x784xf32>
    %16 = arith.addf %9, %15 : vector<8x784xf32>
    %17 = vector.extract_strided_slice %3 {offsets = [0, 56], sizes = [1, 784], strides = [1, 1]} : vector<1x842xf32> to vector<1x784xf32>
    %c2 = arith.constant 2 : index
    %c0_13 = arith.constant 0 : index
    %c0_14 = arith.constant 0 : index
    %c0_15 = arith.constant 0 : index
    %18 = vector.load %arg2[%c2, %c0_13, %c0_14, %c0_15] : memref<3x3x8x1xf32, #tpu.memory_space<vmem>>, vector<1x1x8x1xf32>
    %19 = vector.shape_cast %18 : vector<1x1x8x1xf32> to vector<8x1xf32>
    %20 = vector.broadcast %19 : vector<8x1xf32> to vector<8x784xf32>
    %21 = vector.broadcast %17 : vector<1x784xf32> to vector<8x784xf32>
    %22 = arith.mulf %20, %21 : vector<8x784xf32>
    %23 = arith.addf %16, %22 : vector<8x784xf32>
    %24 = vector.extract_strided_slice %0 {offsets = [0, 0], sizes = [1, 784], strides = [1, 1]} : vector<2x784xf32> to vector<1x784xf32>
    %25 = vector.broadcast %24 : vector<1x784xf32> to vector<8x784xf32>
    %26 = arith.mulf %23, %25 : vector<8x784xf32>
    %27 = vector.extract_strided_slice %3 {offsets = [0, 1], sizes = [1, 784], strides = [1, 1]} : vector<1x842xf32> to vector<1x784xf32>
    %c0_16 = arith.constant 0 : index
    %c1_17 = arith.constant 1 : index
    %c0_18 = arith.constant 0 : index
    %c0_19 = arith.constant 0 : index
    %28 = vector.load %arg2[%c0_16, %c1_17, %c0_18, %c0_19] : memref<3x3x8x1xf32, #tpu.memory_space<vmem>>, vector<1x1x8x1xf32>
    %29 = vector.shape_cast %28 : vector<1x1x8x1xf32> to vector<8x1xf32>
    %30 = vector.broadcast %29 : vector<8x1xf32> to vector<8x784xf32>
    %31 = vector.broadcast %27 : vector<1x784xf32> to vector<8x784xf32>
    %32 = arith.mulf %30, %31 : vector<8x784xf32>
    %33 = vector.extract_strided_slice %3 {offsets = [0, 29], sizes = [1, 784], strides = [1, 1]} : vector<1x842xf32> to vector<1x784xf32>
    %c1_20 = arith.constant 1 : index
    %c1_21 = arith.constant 1 : index
    %c0_22 = arith.constant 0 : index
    %c0_23 = arith.constant 0 : index
    %34 = vector.load %arg2[%c1_20, %c1_21, %c0_22, %c0_23] : memref<3x3x8x1xf32, #tpu.memory_space<vmem>>, vector<1x1x8x1xf32>
    %35 = vector.shape_cast %34 : vector<1x1x8x1xf32> to vector<8x1xf32>
    %36 = vector.broadcast %35 : vector<8x1xf32> to vector<8x784xf32>
    %37 = vector.broadcast %33 : vector<1x784xf32> to vector<8x784xf32>
    %38 = arith.mulf %36, %37 : vector<8x784xf32>
    %39 = arith.addf %32, %38 : vector<8x784xf32>
    %40 = vector.extract_strided_slice %3 {offsets = [0, 57], sizes = [1, 784], strides = [1, 1]} : vector<1x842xf32> to vector<1x784xf32>
    %c2_24 = arith.constant 2 : index
    %c1_25 = arith.constant 1 : index
    %c0_26 = arith.constant 0 : index
    %c0_27 = arith.constant 0 : index
    %41 = vector.load %arg2[%c2_24, %c1_25, %c0_26, %c0_27] : memref<3x3x8x1xf32, #tpu.memory_space<vmem>>, vector<1x1x8x1xf32>
    %42 = vector.shape_cast %41 : vector<1x1x8x1xf32> to vector<8x1xf32>
    %43 = vector.broadcast %42 : vector<8x1xf32> to vector<8x784xf32>
    %44 = vector.broadcast %40 : vector<1x784xf32> to vector<8x784xf32>
    %45 = arith.mulf %43, %44 : vector<8x784xf32>
    %46 = arith.addf %39, %45 : vector<8x784xf32>
    %47 = arith.addf %26, %46 : vector<8x784xf32>
    %48 = vector.extract_strided_slice %3 {offsets = [0, 2], sizes = [1, 784], strides = [1, 1]} : vector<1x842xf32> to vector<1x784xf32>
    %c0_28 = arith.constant 0 : index
    %c2_29 = arith.constant 2 : index
    %c0_30 = arith.constant 0 : index
    %c0_31 = arith.constant 0 : index
    %49 = vector.load %arg2[%c0_28, %c2_29, %c0_30, %c0_31] : memref<3x3x8x1xf32, #tpu.memory_space<vmem>>, vector<1x1x8x1xf32>
    %50 = vector.shape_cast %49 : vector<1x1x8x1xf32> to vector<8x1xf32>
    %51 = vector.broadcast %50 : vector<8x1xf32> to vector<8x784xf32>
    %52 = vector.broadcast %48 : vector<1x784xf32> to vector<8x784xf32>
    %53 = arith.mulf %51, %52 : vector<8x784xf32>
    %54 = vector.extract_strided_slice %3 {offsets = [0, 30], sizes = [1, 784], strides = [1, 1]} : vector<1x842xf32> to vector<1x784xf32>
    %c1_32 = arith.constant 1 : index
    %c2_33 = arith.constant 2 : index
    %c0_34 = arith.constant 0 : index
    %c0_35 = arith.constant 0 : index
    %55 = vector.load %arg2[%c1_32, %c2_33, %c0_34, %c0_35] : memref<3x3x8x1xf32, #tpu.memory_space<vmem>>, vector<1x1x8x1xf32>
    %56 = vector.shape_cast %55 : vector<1x1x8x1xf32> to vector<8x1xf32>
    %57 = vector.broadcast %56 : vector<8x1xf32> to vector<8x784xf32>
    %58 = vector.broadcast %54 : vector<1x784xf32> to vector<8x784xf32>
    %59 = arith.mulf %57, %58 : vector<8x784xf32>
    %60 = arith.addf %53, %59 : vector<8x784xf32>
    %61 = vector.extract_strided_slice %3 {offsets = [0, 58], sizes = [1, 784], strides = [1, 1]} : vector<1x842xf32> to vector<1x784xf32>
    %c2_36 = arith.constant 2 : index
    %c2_37 = arith.constant 2 : index
    %c0_38 = arith.constant 0 : index
    %c0_39 = arith.constant 0 : index
    %62 = vector.load %arg2[%c2_36, %c2_37, %c0_38, %c0_39] : memref<3x3x8x1xf32, #tpu.memory_space<vmem>>, vector<1x1x8x1xf32>
    %63 = vector.shape_cast %62 : vector<1x1x8x1xf32> to vector<8x1xf32>
    %64 = vector.broadcast %63 : vector<8x1xf32> to vector<8x784xf32>
    %65 = vector.broadcast %61 : vector<1x784xf32> to vector<8x784xf32>
    %66 = arith.mulf %64, %65 : vector<8x784xf32>
    %67 = arith.addf %60, %66 : vector<8x784xf32>
    %68 = vector.extract_strided_slice %0 {offsets = [1, 0], sizes = [1, 784], strides = [1, 1]} : vector<2x784xf32> to vector<1x784xf32>
    %69 = vector.broadcast %68 : vector<1x784xf32> to vector<8x784xf32>
    %70 = arith.mulf %67, %69 : vector<8x784xf32>
    %71 = arith.addf %47, %70 : vector<8x784xf32>
    %c0_40 = arith.constant 0 : index
    %c0_41 = arith.constant 0 : index
    %72 = vector.load %arg3[%c0_40, %c0_41] : memref<8x1xf32, #tpu.memory_space<vmem>>, vector<8x1xf32>
    %73 = vector.broadcast %72 : vector<8x1xf32> to vector<8x784xf32>
    %74 = arith.addf %71, %73 : vector<8x784xf32>
    %cst = arith.constant 0.000000e+00 : f32
    %75 = vector.broadcast %cst : f32 to vector<8x784xf32>
    %76 = arith.maximumf %74, %75 : vector<8x784xf32>
    %cst_42 = arith.constant 0.000000e+00 : f32
    %77 = vector.broadcast %cst_42 : f32 to vector<8x29xf32>
    %78 = tpu.concatenate %77, %76, %77 in 1 : vector<8x29xf32>, vector<8x784xf32>, vector<8x29xf32> -> vector<8x842xf32>
    %79 = vector.extract_strided_slice %78 {offsets = [0, 0], sizes = [8, 784], strides = [1, 1]} : vector<8x842xf32> to vector<8x784xf32>
    %c0_43 = arith.constant 0 : index
    %c0_44 = arith.constant 0 : index
    %c0_45 = arith.constant 0 : index
    %c0_46 = arith.constant 0 : index
    %80 = vector.load %arg4[%c0_43, %c0_44, %c0_45, %c0_46] : memref<3x3x8x8xf32, #tpu.memory_space<vmem>>, vector<1x1x8x8xf32>
    %81 = vector.shape_cast %80 : vector<1x1x8x8xf32> to vector<8x8xf32>
    %cst_47 = arith.constant dense<0.000000e+00> : vector<8x784xf32>
    %82 = tpu.matmul %81, %79, %cst_47 {dimension_numbers = #tpu.dot_dimension_numbers<[1], [0], [0], [1], [0, 0, 1, 1], [], []>} : vector<8x8xf32>, vector<8x784xf32>, vector<8x784xf32> -> vector<8x784xf32>
    %83 = vector.extract_strided_slice %78 {offsets = [0, 28], sizes = [8, 784], strides = [1, 1]} : vector<8x842xf32> to vector<8x784xf32>
    %c1_48 = arith.constant 1 : index
    %c0_49 = arith.constant 0 : index
    %c0_50 = arith.constant 0 : index
    %c0_51 = arith.constant 0 : index
    %84 = vector.load %arg4[%c1_48, %c0_49, %c0_50, %c0_51] : memref<3x3x8x8xf32, #tpu.memory_space<vmem>>, vector<1x1x8x8xf32>
    %85 = vector.shape_cast %84 : vector<1x1x8x8xf32> to vector<8x8xf32>
    %cst_52 = arith.constant dense<0.000000e+00> : vector<8x784xf32>
    %86 = tpu.matmul %85, %83, %cst_52 {dimension_numbers = #tpu.dot_dimension_numbers<[1], [0], [0], [1], [0, 0, 1, 1], [], []>} : vector<8x8xf32>, vector<8x784xf32>, vector<8x784xf32> -> vector<8x784xf32>
    %87 = arith.addf %82, %86 : vector<8x784xf32>
    %88 = vector.extract_strided_slice %78 {offsets = [0, 56], sizes = [8, 784], strides = [1, 1]} : vector<8x842xf32> to vector<8x784xf32>
    %c2_53 = arith.constant 2 : index
    %c0_54 = arith.constant 0 : index
    %c0_55 = arith.constant 0 : index
    %c0_56 = arith.constant 0 : index
    %89 = vector.load %arg4[%c2_53, %c0_54, %c0_55, %c0_56] : memref<3x3x8x8xf32, #tpu.memory_space<vmem>>, vector<1x1x8x8xf32>
    %90 = vector.shape_cast %89 : vector<1x1x8x8xf32> to vector<8x8xf32>
    %cst_57 = arith.constant dense<0.000000e+00> : vector<8x784xf32>
    %91 = tpu.matmul %90, %88, %cst_57 {dimension_numbers = #tpu.dot_dimension_numbers<[1], [0], [0], [1], [0, 0, 1, 1], [], []>} : vector<8x8xf32>, vector<8x784xf32>, vector<8x784xf32> -> vector<8x784xf32>
    %92 = arith.addf %87, %91 : vector<8x784xf32>
    %93 = vector.extract_strided_slice %0 {offsets = [0, 0], sizes = [1, 784], strides = [1, 1]} : vector<2x784xf32> to vector<1x784xf32>
    %94 = vector.broadcast %93 : vector<1x784xf32> to vector<8x784xf32>
    %95 = arith.mulf %92, %94 : vector<8x784xf32>
    %96 = vector.extract_strided_slice %78 {offsets = [0, 1], sizes = [8, 784], strides = [1, 1]} : vector<8x842xf32> to vector<8x784xf32>
    %c0_58 = arith.constant 0 : index
    %c1_59 = arith.constant 1 : index
    %c0_60 = arith.constant 0 : index
    %c0_61 = arith.constant 0 : index
    %97 = vector.load %arg4[%c0_58, %c1_59, %c0_60, %c0_61] : memref<3x3x8x8xf32, #tpu.memory_space<vmem>>, vector<1x1x8x8xf32>
    %98 = vector.shape_cast %97 : vector<1x1x8x8xf32> to vector<8x8xf32>
    %cst_62 = arith.constant dense<0.000000e+00> : vector<8x784xf32>
    %99 = tpu.matmul %98, %96, %cst_62 {dimension_numbers = #tpu.dot_dimension_numbers<[1], [0], [0], [1], [0, 0, 1, 1], [], []>} : vector<8x8xf32>, vector<8x784xf32>, vector<8x784xf32> -> vector<8x784xf32>
    %100 = vector.extract_strided_slice %78 {offsets = [0, 29], sizes = [8, 784], strides = [1, 1]} : vector<8x842xf32> to vector<8x784xf32>
    %c1_63 = arith.constant 1 : index
    %c1_64 = arith.constant 1 : index
    %c0_65 = arith.constant 0 : index
    %c0_66 = arith.constant 0 : index
    %101 = vector.load %arg4[%c1_63, %c1_64, %c0_65, %c0_66] : memref<3x3x8x8xf32, #tpu.memory_space<vmem>>, vector<1x1x8x8xf32>
    %102 = vector.shape_cast %101 : vector<1x1x8x8xf32> to vector<8x8xf32>
    %cst_67 = arith.constant dense<0.000000e+00> : vector<8x784xf32>
    %103 = tpu.matmul %102, %100, %cst_67 {dimension_numbers = #tpu.dot_dimension_numbers<[1], [0], [0], [1], [0, 0, 1, 1], [], []>} : vector<8x8xf32>, vector<8x784xf32>, vector<8x784xf32> -> vector<8x784xf32>
    %104 = arith.addf %99, %103 : vector<8x784xf32>
    %105 = vector.extract_strided_slice %78 {offsets = [0, 57], sizes = [8, 784], strides = [1, 1]} : vector<8x842xf32> to vector<8x784xf32>
    %c2_68 = arith.constant 2 : index
    %c1_69 = arith.constant 1 : index
    %c0_70 = arith.constant 0 : index
    %c0_71 = arith.constant 0 : index
    %106 = vector.load %arg4[%c2_68, %c1_69, %c0_70, %c0_71] : memref<3x3x8x8xf32, #tpu.memory_space<vmem>>, vector<1x1x8x8xf32>
    %107 = vector.shape_cast %106 : vector<1x1x8x8xf32> to vector<8x8xf32>
    %cst_72 = arith.constant dense<0.000000e+00> : vector<8x784xf32>
    %108 = tpu.matmul %107, %105, %cst_72 {dimension_numbers = #tpu.dot_dimension_numbers<[1], [0], [0], [1], [0, 0, 1, 1], [], []>} : vector<8x8xf32>, vector<8x784xf32>, vector<8x784xf32> -> vector<8x784xf32>
    %109 = arith.addf %104, %108 : vector<8x784xf32>
    %110 = arith.addf %95, %109 : vector<8x784xf32>
    %111 = vector.extract_strided_slice %78 {offsets = [0, 2], sizes = [8, 784], strides = [1, 1]} : vector<8x842xf32> to vector<8x784xf32>
    %c0_73 = arith.constant 0 : index
    %c2_74 = arith.constant 2 : index
    %c0_75 = arith.constant 0 : index
    %c0_76 = arith.constant 0 : index
    %112 = vector.load %arg4[%c0_73, %c2_74, %c0_75, %c0_76] : memref<3x3x8x8xf32, #tpu.memory_space<vmem>>, vector<1x1x8x8xf32>
    %113 = vector.shape_cast %112 : vector<1x1x8x8xf32> to vector<8x8xf32>
    %cst_77 = arith.constant dense<0.000000e+00> : vector<8x784xf32>
    %114 = tpu.matmul %113, %111, %cst_77 {dimension_numbers = #tpu.dot_dimension_numbers<[1], [0], [0], [1], [0, 0, 1, 1], [], []>} : vector<8x8xf32>, vector<8x784xf32>, vector<8x784xf32> -> vector<8x784xf32>
    %115 = vector.extract_strided_slice %78 {offsets = [0, 30], sizes = [8, 784], strides = [1, 1]} : vector<8x842xf32> to vector<8x784xf32>
    %c1_78 = arith.constant 1 : index
    %c2_79 = arith.constant 2 : index
    %c0_80 = arith.constant 0 : index
    %c0_81 = arith.constant 0 : index
    %116 = vector.load %arg4[%c1_78, %c2_79, %c0_80, %c0_81] : memref<3x3x8x8xf32, #tpu.memory_space<vmem>>, vector<1x1x8x8xf32>
    %117 = vector.shape_cast %116 : vector<1x1x8x8xf32> to vector<8x8xf32>
    %cst_82 = arith.constant dense<0.000000e+00> : vector<8x784xf32>
    %118 = tpu.matmul %117, %115, %cst_82 {dimension_numbers = #tpu.dot_dimension_numbers<[1], [0], [0], [1], [0, 0, 1, 1], [], []>} : vector<8x8xf32>, vector<8x784xf32>, vector<8x784xf32> -> vector<8x784xf32>
    %119 = arith.addf %114, %118 : vector<8x784xf32>
    %120 = vector.extract_strided_slice %78 {offsets = [0, 58], sizes = [8, 784], strides = [1, 1]} : vector<8x842xf32> to vector<8x784xf32>
    %c2_83 = arith.constant 2 : index
    %c2_84 = arith.constant 2 : index
    %c0_85 = arith.constant 0 : index
    %c0_86 = arith.constant 0 : index
    %121 = vector.load %arg4[%c2_83, %c2_84, %c0_85, %c0_86] : memref<3x3x8x8xf32, #tpu.memory_space<vmem>>, vector<1x1x8x8xf32>
    %122 = vector.shape_cast %121 : vector<1x1x8x8xf32> to vector<8x8xf32>
    %cst_87 = arith.constant dense<0.000000e+00> : vector<8x784xf32>
    %123 = tpu.matmul %122, %120, %cst_87 {dimension_numbers = #tpu.dot_dimension_numbers<[1], [0], [0], [1], [0, 0, 1, 1], [], []>} : vector<8x8xf32>, vector<8x784xf32>, vector<8x784xf32> -> vector<8x784xf32>
    %124 = arith.addf %119, %123 : vector<8x784xf32>
    %125 = vector.extract_strided_slice %0 {offsets = [1, 0], sizes = [1, 784], strides = [1, 1]} : vector<2x784xf32> to vector<1x784xf32>
    %126 = vector.broadcast %125 : vector<1x784xf32> to vector<8x784xf32>
    %127 = arith.mulf %124, %126 : vector<8x784xf32>
    %128 = arith.addf %110, %127 : vector<8x784xf32>
    %c0_88 = arith.constant 0 : index
    %c0_89 = arith.constant 0 : index
    %129 = vector.load %arg5[%c0_88, %c0_89] : memref<8x1xf32, #tpu.memory_space<vmem>>, vector<8x1xf32>
    %130 = vector.broadcast %129 : vector<8x1xf32> to vector<8x784xf32>
    %131 = arith.addf %128, %130 : vector<8x784xf32>
    %cst_90 = arith.constant 0.000000e+00 : f32
    %132 = vector.broadcast %cst_90 : f32 to vector<8x784xf32>
    %133 = arith.maximumf %131, %132 : vector<8x784xf32>
    %cst_91 = arith.constant 0.000000e+00 : f32
    %134 = vector.broadcast %cst_91 : f32 to vector<8x29xf32>
    %135 = tpu.concatenate %133, %134 in 1 : vector<8x784xf32>, vector<8x29xf32> -> vector<8x813xf32>
    %136 = vector.extract_strided_slice %135 {offsets = [0, 0], sizes = [8, 784], strides = [1, 1]} : vector<8x813xf32> to vector<8x784xf32>
    %137 = vector.extract_strided_slice %135 {offsets = [0, 1], sizes = [8, 784], strides = [1, 1]} : vector<8x813xf32> to vector<8x784xf32>
    %138 = arith.maximumf %136, %137 : vector<8x784xf32>
    %139 = vector.extract_strided_slice %135 {offsets = [0, 28], sizes = [8, 784], strides = [1, 1]} : vector<8x813xf32> to vector<8x784xf32>
    %140 = vector.extract_strided_slice %135 {offsets = [0, 29], sizes = [8, 784], strides = [1, 1]} : vector<8x813xf32> to vector<8x784xf32>
    %141 = arith.maximumf %139, %140 : vector<8x784xf32>
    %142 = arith.maximumf %138, %141 : vector<8x784xf32>
    %c0_92 = arith.constant 0 : index
    %c0_93 = arith.constant 0 : index
    %143 = vector.load %arg12[%c0_92, %c0_93] : memref<784x226xf32, #tpu.memory_space<vmem>>, vector<784x226xf32>
    %cst_94 = arith.constant dense<0.000000e+00> : vector<8x226xf32>
    %144 = tpu.matmul %142, %143, %cst_94 {dimension_numbers = #tpu.dot_dimension_numbers<[1], [0], [0], [1], [0, 0, 1, 1], [], []>} : vector<8x784xf32>, vector<784x226xf32>, vector<8x226xf32> -> vector<8x226xf32>
    %145 = vector.extract_strided_slice %144 {offsets = [0, 0], sizes = [8, 196], strides = [1, 1]} : vector<8x226xf32> to vector<8x196xf32>
    %c0_95 = arith.constant 0 : index
    %c0_96 = arith.constant 0 : index
    %c0_97 = arith.constant 0 : index
    %c0_98 = arith.constant 0 : index
    %146 = vector.load %arg6[%c0_95, %c0_96, %c0_97, %c0_98] : memref<3x3x8x8xf32, #tpu.memory_space<vmem>>, vector<1x1x8x8xf32>
    %147 = vector.shape_cast %146 : vector<1x1x8x8xf32> to vector<8x8xf32>
    %cst_99 = arith.constant dense<0.000000e+00> : vector<8x196xf32>
    %148 = tpu.matmul %147, %145, %cst_99 {dimension_numbers = #tpu.dot_dimension_numbers<[1], [0], [0], [1], [0, 0, 1, 1], [], []>} : vector<8x8xf32>, vector<8x196xf32>, vector<8x196xf32> -> vector<8x196xf32>
    %149 = vector.extract_strided_slice %144 {offsets = [0, 14], sizes = [8, 196], strides = [1, 1]} : vector<8x226xf32> to vector<8x196xf32>
    %c1_100 = arith.constant 1 : index
    %c0_101 = arith.constant 0 : index
    %c0_102 = arith.constant 0 : index
    %c0_103 = arith.constant 0 : index
    %150 = vector.load %arg6[%c1_100, %c0_101, %c0_102, %c0_103] : memref<3x3x8x8xf32, #tpu.memory_space<vmem>>, vector<1x1x8x8xf32>
    %151 = vector.shape_cast %150 : vector<1x1x8x8xf32> to vector<8x8xf32>
    %cst_104 = arith.constant dense<0.000000e+00> : vector<8x196xf32>
    %152 = tpu.matmul %151, %149, %cst_104 {dimension_numbers = #tpu.dot_dimension_numbers<[1], [0], [0], [1], [0, 0, 1, 1], [], []>} : vector<8x8xf32>, vector<8x196xf32>, vector<8x196xf32> -> vector<8x196xf32>
    %153 = arith.addf %148, %152 : vector<8x196xf32>
    %154 = vector.extract_strided_slice %144 {offsets = [0, 28], sizes = [8, 196], strides = [1, 1]} : vector<8x226xf32> to vector<8x196xf32>
    %c2_105 = arith.constant 2 : index
    %c0_106 = arith.constant 0 : index
    %c0_107 = arith.constant 0 : index
    %c0_108 = arith.constant 0 : index
    %155 = vector.load %arg6[%c2_105, %c0_106, %c0_107, %c0_108] : memref<3x3x8x8xf32, #tpu.memory_space<vmem>>, vector<1x1x8x8xf32>
    %156 = vector.shape_cast %155 : vector<1x1x8x8xf32> to vector<8x8xf32>
    %cst_109 = arith.constant dense<0.000000e+00> : vector<8x196xf32>
    %157 = tpu.matmul %156, %154, %cst_109 {dimension_numbers = #tpu.dot_dimension_numbers<[1], [0], [0], [1], [0, 0, 1, 1], [], []>} : vector<8x8xf32>, vector<8x196xf32>, vector<8x196xf32> -> vector<8x196xf32>
    %158 = arith.addf %153, %157 : vector<8x196xf32>
    %159 = vector.extract_strided_slice %1 {offsets = [0, 0], sizes = [1, 196], strides = [1, 1]} : vector<2x196xf32> to vector<1x196xf32>
    %160 = vector.broadcast %159 : vector<1x196xf32> to vector<8x196xf32>
    %161 = arith.mulf %158, %160 : vector<8x196xf32>
    %162 = vector.extract_strided_slice %144 {offsets = [0, 1], sizes = [8, 196], strides = [1, 1]} : vector<8x226xf32> to vector<8x196xf32>
    %c0_110 = arith.constant 0 : index
    %c1_111 = arith.constant 1 : index
    %c0_112 = arith.constant 0 : index
    %c0_113 = arith.constant 0 : index
    %163 = vector.load %arg6[%c0_110, %c1_111, %c0_112, %c0_113] : memref<3x3x8x8xf32, #tpu.memory_space<vmem>>, vector<1x1x8x8xf32>
    %164 = vector.shape_cast %163 : vector<1x1x8x8xf32> to vector<8x8xf32>
    %cst_114 = arith.constant dense<0.000000e+00> : vector<8x196xf32>
    %165 = tpu.matmul %164, %162, %cst_114 {dimension_numbers = #tpu.dot_dimension_numbers<[1], [0], [0], [1], [0, 0, 1, 1], [], []>} : vector<8x8xf32>, vector<8x196xf32>, vector<8x196xf32> -> vector<8x196xf32>
    %166 = vector.extract_strided_slice %144 {offsets = [0, 15], sizes = [8, 196], strides = [1, 1]} : vector<8x226xf32> to vector<8x196xf32>
    %c1_115 = arith.constant 1 : index
    %c1_116 = arith.constant 1 : index
    %c0_117 = arith.constant 0 : index
    %c0_118 = arith.constant 0 : index
    %167 = vector.load %arg6[%c1_115, %c1_116, %c0_117, %c0_118] : memref<3x3x8x8xf32, #tpu.memory_space<vmem>>, vector<1x1x8x8xf32>
    %168 = vector.shape_cast %167 : vector<1x1x8x8xf32> to vector<8x8xf32>
    %cst_119 = arith.constant dense<0.000000e+00> : vector<8x196xf32>
    %169 = tpu.matmul %168, %166, %cst_119 {dimension_numbers = #tpu.dot_dimension_numbers<[1], [0], [0], [1], [0, 0, 1, 1], [], []>} : vector<8x8xf32>, vector<8x196xf32>, vector<8x196xf32> -> vector<8x196xf32>
    %170 = arith.addf %165, %169 : vector<8x196xf32>
    %171 = vector.extract_strided_slice %144 {offsets = [0, 29], sizes = [8, 196], strides = [1, 1]} : vector<8x226xf32> to vector<8x196xf32>
    %c2_120 = arith.constant 2 : index
    %c1_121 = arith.constant 1 : index
    %c0_122 = arith.constant 0 : index
    %c0_123 = arith.constant 0 : index
    %172 = vector.load %arg6[%c2_120, %c1_121, %c0_122, %c0_123] : memref<3x3x8x8xf32, #tpu.memory_space<vmem>>, vector<1x1x8x8xf32>
    %173 = vector.shape_cast %172 : vector<1x1x8x8xf32> to vector<8x8xf32>
    %cst_124 = arith.constant dense<0.000000e+00> : vector<8x196xf32>
    %174 = tpu.matmul %173, %171, %cst_124 {dimension_numbers = #tpu.dot_dimension_numbers<[1], [0], [0], [1], [0, 0, 1, 1], [], []>} : vector<8x8xf32>, vector<8x196xf32>, vector<8x196xf32> -> vector<8x196xf32>
    %175 = arith.addf %170, %174 : vector<8x196xf32>
    %176 = arith.addf %161, %175 : vector<8x196xf32>
    %177 = vector.extract_strided_slice %144 {offsets = [0, 2], sizes = [8, 196], strides = [1, 1]} : vector<8x226xf32> to vector<8x196xf32>
    %c0_125 = arith.constant 0 : index
    %c2_126 = arith.constant 2 : index
    %c0_127 = arith.constant 0 : index
    %c0_128 = arith.constant 0 : index
    %178 = vector.load %arg6[%c0_125, %c2_126, %c0_127, %c0_128] : memref<3x3x8x8xf32, #tpu.memory_space<vmem>>, vector<1x1x8x8xf32>
    %179 = vector.shape_cast %178 : vector<1x1x8x8xf32> to vector<8x8xf32>
    %cst_129 = arith.constant dense<0.000000e+00> : vector<8x196xf32>
    %180 = tpu.matmul %179, %177, %cst_129 {dimension_numbers = #tpu.dot_dimension_numbers<[1], [0], [0], [1], [0, 0, 1, 1], [], []>} : vector<8x8xf32>, vector<8x196xf32>, vector<8x196xf32> -> vector<8x196xf32>
    %181 = vector.extract_strided_slice %144 {offsets = [0, 16], sizes = [8, 196], strides = [1, 1]} : vector<8x226xf32> to vector<8x196xf32>
    %c1_130 = arith.constant 1 : index
    %c2_131 = arith.constant 2 : index
    %c0_132 = arith.constant 0 : index
    %c0_133 = arith.constant 0 : index
    %182 = vector.load %arg6[%c1_130, %c2_131, %c0_132, %c0_133] : memref<3x3x8x8xf32, #tpu.memory_space<vmem>>, vector<1x1x8x8xf32>
    %183 = vector.shape_cast %182 : vector<1x1x8x8xf32> to vector<8x8xf32>
    %cst_134 = arith.constant dense<0.000000e+00> : vector<8x196xf32>
    %184 = tpu.matmul %183, %181, %cst_134 {dimension_numbers = #tpu.dot_dimension_numbers<[1], [0], [0], [1], [0, 0, 1, 1], [], []>} : vector<8x8xf32>, vector<8x196xf32>, vector<8x196xf32> -> vector<8x196xf32>
    %185 = arith.addf %180, %184 : vector<8x196xf32>
    %186 = vector.extract_strided_slice %144 {offsets = [0, 30], sizes = [8, 196], strides = [1, 1]} : vector<8x226xf32> to vector<8x196xf32>
    %c2_135 = arith.constant 2 : index
    %c2_136 = arith.constant 2 : index
    %c0_137 = arith.constant 0 : index
    %c0_138 = arith.constant 0 : index
    %187 = vector.load %arg6[%c2_135, %c2_136, %c0_137, %c0_138] : memref<3x3x8x8xf32, #tpu.memory_space<vmem>>, vector<1x1x8x8xf32>
    %188 = vector.shape_cast %187 : vector<1x1x8x8xf32> to vector<8x8xf32>
    %cst_139 = arith.constant dense<0.000000e+00> : vector<8x196xf32>
    %189 = tpu.matmul %188, %186, %cst_139 {dimension_numbers = #tpu.dot_dimension_numbers<[1], [0], [0], [1], [0, 0, 1, 1], [], []>} : vector<8x8xf32>, vector<8x196xf32>, vector<8x196xf32> -> vector<8x196xf32>
    %190 = arith.addf %185, %189 : vector<8x196xf32>
    %191 = vector.extract_strided_slice %1 {offsets = [1, 0], sizes = [1, 196], strides = [1, 1]} : vector<2x196xf32> to vector<1x196xf32>
    %192 = vector.broadcast %191 : vector<1x196xf32> to vector<8x196xf32>
    %193 = arith.mulf %190, %192 : vector<8x196xf32>
    %194 = arith.addf %176, %193 : vector<8x196xf32>
    %c0_140 = arith.constant 0 : index
    %c0_141 = arith.constant 0 : index
    %195 = vector.load %arg7[%c0_140, %c0_141] : memref<8x1xf32, #tpu.memory_space<vmem>>, vector<8x1xf32>
    %196 = vector.broadcast %195 : vector<8x1xf32> to vector<8x196xf32>
    %197 = arith.addf %194, %196 : vector<8x196xf32>
    %cst_142 = arith.constant 0.000000e+00 : f32
    %198 = vector.broadcast %cst_142 : f32 to vector<8x196xf32>
    %199 = arith.maximumf %197, %198 : vector<8x196xf32>
    %cst_143 = arith.constant 0.000000e+00 : f32
    %200 = vector.broadcast %cst_143 : f32 to vector<8x15xf32>
    %201 = tpu.concatenate %200, %199, %200 in 1 : vector<8x15xf32>, vector<8x196xf32>, vector<8x15xf32> -> vector<8x226xf32>
    %202 = vector.extract_strided_slice %201 {offsets = [0, 0], sizes = [8, 196], strides = [1, 1]} : vector<8x226xf32> to vector<8x196xf32>
    %c0_144 = arith.constant 0 : index
    %c0_145 = arith.constant 0 : index
    %c0_146 = arith.constant 0 : index
    %c0_147 = arith.constant 0 : index
    %203 = vector.load %arg8[%c0_144, %c0_145, %c0_146, %c0_147] : memref<3x3x8x8xf32, #tpu.memory_space<vmem>>, vector<1x1x8x8xf32>
    %204 = vector.shape_cast %203 : vector<1x1x8x8xf32> to vector<8x8xf32>
    %cst_148 = arith.constant dense<0.000000e+00> : vector<8x196xf32>
    %205 = tpu.matmul %204, %202, %cst_148 {dimension_numbers = #tpu.dot_dimension_numbers<[1], [0], [0], [1], [0, 0, 1, 1], [], []>} : vector<8x8xf32>, vector<8x196xf32>, vector<8x196xf32> -> vector<8x196xf32>
    %206 = vector.extract_strided_slice %201 {offsets = [0, 14], sizes = [8, 196], strides = [1, 1]} : vector<8x226xf32> to vector<8x196xf32>
    %c1_149 = arith.constant 1 : index
    %c0_150 = arith.constant 0 : index
    %c0_151 = arith.constant 0 : index
    %c0_152 = arith.constant 0 : index
    %207 = vector.load %arg8[%c1_149, %c0_150, %c0_151, %c0_152] : memref<3x3x8x8xf32, #tpu.memory_space<vmem>>, vector<1x1x8x8xf32>
    %208 = vector.shape_cast %207 : vector<1x1x8x8xf32> to vector<8x8xf32>
    %cst_153 = arith.constant dense<0.000000e+00> : vector<8x196xf32>
    %209 = tpu.matmul %208, %206, %cst_153 {dimension_numbers = #tpu.dot_dimension_numbers<[1], [0], [0], [1], [0, 0, 1, 1], [], []>} : vector<8x8xf32>, vector<8x196xf32>, vector<8x196xf32> -> vector<8x196xf32>
    %210 = arith.addf %205, %209 : vector<8x196xf32>
    %211 = vector.extract_strided_slice %201 {offsets = [0, 28], sizes = [8, 196], strides = [1, 1]} : vector<8x226xf32> to vector<8x196xf32>
    %c2_154 = arith.constant 2 : index
    %c0_155 = arith.constant 0 : index
    %c0_156 = arith.constant 0 : index
    %c0_157 = arith.constant 0 : index
    %212 = vector.load %arg8[%c2_154, %c0_155, %c0_156, %c0_157] : memref<3x3x8x8xf32, #tpu.memory_space<vmem>>, vector<1x1x8x8xf32>
    %213 = vector.shape_cast %212 : vector<1x1x8x8xf32> to vector<8x8xf32>
    %cst_158 = arith.constant dense<0.000000e+00> : vector<8x196xf32>
    %214 = tpu.matmul %213, %211, %cst_158 {dimension_numbers = #tpu.dot_dimension_numbers<[1], [0], [0], [1], [0, 0, 1, 1], [], []>} : vector<8x8xf32>, vector<8x196xf32>, vector<8x196xf32> -> vector<8x196xf32>
    %215 = arith.addf %210, %214 : vector<8x196xf32>
    %216 = vector.extract_strided_slice %1 {offsets = [0, 0], sizes = [1, 196], strides = [1, 1]} : vector<2x196xf32> to vector<1x196xf32>
    %217 = vector.broadcast %216 : vector<1x196xf32> to vector<8x196xf32>
    %218 = arith.mulf %215, %217 : vector<8x196xf32>
    %219 = vector.extract_strided_slice %201 {offsets = [0, 1], sizes = [8, 196], strides = [1, 1]} : vector<8x226xf32> to vector<8x196xf32>
    %c0_159 = arith.constant 0 : index
    %c1_160 = arith.constant 1 : index
    %c0_161 = arith.constant 0 : index
    %c0_162 = arith.constant 0 : index
    %220 = vector.load %arg8[%c0_159, %c1_160, %c0_161, %c0_162] : memref<3x3x8x8xf32, #tpu.memory_space<vmem>>, vector<1x1x8x8xf32>
    %221 = vector.shape_cast %220 : vector<1x1x8x8xf32> to vector<8x8xf32>
    %cst_163 = arith.constant dense<0.000000e+00> : vector<8x196xf32>
    %222 = tpu.matmul %221, %219, %cst_163 {dimension_numbers = #tpu.dot_dimension_numbers<[1], [0], [0], [1], [0, 0, 1, 1], [], []>} : vector<8x8xf32>, vector<8x196xf32>, vector<8x196xf32> -> vector<8x196xf32>
    %223 = vector.extract_strided_slice %201 {offsets = [0, 15], sizes = [8, 196], strides = [1, 1]} : vector<8x226xf32> to vector<8x196xf32>
    %c1_164 = arith.constant 1 : index
    %c1_165 = arith.constant 1 : index
    %c0_166 = arith.constant 0 : index
    %c0_167 = arith.constant 0 : index
    %224 = vector.load %arg8[%c1_164, %c1_165, %c0_166, %c0_167] : memref<3x3x8x8xf32, #tpu.memory_space<vmem>>, vector<1x1x8x8xf32>
    %225 = vector.shape_cast %224 : vector<1x1x8x8xf32> to vector<8x8xf32>
    %cst_168 = arith.constant dense<0.000000e+00> : vector<8x196xf32>
    %226 = tpu.matmul %225, %223, %cst_168 {dimension_numbers = #tpu.dot_dimension_numbers<[1], [0], [0], [1], [0, 0, 1, 1], [], []>} : vector<8x8xf32>, vector<8x196xf32>, vector<8x196xf32> -> vector<8x196xf32>
    %227 = arith.addf %222, %226 : vector<8x196xf32>
    %228 = vector.extract_strided_slice %201 {offsets = [0, 29], sizes = [8, 196], strides = [1, 1]} : vector<8x226xf32> to vector<8x196xf32>
    %c2_169 = arith.constant 2 : index
    %c1_170 = arith.constant 1 : index
    %c0_171 = arith.constant 0 : index
    %c0_172 = arith.constant 0 : index
    %229 = vector.load %arg8[%c2_169, %c1_170, %c0_171, %c0_172] : memref<3x3x8x8xf32, #tpu.memory_space<vmem>>, vector<1x1x8x8xf32>
    %230 = vector.shape_cast %229 : vector<1x1x8x8xf32> to vector<8x8xf32>
    %cst_173 = arith.constant dense<0.000000e+00> : vector<8x196xf32>
    %231 = tpu.matmul %230, %228, %cst_173 {dimension_numbers = #tpu.dot_dimension_numbers<[1], [0], [0], [1], [0, 0, 1, 1], [], []>} : vector<8x8xf32>, vector<8x196xf32>, vector<8x196xf32> -> vector<8x196xf32>
    %232 = arith.addf %227, %231 : vector<8x196xf32>
    %233 = arith.addf %218, %232 : vector<8x196xf32>
    %234 = vector.extract_strided_slice %201 {offsets = [0, 2], sizes = [8, 196], strides = [1, 1]} : vector<8x226xf32> to vector<8x196xf32>
    %c0_174 = arith.constant 0 : index
    %c2_175 = arith.constant 2 : index
    %c0_176 = arith.constant 0 : index
    %c0_177 = arith.constant 0 : index
    %235 = vector.load %arg8[%c0_174, %c2_175, %c0_176, %c0_177] : memref<3x3x8x8xf32, #tpu.memory_space<vmem>>, vector<1x1x8x8xf32>
    %236 = vector.shape_cast %235 : vector<1x1x8x8xf32> to vector<8x8xf32>
    %cst_178 = arith.constant dense<0.000000e+00> : vector<8x196xf32>
    %237 = tpu.matmul %236, %234, %cst_178 {dimension_numbers = #tpu.dot_dimension_numbers<[1], [0], [0], [1], [0, 0, 1, 1], [], []>} : vector<8x8xf32>, vector<8x196xf32>, vector<8x196xf32> -> vector<8x196xf32>
    %238 = vector.extract_strided_slice %201 {offsets = [0, 16], sizes = [8, 196], strides = [1, 1]} : vector<8x226xf32> to vector<8x196xf32>
    %c1_179 = arith.constant 1 : index
    %c2_180 = arith.constant 2 : index
    %c0_181 = arith.constant 0 : index
    %c0_182 = arith.constant 0 : index
    %239 = vector.load %arg8[%c1_179, %c2_180, %c0_181, %c0_182] : memref<3x3x8x8xf32, #tpu.memory_space<vmem>>, vector<1x1x8x8xf32>
    %240 = vector.shape_cast %239 : vector<1x1x8x8xf32> to vector<8x8xf32>
    %cst_183 = arith.constant dense<0.000000e+00> : vector<8x196xf32>
    %241 = tpu.matmul %240, %238, %cst_183 {dimension_numbers = #tpu.dot_dimension_numbers<[1], [0], [0], [1], [0, 0, 1, 1], [], []>} : vector<8x8xf32>, vector<8x196xf32>, vector<8x196xf32> -> vector<8x196xf32>
    %242 = arith.addf %237, %241 : vector<8x196xf32>
    %243 = vector.extract_strided_slice %201 {offsets = [0, 30], sizes = [8, 196], strides = [1, 1]} : vector<8x226xf32> to vector<8x196xf32>
    %c2_184 = arith.constant 2 : index
    %c2_185 = arith.constant 2 : index
    %c0_186 = arith.constant 0 : index
    %c0_187 = arith.constant 0 : index
    %244 = vector.load %arg8[%c2_184, %c2_185, %c0_186, %c0_187] : memref<3x3x8x8xf32, #tpu.memory_space<vmem>>, vector<1x1x8x8xf32>
    %245 = vector.shape_cast %244 : vector<1x1x8x8xf32> to vector<8x8xf32>
    %cst_188 = arith.constant dense<0.000000e+00> : vector<8x196xf32>
    %246 = tpu.matmul %245, %243, %cst_188 {dimension_numbers = #tpu.dot_dimension_numbers<[1], [0], [0], [1], [0, 0, 1, 1], [], []>} : vector<8x8xf32>, vector<8x196xf32>, vector<8x196xf32> -> vector<8x196xf32>
    %247 = arith.addf %242, %246 : vector<8x196xf32>
    %248 = vector.extract_strided_slice %1 {offsets = [1, 0], sizes = [1, 196], strides = [1, 1]} : vector<2x196xf32> to vector<1x196xf32>
    %249 = vector.broadcast %248 : vector<1x196xf32> to vector<8x196xf32>
    %250 = arith.mulf %247, %249 : vector<8x196xf32>
    %251 = arith.addf %233, %250 : vector<8x196xf32>
    %c0_189 = arith.constant 0 : index
    %c0_190 = arith.constant 0 : index
    %252 = vector.load %arg9[%c0_189, %c0_190] : memref<8x1xf32, #tpu.memory_space<vmem>>, vector<8x1xf32>
    %253 = vector.broadcast %252 : vector<8x1xf32> to vector<8x196xf32>
    %254 = arith.addf %251, %253 : vector<8x196xf32>
    %cst_191 = arith.constant 0.000000e+00 : f32
    %255 = vector.broadcast %cst_191 : f32 to vector<8x196xf32>
    %256 = arith.maximumf %254, %255 : vector<8x196xf32>
    %cst_192 = arith.constant 0.000000e+00 : f32
    %257 = vector.broadcast %cst_192 : f32 to vector<8x15xf32>
    %258 = tpu.concatenate %256, %257 in 1 : vector<8x196xf32>, vector<8x15xf32> -> vector<8x211xf32>
    %259 = vector.extract_strided_slice %258 {offsets = [0, 0], sizes = [8, 196], strides = [1, 1]} : vector<8x211xf32> to vector<8x196xf32>
    %260 = vector.extract_strided_slice %258 {offsets = [0, 1], sizes = [8, 196], strides = [1, 1]} : vector<8x211xf32> to vector<8x196xf32>
    %261 = arith.maximumf %259, %260 : vector<8x196xf32>
    %262 = vector.extract_strided_slice %258 {offsets = [0, 14], sizes = [8, 196], strides = [1, 1]} : vector<8x211xf32> to vector<8x196xf32>
    %263 = vector.extract_strided_slice %258 {offsets = [0, 15], sizes = [8, 196], strides = [1, 1]} : vector<8x211xf32> to vector<8x196xf32>
    %264 = arith.maximumf %262, %263 : vector<8x196xf32>
    %265 = arith.maximumf %261, %264 : vector<8x196xf32>
    %c0_193 = arith.constant 0 : index
    %c0_194 = arith.constant 0 : index
    %266 = vector.load %arg13[%c0_193, %c0_194] : memref<196x49xf32, #tpu.memory_space<vmem>>, vector<196x49xf32>
    %cst_195 = arith.constant dense<0.000000e+00> : vector<8x49xf32>
    %267 = tpu.matmul %265, %266, %cst_195 {dimension_numbers = #tpu.dot_dimension_numbers<[1], [0], [0], [1], [0, 0, 1, 1], [], []>} : vector<8x196xf32>, vector<196x49xf32>, vector<8x49xf32> -> vector<8x49xf32>
    %268 = vector.extract_strided_slice %267 {offsets = [0, 0], sizes = [1, 49], strides = [1, 1]} : vector<8x49xf32> to vector<1x49xf32>
    %269 = vector.extract_strided_slice %267 {offsets = [1, 0], sizes = [1, 49], strides = [1, 1]} : vector<8x49xf32> to vector<1x49xf32>
    %270 = vector.extract_strided_slice %267 {offsets = [2, 0], sizes = [1, 49], strides = [1, 1]} : vector<8x49xf32> to vector<1x49xf32>
    %271 = vector.extract_strided_slice %267 {offsets = [3, 0], sizes = [1, 49], strides = [1, 1]} : vector<8x49xf32> to vector<1x49xf32>
    %272 = vector.extract_strided_slice %267 {offsets = [4, 0], sizes = [1, 49], strides = [1, 1]} : vector<8x49xf32> to vector<1x49xf32>
    %273 = vector.extract_strided_slice %267 {offsets = [5, 0], sizes = [1, 49], strides = [1, 1]} : vector<8x49xf32> to vector<1x49xf32>
    %274 = vector.extract_strided_slice %267 {offsets = [6, 0], sizes = [1, 49], strides = [1, 1]} : vector<8x49xf32> to vector<1x49xf32>
    %275 = vector.extract_strided_slice %267 {offsets = [7, 0], sizes = [1, 49], strides = [1, 1]} : vector<8x49xf32> to vector<1x49xf32>
    %276 = tpu.concatenate %268, %269, %270, %271, %272, %273, %274, %275 in 1 : vector<1x49xf32>, vector<1x49xf32>, vector<1x49xf32>, vector<1x49xf32>, vector<1x49xf32>, vector<1x49xf32>, vector<1x49xf32>, vector<1x49xf32> -> vector<1x392xf32>
    %c0_196 = arith.constant 0 : index
    %c0_197 = arith.constant 0 : index
    %277 = vector.load %arg10[%c0_196, %c0_197] : memref<392x10xf32, #tpu.memory_space<vmem>>, vector<392x10xf32>
    %cst_198 = arith.constant dense<0.000000e+00> : vector<1x10xf32>
    %278 = tpu.matmul %276, %277, %cst_198 {dimension_numbers = #tpu.dot_dimension_numbers<[1], [0], [0], [1], [0, 0, 1, 1], [], []>} : vector<1x392xf32>, vector<392x10xf32>, vector<1x10xf32> -> vector<1x10xf32>
    %c0_199 = arith.constant 0 : index
    %c0_200 = arith.constant 0 : index
    %279 = vector.load %arg11[%c0_199, %c0_200] : memref<1x10xf32, #tpu.memory_space<vmem>>, vector<1x10xf32>
    %280 = arith.addf %278, %279 : vector<1x10xf32>
    %281 = vector.shape_cast %280 : vector<1x10xf32> to vector<1x1x10xf32>
    %c0_201 = arith.constant 0 : index
    %c0_202 = arith.constant 0 : index
    %c0_203 = arith.constant 0 : index
    %282 = vector.load %arg16[%c0_201, %c0_202, %c0_203] : memref<1x1x10xf32, #tpu.memory_space<vmem>>, vector<1x1x10xf32>
    tpu.vector_store %arg16[%c0_201, %c0_202, %c0_203], %281 {strides = array<i32>} : memref<1x1x10xf32, #tpu.memory_space<vmem>>, vector<1x1x10xf32>,
    return
  }
  func.func @transform_0(%arg0: i32) -> (i32, i32, i32) {
    %c0_i32 = arith.constant 0 : i32
    %c0_i32_0 = arith.constant 0 : i32
    %c0_i32_1 = arith.constant 0 : i32
    return %arg0, %c0_i32, %c0_i32_0 : i32, i32, i32
  }
  func.func @transform_1(%arg0: i32) -> (i32, i32, i32, i32) {
    %c0_i32 = arith.constant 0 : i32
    %c0_i32_0 = arith.constant 0 : i32
    %c0_i32_1 = arith.constant 0 : i32
    %c0_i32_2 = arith.constant 0 : i32
    %c0_i32_3 = arith.constant 0 : i32
    return %c0_i32, %c0_i32_0, %c0_i32_1, %c0_i32_2 : i32, i32, i32, i32
  }
  func.func @transform_2(%arg0: i32) -> (i32, i32) {
    %c0_i32 = arith.constant 0 : i32
    %c0_i32_0 = arith.constant 0 : i32
    %c0_i32_1 = arith.constant 0 : i32
    return %c0_i32, %c0_i32_0 : i32, i32
  }
  func.func @transform_3(%arg0: i32) -> (i32, i32, i32, i32) {
    %c0_i32 = arith.constant 0 : i32
    %c0_i32_0 = arith.constant 0 : i32
    %c0_i32_1 = arith.constant 0 : i32
    %c0_i32_2 = arith.constant 0 : i32
    %c0_i32_3 = arith.constant 0 : i32
    return %c0_i32, %c0_i32_0, %c0_i32_1, %c0_i32_2 : i32, i32, i32, i32
  }
  func.func @transform_4(%arg0: i32) -> (i32, i32) {
    %c0_i32 = arith.constant 0 : i32
    %c0_i32_0 = arith.constant 0 : i32
    %c0_i32_1 = arith.constant 0 : i32
    return %c0_i32, %c0_i32_0 : i32, i32
  }
  func.func @transform_5(%arg0: i32) -> (i32, i32, i32, i32) {
    %c0_i32 = arith.constant 0 : i32
    %c0_i32_0 = arith.constant 0 : i32
    %c0_i32_1 = arith.constant 0 : i32
    %c0_i32_2 = arith.constant 0 : i32
    %c0_i32_3 = arith.constant 0 : i32
    return %c0_i32, %c0_i32_0, %c0_i32_1, %c0_i32_2 : i32, i32, i32, i32
  }
  func.func @transform_6(%arg0: i32) -> (i32, i32) {
    %c0_i32 = arith.constant 0 : i32
    %c0_i32_0 = arith.constant 0 : i32
    %c0_i32_1 = arith.constant 0 : i32
    return %c0_i32, %c0_i32_0 : i32, i32
  }
  func.func @transform_7(%arg0: i32) -> (i32, i32, i32, i32) {
    %c0_i32 = arith.constant 0 : i32
    %c0_i32_0 = arith.constant 0 : i32
    %c0_i32_1 = arith.constant 0 : i32
    %c0_i32_2 = arith.constant 0 : i32
    %c0_i32_3 = arith.constant 0 : i32
    return %c0_i32, %c0_i32_0, %c0_i32_1, %c0_i32_2 : i32, i32, i32, i32
  }
  func.func @transform_8(%arg0: i32) -> (i32, i32) {
    %c0_i32 = arith.constant 0 : i32
    %c0_i32_0 = arith.constant 0 : i32
    %c0_i32_1 = arith.constant 0 : i32
    return %c0_i32, %c0_i32_0 : i32, i32
  }
  func.func @transform_9(%arg0: i32) -> (i32, i32) {
    %c0_i32 = arith.constant 0 : i32
    %c0_i32_0 = arith.constant 0 : i32
    %c0_i32_1 = arith.constant 0 : i32
    return %c0_i32, %c0_i32_0 : i32, i32
  }
  func.func @transform_10(%arg0: i32) -> (i32, i32) {
    %c0_i32 = arith.constant 0 : i32
    %c0_i32_0 = arith.constant 0 : i32
    %c0_i32_1 = arith.constant 0 : i32
    return %c0_i32, %c0_i32_0 : i32, i32
  }
  func.func @transform_11(%arg0: i32) -> (i32, i32) {
    %c0_i32 = arith.constant 0 : i32
    %c0_i32_0 = arith.constant 0 : i32
    %c0_i32_1 = arith.constant 0 : i32
    return %c0_i32, %c0_i32_0 : i32, i32
  }
  func.func @transform_12(%arg0: i32) -> (i32, i32) {
    %c0_i32 = arith.constant 0 : i32
    %c0_i32_0 = arith.constant 0 : i32
    %c0_i32_1 = arith.constant 0 : i32
    return %c0_i32, %c0_i32_0 : i32, i32
  }
  func.func @transform_13(%arg0: i32) -> (i32, i32) {
    %c0_i32 = arith.constant 0 : i32
    %c0_i32_0 = arith.constant 0 : i32
    %c0_i32_1 = arith.constant 0 : i32
    return %c0_i32, %c0_i32_0 : i32, i32
  }
  func.func @transform_14(%arg0: i32) -> (i32, i32) {
    %c0_i32 = arith.constant 0 : i32
    %c0_i32_0 = arith.constant 0 : i32
    %c0_i32_1 = arith.constant 0 : i32
    return %c0_i32, %c0_i32_0 : i32, i32
  }
  func.func @transform_15(%arg0: i32) -> (i32, i32, i32) {
    %c0_i32 = arith.constant 0 : i32
    %c0_i32_0 = arith.constant 0 : i32
    %c0_i32_1 = arith.constant 0 : i32
    return %arg0, %c0_i32, %c0_i32_0 : i32, i32, i32
  }
}

</mosaic_0001>

<bundles_post_ra>
// kernel: tpu_custom_call.1
= control target key start
LH: loop header
LB: loop body
LE: loop exit
PB: predicated region body
PF: predicated region fallthrough
CT: control target
= control target key end

     0   :  { %s9109_s0 = inlined_call_operand.vmem [shape: f32[2,1,842], index: 0, kind: input, shape index: {}]   ;;  %s9110_s1 = inlined_call_operand.vmem [shape: f32[3,3,8,1], index: 1, kind: input, shape index: {}]   ;;  %s9111_s2 = inlined_call_operand.vmem [shape: f32[8,1], index: 2, kind: input, shape index: {}]   ;;  %s9112_s3 = inlined_call_operand.vmem [shape: f32[3,3,8,8], index: 3, kind: input, shape index: {}]   ;;  %s9113_s4 = inlined_call_operand.vmem [shape: f32[8,1], index: 4, kind: input, shape index: {}]   ;;  %s9114_s5 = inlined_call_operand.vmem [shape: f32[3,3,8,8], index: 5, kind: input, shape index: {}]   ;;  %s9115_s6 = inlined_call_operand.vmem [shape: f32[8,1], index: 6, kind: input, shape index: {}]   ;;  %s9116_s7 = inlined_call_operand.vmem [shape: f32[3,3,8,8], index: 7, kind: input, shape index: {}]   ;;  %s9117_s8 = inlined_call_operand.vmem [shape: f32[8,1], index: 8, kind: input, shape index: {}]   ;;  %s9118_s9 = inlined_call_operand.vmem [shape: f32[392,10], index: 9, kind: input, shape index: {}]   ;;  %s9119_s10 = inlined_call_operand.vmem [shape: f32[1,10], index: 10, kind: input, shape index: {}]   ;;  %s9120_s11 = inlined_call_operand.hbm [shape: f32[784,226], index: 11, kind: input, shape index: {}]   ;;  %s9121_s12 = inlined_call_operand.vmem [shape: f32[196,49], index: 12, kind: input, shape index: {}]   ;;  %s9122_s13 = inlined_call_operand.vmem [shape: f32[2,784], index: 13, kind: input, shape index: {}]   ;;  %s9123_s14 = inlined_call_operand.vmem [shape: f32[2,196], index: 14, kind: input, shape index: {}]   ;;  %s9124_s15 = inlined_call_operand.hbm [shape: f32[2,1,10], index: 15, kind: output, shape index: {}]  }
   0x1   :  { %9138 = sst [smem:[#allocation13_spill]] %s9109_s0 }
   0x2   :  { %20 = vsyncpa [#allocation3], 0 }
   0x3   :  { %21 = vsyncpa [#allocation4], 0 }
   0x4   :  { %23 = vsyncpa [#allocation4 + $0x1], 0  ;;  %s7583_s18 = smov 0   ;;  %s7585_s19 = smov 0  }
   0x5   :  { %s7587_s20 = smov 0   ;;  %s7589_s21 = smov 0  }
   0x6 LB: > { %9139 = sst [smem:[#allocation8_spill]] %s7461_s18  ;;  %s7604_s22 = sadd.s32 4294967295, %s7473_s21   ;;  %s7473_s21 = sphi %s7589_s21, %s9159_s21   ;;  %s7469_s20 = sphi %s7587_s20, %s9161_s20   ;;  %s7465_s19 = sphi %s7585_s19, %s9163_s19   ;;  %s7461_s18 = sphi %s7583_s18, %s9162_s18  }
   0x7   : > { %9140 = sst [smem:[#allocation9_spill]] %s7469_s20  ;;  %s6710_s23 = sadd.s32 4294967294, %s7473_s21  }
   0x8   : > { %s7608_s24 = sadd.s32 1, %s7473_s21   ;;  %s356_s25 = sadd.s32 1, %s7469_s20 }
   0x9   : > { %9141 = sst [smem:[#allocation10_spill]] %s7608_s24  ;;  %s353_s26 = ssub.s32 %s7473_s21, %s7608_s24 }
   0xa   : > { %p366_p0 = scmp.ne.s32.totalorder %s7469_s20, %s7465_s19  ;;  %p354_p1 = scmp.eq.s32.totalorder %s353_s26, 0 }
   0xb   : > { %p367_p2 = scmp.eq.s32.totalorder %s7604_s22, 1  ;;  %p372_p3 = scmp.ne.s32.totalorder %s7465_s19, %s7461_s18 }
   0xc   : > { %p373_p4 = scmp.eq.s32.totalorder %s6710_s23, 1  ;;  %p6711_p7 = scmp.ge.s32.totalorder %s7473_s21, 1 }
   0xd   : > { %s7619_s27 = scalar_select %p354_p1, %s7469_s20, %s356_s25  }
   0xe   : > { %p7621_p5 = por %p367_p2, %p366_p0  ;;  %p7625_p6 = por %p373_p4, %p372_p3 }
   0xf   : > { %9142 = sst [smem:[#allocation11_spill]] %s7619_s27  ;;  %p380_p8 = scmp.lt.s32.totalorder %s7473_s21, 3 }
  0x10   : > { %s9143_s28 = scalar_select %p7621_p5, 1, 0 }
  0x11   : > { %s9144_s29 = scalar_select %p7625_p6, 1, 0 }
  0x12   : > { %p9130_p9 = scmp.eq.s32.totalorder %s7604_s22, 0  ;;  %p7632_p10 = pnand %p6711_p7, %p380_p8 }
  0x13   : > { %9145 = sst [smem:[#allocation12_spill]] %s9144_s29  ;;  %s7475_s16 = smov [#allocation2]  }
  0x14   : > { %s9146_s30 = scalar_select %p7632_p10, 1, 0 }
  0x15   : > { %s422_s17 = sshll.u32 %s7475_s16, 4  ;;  %p7282_p11 = pneg %p7632_p10  ;;  %s423_s17 = int_to_ptr.vmem [resolvable:$true] %s422_s17 }
  0x16   : > { %s7379_s27 = scalar_lea.hbm %s9120_s11, 25088 }
  0x17   : > { %p7640_p12 = pnand %p9130_p9, %p7282_p11  ;;  %p7380_p13 = scmp.ne.s32.totalorder %s9120_s11, %s7379_s27 }
  0x18   : > { %p7386_p3 = scmp.lt.u32.totalorder %s7379_s27, %s9120_s11 }
  0x19   : > { %p7381_p0 = pneg %p7640_p12 }
  0x1b   : > { %p7382_p1 = pnand %p7381_p0, %p7380_p13 }
  0x1d   : > { %p7383_p2 = pneg %p7382_p1 }
  0x1f   : > { %p7388_p4 = pnand %p7386_p3, %p7383_p2 }
  0x21   : > { %7391 = shalt.err (!%p7388_p4)
}
  0x22   : > { %s7392_s18 = scalar_lea.vmem %s423_s17, 25088  ;;  %p7400_p9 = scmp.lt.s32.totalorder %s423_s17, %s423_s17 }
  0x23   : > { %p7393_p7 = scmp.ne.s32.totalorder %s423_s17, %s7392_s18  ;;  %p7401_p6 = scmp.lt.s32.totalorder %s7392_s18, %s7392_s18 }
  0x25   : > { %p7395_p8 = pnand %p7393_p7, %p7381_p0  ;;  %p7402_p5 = por %p7401_p6, %p7400_p9 }
  0x27   : > { %p7396_p11 = pneg %p7395_p8 }
  0x29   : > { %p7403_p10 = pnand %p7402_p5, %p7396_p11 }
  0x2b   : > { %7406 = shalt.err (!%p7403_p10)
}
  0x2c   : > { %s7476_s20 = smov 256   ;;  %s7477_s24 = smov 16  }
  0x2d   : > { %7285 = dma.hbm_to_vmem [thread:$0]  (!%p7640_p12), %s9120_s11, 25088, %s423_s17, [#allocation3], %s7476_s20, %s7476_s20, %s7477_s24  }
  0x2e   : > { %p9148_p13 = scmp.ne.s32.totalorder %s9146_s30, 0 }
  0x2f   : > { %p9149_p1 = scmp.eq.s32.totalorder (!%p9148_p13), %s7604_s22, 0 }
  0x30   : > { %454 = sbr.rel (%p9148_p13) target bundleno = 3444 (0xd74), region = 80 }
  0x37   : > { %7452 = dma.done.wait (%p9149_p1), [#allocation3], 25088   ;;  %p9150_p0 = pmov %p9149_p1 }
  0x38   : > { %v7478_v0 = vmov 0   ;;  %v515_v1 = vlaneseq  ;;  %v6719_v2 = vld [vmem:[%s9110_s1 + $0x20] sm:$0xff]  ;;  %v6720_v3 = vld [vmem:[%s9110_s1 + $0x38] sm:$0xff]  ;;  %v6722_v5 = vld [vmem:[%s9110_s1 + $0x28] sm:$0xff]  ;;  %s7479_s20 = smov 2   ;;  %p500_p5 = scmp.lt.s32.totalorder %s7604_s22, 1 }
  0x39   : > { %7454 = vsyncadd (%p9150_p0), [#allocation3], 4294942208  ;;  %7352 = vset.pattern.permute.xlu0 %v7478_v0  ;;  %7353 = vset.pattern.permute.xlu1 %v7478_v0  ;;  %v6723_v6 = vld [vmem:[%s9110_s1 + $0x40] sm:$0xff]  ;;  %v6716_v9 = vld [vmem:[%s9110_s1 + $0x18] sm:$0xff]  ;;  %s9151_s0 = sld [smem:[#allocation13_spill]]  ;;  %s7480_s29 = smov 100  }
  0x3a   : > { %759 = vperm.xlu0 %7352, %v6719_v2   ;;  %814 = vperm.xlu1 %7353, %v6720_v3   ;;  %v7672_v4 = vshrl.u32 %v515_v1, 7  ;;  %v6717_v10 = vld [vmem:[%s9110_s1 + $0x30] sm:$0xff]  ;;  %v7695_v11 = vld [vmem:[%s9122_s13] sm:$0xff]  ;;  %v6718_v16 = vld [vmem:[%s9110_s1 + $0x8] sm:$0xff]  ;;  %s501_s24 = scalar_select %p500_p5, %s7604_s22, 1  ;;  %vm592_vm0 = vcmask 818176  }
  0x3b   : > { %v6721_v17 = vld [vmem:[%s9110_s1 + $0x10] sm:$0xff]  ;;  %s7481_s23 = smov 72   ;;  %v7822_v0 = vld [vmem:[%s9122_s13 + $0x8] sm:$0x3f]  ;;  %vm648_vm1 = vcmask 588800   ;;  %vm1115_vm2 = vcmask 15360  }
  0x3c   : > { %v7681_v7 = vsub.s32 1, %v7672_v4  ;;  %v7684_v8 = vsub.s32 3, %v7672_v4  ;;  %v7698_v12 = vsub.s32 5, %v7672_v4  ;;  %v1045_v15 = vsub.s32 7, %v7672_v4  ;;  %s7275_s25 = smul.u32 7, %s501_s24  ;;  %s7483_s18 = smov 126  }
  0x3d   : > { %v7740_v24 = vsub.s32 0, %v7672_v4  ;;  %v7749_v28 = vsub.s32 2, %v7672_v4  ;;  %v7752_v30 = vsub.s32 4, %v7672_v4  ;;  %v9133_v55 = vsub.s32 6, %v7672_v4  ;;  %s9134_s30 = smov 99   ;;  %s7487_s17 = smov 71  }
  0x3e   : > { %925 = vperm.xlu0 %7352, %v6722_v5   ;;  %980 = vperm.xlu1 %7353, %v6723_v6   ;;  %v1034_v13 = vrot.slane %v7695_v11, %v7681_v7  ;;  %v1038_v14 = vrot.slane %v7695_v11, %v7684_v8  ;;  %v1042_v18 = vrot.slane %v7695_v11, %v7698_v12  ;;  %vm886_vm3 = vcmask 1039360   ;;  %s9136_s16 = smov 98   ;;  %s7491_s26 = smov 114  }
  0x3f   : > { %v1046_v21 = vrot.slane %v7695_v11, %v1045_v15  ;;  %s503_s27 = scalar_lea.vmem %s9151_s0, %s7275_s25  ;;  %v1054_v3 = vrot.slane %v7822_v0, %v7684_v8  ;;  %v1050_v5 = vrot.slane %v7822_v0, %v7681_v7  ;;  %vm1157_vm4 = vcmask 1031168   ;;  %s9153_s24 = smov 99  }
  0x40   : > { %v7714_v19 = vrot.slane %v1034_v13, %v7681_v7  ;;  %v7717_v20 = vrot.slane %v1038_v14, %v7681_v7  ;;  %v7725_v22 = vrot.slane %v1042_v18, %v7681_v7  ;;  %v507_v25 = vld [vmem:[%s503_s27] sm:$0x7f]  ;;  %v1058_v14 = vrot.slane %v7822_v0, %v7698_v12  ;;  %s7484_s27 = smov 29   ;;  %s7496_s0 = smov 19  }
  0x41   : > { %v7728_v23 = vrot.slane %v1046_v21, %v7681_v7  ;;  %v7743_v26 = vrot.slane %v507_v25, %v7681_v7  ;;  %v7746_v27 = vrot.slane %v507_v25, %v7740_v24  ;;  %v7755_v31 = vrot.slane %v507_v25, %v7684_v8  ;;  %s7498_s25 = smov 49   ;;  %p9155_p9 = scmp.ne.s32.totalorder %s9143_s28, 0 }
  0x42   : > { %561 = vperm.xlu0 %7352, %v6716_v9   ;;  %617 = vperm.xlu1 %7353, %v6717_v10   ;;  %v7760_v34 = vrot.slane %v507_v25, %v7749_v28  ;;  %v7767_v37 = vrot.slane %v507_v25, %v7752_v30  ;;  %v7801_v56 = vrot.slane %v507_v25, %v7698_v12  ;;  %v1178_v12 = vld [vmem:[%s9111_s2] sm:$0xff]  ;;  %vm1219_vm5 = vcmask 236544  }
  0x43   : > { %v7807_v59 = vrot.slane %v507_v25, %v9133_v55  ;;  %v7837_v10 = vrot.slane %v1054_v3, %v7681_v7  ;;  %v7840_v13 = vrot.slane %v1050_v5, %v7681_v7  ;;  %v7849_v15 = vrot.slane %v1058_v14, %v7681_v7  ;;  %vm6729_vm9 = vmneg %vm1219_vm5 }
  0x44   : > { %vm1234_vm6 = vcmask 367616   ;;  %vm1268_vm7 = vcmask 64512   ;;  %vm7490_vm8 = vmmov 0   ;;  %vm2188_vm10 = vcmask 809984  }
  0x45   : > { %vm2817_vm11 = vcmask 580608   ;;  %vm3149_vm12 = vcmask 801792   ;;  %vm3778_vm13 = vcmask 572416   ;;  %vm4119_vm14 = vcmask 130048  }
  0x46   : > { %745 = vperm.xlu0 %7352, %v6718_v16   ;;  %911 = vperm.xlu1 %7353, %v6721_v17   ;;  %v508_v16 = vld [vmem:[%s9110_s1] sm:$0xff]  ;;  %vm4695_vm15 = vcmask 932864  }
  0x4a   : > { %1101 = vrot.lane.b32.xlu0 %v7714_v19, %s7479_s20  ;;  %1103 = vrot.lane.b32.xlu1 %v7717_v20, %s7479_s20 }
  0x4e   : > { %1105 = vrot.lane.b32.xlu0 %v7725_v22, %s7479_s20  ;;  %1107 = vrot.lane.b32.xlu1 %v7728_v23, %s7479_s20 }
  0xb9   : > { %v760_v29 = vpop.permute.xlu0 %759  ;;  %v815_v45 = vpop.permute.xlu1 %814 }
  0xba   : > { %v763_v32 = vmul.f32 %v760_v29, %v7743_v26  ;;  %v762_v33 = vmul.f32 %v760_v29, %v7746_v27  ;;  %v765_v35 = vmul.f32 %v760_v29, %v7755_v31  ;;  %v764_v36 = vmul.f32 %v760_v29, %v7760_v34 }
  0xbb   : > { %v766_v40 = vmul.f32 %v760_v29, %v7767_v37  ;;  %v818_v46 = vmul.f32 %v815_v45, %v7743_v26  ;;  %v817_v47 = vmul.f32 %v815_v45, %v7746_v27  ;;  %v820_v48 = vmul.f32 %v815_v45, %v7755_v31 }
  0xbc   : > { %778 = vrot.lane.b32.xlu1 %v763_v32, %s7480_s29  ;;  %776 = vrot.lane.b32.xlu0 %v762_v33, %s7480_s29  ;;  %v819_v49 = vmul.f32 %v815_v45, %v7760_v34  ;;  %v821_v52 = vmul.f32 %v815_v45, %v7767_v37  ;;  %v768_v60 = vmul.f32 %v760_v29, %v7807_v59 }
  0xbd   : > { %v926_v38 = vpop.permute.xlu0 %925  ;;  %v981_v50 = vpop.permute.xlu1 %980  ;;  %v767_v61 = vmul.f32 %v760_v29, %v7801_v56  ;;  %v823_v1 = vmul.f32 %v815_v45, %v7807_v59  ;;  %v822_v2 = vmul.f32 %v815_v45, %v7801_v56 }
  0xbe   : > { %v928_v39 = vmul.f32 %v926_v38, %v7746_v27  ;;  %v930_v41 = vmul.f32 %v926_v38, %v7760_v34  ;;  %v929_v42 = vmul.f32 %v926_v38, %v7743_v26  ;;  %v932_v43 = vmul.f32 %v926_v38, %v7767_v37 }
  0xbf   : > { %v931_v44 = vmul.f32 %v926_v38, %v7755_v31  ;;  %v983_v51 = vmul.f32 %v981_v50, %v7746_v27  ;;  %v985_v53 = vmul.f32 %v981_v50, %v7760_v34  ;;  %v984_v54 = vmul.f32 %v981_v50, %v7743_v26 }
  0xc0   : > { %782 = vrot.lane.b32.xlu1 %v765_v35, %s7480_s29  ;;  %780 = vrot.lane.b32.xlu0 %v764_v36, %s7480_s29  ;;  %v987_v57 = vmul.f32 %v981_v50, %v7767_v37  ;;  %v986_v58 = vmul.f32 %v981_v50, %v7755_v31  ;;  %v934_v62 = vmul.f32 %v926_v38, %v7807_v59 }
  0xc1   : > { %v933_v63 = vmul.f32 %v926_v38, %v7801_v56  ;;  %v989_v6 = vmul.f32 %v981_v50, %v7807_v59  ;;  %v988_v9 = vmul.f32 %v981_v50, %v7801_v56  ;;  %v562_v17 = vpop.permute.xlu0 %561  ;;  %v618_v29 = vpop.permute.xlu1 %617 }
  0xc2   : > { %v565_v18 = vmul.f32 %v562_v17, %v7743_v26  ;;  %v567_v21 = vmul.f32 %v562_v17, %v7755_v31  ;;  %v564_v25 = vmul.f32 %v562_v17, %v7746_v27  ;;  %v621_v32 = vmul.f32 %v618_v29, %v7743_v26 }
  0xc3   : > { %v566_v33 = vmul.f32 %v562_v17, %v7760_v34  ;;  %v623_v35 = vmul.f32 %v618_v29, %v7755_v31  ;;  %v620_v36 = vmul.f32 %v618_v29, %v7746_v27  ;;  %v569_v38 = vmul.f32 %v562_v17, %v7801_v56 }
  0xc4   : > { %942 = vrot.lane.b32.xlu1 %v928_v39, %s7480_s29  ;;  %784 = vrot.lane.b32.xlu0 %v766_v40, %s7480_s29  ;;  %v622_v39 = vmul.f32 %v618_v29, %v7760_v34  ;;  %v624_v40 = vmul.f32 %v618_v29, %v7767_v37 }
  0xc5   : > { %v7887_v45 = vpop.permute.xlu1 %911 }
  0xc8   : > { %946 = vrot.lane.b32.xlu1 %v930_v41, %s7480_s29  ;;  %944 = vrot.lane.b32.xlu0 %v929_v42, %s7480_s29  ;;  %v568_v41 = vmul.f32 %v562_v17, %v7767_v37  ;;  %v570_v42 = vmul.f32 %v562_v17, %v7807_v59 }
  0xcc   : > { %950 = vrot.lane.b32.xlu1 %v932_v43, %s7480_s29  ;;  %948 = vrot.lane.b32.xlu0 %v931_v44, %s7480_s29  ;;  %v625_v43 = vmul.f32 %v618_v29, %v7801_v56  ;;  %v626_v44 = vmul.f32 %v618_v29, %v7807_v59 }
  0xd0   : > { %833 = vrot.lane.b32.xlu1 %v818_v46, %s7481_s23  ;;  %831 = vrot.lane.b32.xlu0 %v817_v47, %s7481_s23  ;;  %v7889_v46 = vpop.permute.xlu0 %745  ;;  %v7891_v47 = vpop.permute.xlu1 %1103 }
  0xd1   : > { %v749_v17 = vmul.f32 %v7889_v46, %v7743_v26 }
  0xd4   : > { %837 = vrot.lane.b32.xlu1 %v820_v48, %s7481_s23  ;;  %835 = vrot.lane.b32.xlu0 %v819_v49, %s7481_s23  ;;  %v7893_v48 = vpop.permute.xlu0 %1101  ;;  %v7895_v49 = vpop.permute.xlu1 %1107 }
  0xd8   : > { %997 = vrot.lane.b32.xlu1 %v983_v51, %s7481_s23  ;;  %839 = vrot.lane.b32.xlu0 %v821_v52, %s7481_s23  ;;  %v7897_v50 = vpop.permute.xlu0 %1105 }
  0xdc   : > { %1001 = vrot.lane.b32.xlu1 %v985_v53, %s7481_s23  ;;  %999 = vrot.lane.b32.xlu0 %v984_v54, %s7481_s23 }
  0xe0   : > { %1005 = vrot.lane.b32.xlu1 %v987_v57, %s7481_s23  ;;  %1003 = vrot.lane.b32.xlu0 %v986_v58, %s7481_s23 }
  0xe4   : > { %788 = vrot.lane.b32.xlu1 %v768_v60, %s7480_s29  ;;  %786 = vrot.lane.b32.xlu0 %v767_v61, %s7480_s29 }
  0xe8   : > { %954 = vrot.lane.b32.xlu1 %v934_v62, %s7480_s29  ;;  %952 = vrot.lane.b32.xlu0 %v933_v63, %s7480_s29 }
  0xec   : > { %843 = vrot.lane.b32.xlu1 %v823_v1, %s7481_s23  ;;  %841 = vrot.lane.b32.xlu0 %v822_v2, %s7481_s23  ;;  %v748_v2 = vmul.f32 %v7889_v46, %v7746_v27 }
  0xf0   : > { %1009 = vrot.lane.b32.xlu1 %v989_v6, %s7481_s23  ;;  %1007 = vrot.lane.b32.xlu0 %v988_v9, %s7481_s23 }
  0xf4   : > { %1111 = vrot.lane.b32.xlu1 %v7837_v10, %s7479_s20  ;;  %1109 = vrot.lane.b32.xlu0 %v7840_v13, %s7479_s20 }
  0xf8   : > { %511 = vperm.xlu1 %7353, %v508_v16   ;;  %1113 = vrot.lane.b32.xlu0 %v7849_v15, %s7479_s20  ;;  %s7482_s20 = smov 127  }
  0xfc   : > { %580 = vrot.lane.b32.xlu1 %v565_v18, %s7480_s29  ;;  %1181 = vperm.xlu0 %7352, %v1178_v12   ;;  %v750_v12 = vmul.f32 %v7889_v46, %v7760_v34 }
 0x100   : > { %584 = vrot.lane.b32.xlu1 %v567_v21, %s7480_s29  ;;  %578 = vrot.lane.b32.xlu0 %v564_v25, %s7480_s29 }
 0x104   : > { %636 = vrot.lane.b32.xlu1 %v621_v32, %s7481_s23  ;;  %582 = vrot.lane.b32.xlu0 %v566_v33, %s7480_s29 }
 0x108   : > { %640 = vrot.lane.b32.xlu1 %v623_v35, %s7481_s23  ;;  %634 = vrot.lane.b32.xlu0 %v620_v36, %s7481_s23 }
 0x10c   : > { %588 = vrot.lane.b32.xlu1 %v569_v38, %s7480_s29  ;;  %638 = vrot.lane.b32.xlu0 %v622_v39, %s7481_s23  ;;  %v751_v38 = vmul.f32 %v7889_v46, %v7755_v31 }
 0x110   : > { %642 = vrot.lane.b32.xlu1 %v624_v40, %s7481_s23  ;;  %586 = vrot.lane.b32.xlu0 %v568_v41, %s7480_s29 }
 0x114   : > { %590 = vrot.lane.b32.xlu1 %v570_v42, %s7480_s29  ;;  %644 = vrot.lane.b32.xlu0 %v625_v43, %s7481_s23 }
 0x118   : > { %646 = vrot.lane.b32.xlu0 %v626_v44, %s7481_s23 }
 0x12e   : > { %v779_v51 = vpop.permute.xlu1 %778  ;;  %v777_v52 = vpop.permute.xlu0 %776 }
 0x12f   : > { %v790_v1 = vsel %vm592_vm0, %v777_v52, %v779_v51 }
 0x130   : > { %v803_v3 = vadd.f32 %v790_v1, %v748_v2 }
 0x132   : > { %v783_v53 = vpop.permute.xlu1 %782  ;;  %v781_v54 = vpop.permute.xlu0 %780 }
 0x133   : > { %v791_v9 = vsel %vm592_vm0, %v779_v51, %v781_v54  ;;  %v792_v14 = vsel %vm592_vm0, %v781_v54, %v783_v53 }
 0x134   : > { %v804_v21 = vadd.f32 %v791_v9, %v749_v17  ;;  %v805_v25 = vadd.f32 %v792_v14, %v750_v12  ;;  %v914_v12 = vmul.f32 %v7887_v45, %v7746_v27 }
 0x136   : > { %v943_v57 = vpop.permute.xlu1 %942  ;;  %v785_v58 = vpop.permute.xlu0 %784 }
 0x137   : > { %v793_v33 = vsel %vm592_vm0, %v783_v53, %v785_v58 }
 0x138   : > { %v806_v41 = vadd.f32 %v793_v33, %v751_v38 }
 0x13a   : > { %v7899_v60 = vpop.permute.xlu1 %946  ;;  %v945_v61 = vpop.permute.xlu0 %944 }
 0x13b   : > { %v956_v9 = vsel %vm592_vm0, %v943_v57, %v945_v61  ;;  %v957_v14 = vsel %vm592_vm0, %v945_v61, %v7899_v60  ;;  %v753_v57 = vmul.f32 %v7889_v46, %v7801_v56  ;;  %v916_v61 = vmul.f32 %v7887_v45, %v7760_v34 }
 0x13e   : > { %v7901_v62 = vpop.permute.xlu1 %950  ;;  %v949_v63 = vpop.permute.xlu0 %948 }
 0x142   : > { %v834_v5 = vpop.permute.xlu1 %833  ;;  %v832_v6 = vpop.permute.xlu0 %831 }
 0x143   : > { %v845_v16 = vsel %vm648_vm1, %v832_v6, %v834_v5 }
 0x144   : > { %v858_v18 = vadd.f32 %v845_v16, %v803_v3 }
 0x146   : > { %v838_v29 = vpop.permute.xlu1 %837  ;;  %872 = vrot.lane.b32.xlu1 %v858_v18, %s7482_s20  ;;  %v836_v32 = vpop.permute.xlu0 %835  ;;  %v915_v18 = vmul.f32 %v7887_v45, %v7743_v26 }
 0x147   : > { %v846_v35 = vsel %vm648_vm1, %v834_v5, %v836_v32  ;;  %v847_v36 = vsel %vm648_vm1, %v836_v32, %v838_v29  ;;  %v969_v32 = vadd.f32 %v956_v9, %v914_v12 }
 0x148   : > { %v860_v39 = vadd.f32 %v847_v36, %v805_v25  ;;  %v859_v40 = vadd.f32 %v846_v35, %v804_v21  ;;  %v752_v21 = vmul.f32 %v7889_v46, %v7767_v37  ;;  %v970_v33 = vadd.f32 %v957_v14, %v915_v18 }
 0x14a   : > { %v998_v42 = vpop.permute.xlu1 %997  ;;  %876 = vrot.lane.b32.xlu1 %v860_v39, %s7482_s20  ;;  %874 = vrot.lane.b32.xlu0 %v859_v40, %s7482_s20  ;;  %v840_v43 = vpop.permute.xlu0 %839  ;;  %v958_v40 = vsel %vm592_vm0, %v7899_v60, %v949_v63 }
 0x14b   : > { %v848_v44 = vsel %vm648_vm1, %v838_v29, %v840_v43 }
 0x14c   : > { %v861_v51 = vadd.f32 %v848_v44, %v806_v41  ;;  %v959_v41 = vsel %vm592_vm0, %v949_v63, %v7901_v62  ;;  %v1116_v63 = vsel %vm1115_vm2, %v7893_v48, %v7891_v47 }
 0x14e   : > { %v1002_v52 = vpop.permute.xlu1 %1001  ;;  %878 = vrot.lane.b32.xlu0 %v861_v51, %s7482_s20  ;;  %v1000_v53 = vpop.permute.xlu0 %999 }
 0x14f   : > { %v1011_v25 = vsel %vm648_vm1, %v998_v42, %v1000_v53  ;;  %v1012_v29 = vsel %vm648_vm1, %v1000_v53, %v1002_v52 }
 0x150   : > { %v1025_v42 = vadd.f32 %v1012_v29, %v970_v33 }
 0x152   : > { %v1006_v54 = vpop.permute.xlu1 %1005  ;;  %v1004_v1 = vpop.permute.xlu0 %1003 }
 0x153   : > { %v1013_v9 = vsel %vm648_vm1, %v1002_v52, %v1004_v1  ;;  %v1014_v14 = vsel %vm648_vm1, %v1004_v1, %v1006_v54 }
 0x156   : > { %v7923_v2 = vpop.permute.xlu1 %788  ;;  %v787_v3 = vpop.permute.xlu0 %786 }
 0x157   : > { %v794_v16 = vsel %vm592_vm0, %v785_v58, %v787_v3  ;;  %v795_v17 = vsel %vm592_vm0, %v787_v3, %v7923_v2  ;;  %v917_v58 = vmul.f32 %v7887_v45, %v7755_v31  ;;  %v1024_v3 = vadd.f32 %v1011_v25, %v969_v32 }
 0x158   : > { %v807_v35 = vadd.f32 %v794_v16, %v752_v21  ;;  %v808_v36 = vadd.f32 %v795_v17, %v753_v57  ;;  %v971_v16 = vadd.f32 %v958_v40, %v916_v61  ;;  %v1130_v57 = vmul.f32 %v1116_v63, %v1025_v42 }
 0x159   : > { %v972_v17 = vadd.f32 %v959_v41, %v917_v58  ;;  %v1129_v21 = vmul.f32 %v7893_v48, %v1024_v3  ;;  %v919_v61 = vmul.f32 %v7887_v45, %v7801_v56 }
 0x15a   : > { %v7925_v5 = vpop.permute.xlu1 %954  ;;  %v953_v6 = vpop.permute.xlu0 %952 }
 0x15b   : > { %v1027_v18 = vadd.f32 %v1014_v14, %v972_v17  ;;  %v960_v52 = vsel %vm592_vm0, %v7901_v62, %v953_v6  ;;  %v961_v1 = vsel %vm592_vm0, %v953_v6, %v7925_v5  ;;  %v1117_v62 = vsel %vm1115_vm2, %v7891_v47, %v7897_v50 }
 0x15c   : > { %v1118_v6 = vsel %vm1115_vm2, %v7897_v50, %v7895_v49  ;;  %v974_v33 = vadd.f32 %v961_v1, %v919_v61  ;;  %v920_v47 = vmul.f32 %v7887_v45, %v7807_v59 }
 0x15e   : > { %v844_v38 = vpop.permute.xlu1 %843  ;;  %v842_v39 = vpop.permute.xlu0 %841 }
 0x15f   : > { %v849_v44 = vsel %vm648_vm1, %v840_v43, %v842_v39  ;;  %v850_v51 = vsel %vm648_vm1, %v842_v39, %v844_v38  ;;  %v1026_v43 = vadd.f32 %v1013_v9, %v971_v16 }
 0x160   : > { %v863_v55 = vadd.f32 %v850_v51, %v808_v36  ;;  %v862_v53 = vadd.f32 %v849_v44, %v807_v35  ;;  %v1132_v36 = vmul.f32 %v1118_v6, %v1027_v18  ;;  %v975_v51 = vadd.f32 %v7925_v5, %v920_v47 }
 0x161   : > { %v1131_v35 = vmul.f32 %v1117_v62, %v1026_v43  ;;  %v678_v6 = vrot.slane %v7695_v11, %v7749_v28  ;;  %v9152_v47 = vsub.s32 6, %v7672_v4 }
 0x162   : > { %v1010_v12 = vpop.permute.xlu1 %1009  ;;  %882 = vrot.lane.b32.xlu0 %v863_v55, %s7482_s20  ;;  %880 = vrot.lane.b32.xlu1 %v862_v53, %s7482_s20  ;;  %v1008_v60 = vpop.permute.xlu0 %1007  ;;  %v918_v55 = vmul.f32 %v7887_v45, %v7767_v37 }
 0x163   : > { %v1015_v25 = vsel %vm648_vm1, %v1006_v54, %v1008_v60  ;;  %v1016_v29 = vsel %vm648_vm1, %v1008_v60, %v1010_v12  ;;  %v754_v54 = vmul.f32 %v7889_v46, %v7807_v59  ;;  %v1030_v9 = vadd.f32 %v1010_v12, %v975_v51 }
 0x164   : > { %v973_v32 = vadd.f32 %v960_v52, %v918_v55  ;;  %v1029_v44 = vadd.f32 %v1016_v29, %v974_v33 }
 0x165   : > { %v809_v53 = vadd.f32 %v7923_v2, %v754_v54  ;;  %v8025_v54 = vrot.slane %v678_v6, %v7740_v24 }
 0x166   : > { %v1112_v58 = vpop.permute.xlu1 %1111  ;;  %1143 = vrot.lane.b32.xlu0 %v1129_v21, %s7483_s18  ;;  %1145 = vrot.lane.b32.xlu1 %v1130_v57, %s7483_s18  ;;  %v1110_v48 = vpop.permute.xlu0 %1109  ;;  %v1028_v41 = vadd.f32 %v1015_v25, %v973_v32 }
 0x167   : > { %v1119_v39 = vsel %vm1115_vm2, %v7895_v49, %v1110_v48  ;;  %v1120_v40 = vsel %vm1115_vm2, %v1110_v48, %v1112_v58  ;;  %v864_v45 = vadd.f32 %v844_v38, %v809_v53  ;;  %v674_v48 = vrot.slane %v7695_v11, %v7740_v24 }
 0x168   : > { %v1134_v3 = vmul.f32 %v1120_v40, %v1029_v44  ;;  %v1133_v42 = vmul.f32 %v1119_v39, %v1028_v41  ;;  %v682_v40 = vrot.slane %v7695_v11, %v7752_v30  ;;  %v686_v41 = vrot.slane %v7695_v11, %v9152_v47 }
 0x169   : > { %v8012_v32 = vrot.slane %v674_v48, %v7740_v24  ;;  %v690_v53 = vrot.slane %v7822_v0, %v7740_v24 }
 0x16a   : > { %1147 = vrot.lane.b32.xlu0 %v1131_v35, %s7483_s18  ;;  %1149 = vrot.lane.b32.xlu1 %v1132_v36, %s7483_s18  ;;  %v1114_v50 = vpop.permute.xlu0 %1113 }
 0x16b   : > { %v1121_v49 = vsel %vm1115_vm2, %v1112_v58, %v1114_v50  ;;  %v8052_v6 = vrot.slane %v690_v53, %v7740_v24  ;;  %vm5215_vm2 = vcmask 916480  }
 0x16c   : > { %v1135_v14 = vmul.f32 %v1121_v49, %v1030_v9 }
 0x16e   : > { %1153 = vrot.lane.b32.xlu0 %v1134_v3, %s7483_s18  ;;  %1151 = vrot.lane.b32.xlu1 %v1133_v42, %s7483_s18 }
 0x172   : > { %884 = vrot.lane.b32.xlu1 %v864_v45, %s7482_s20  ;;  %1155 = vrot.lane.b32.xlu0 %v1135_v14, %s7483_s18  ;;  %v8036_v45 = vrot.slane %v682_v40, %v7740_v24 }
 0x177   : > { %v7995_v46 = vpop.permute.xlu1 %511 }
 0x178   : > { %v550_v25 = vmul.f32 %v7746_v27, %v7995_v46  ;;  %v553_v50 = vmul.f32 %v7755_v31, %v7995_v46  ;;  %v551_v51 = vmul.f32 %v7743_v26, %v7995_v46  ;;  %v552_v3 = vmul.f32 %v7760_v34, %v7995_v46 }
 0x179   : > { %v8039_v26 = vrot.slane %v686_v41, %v7740_v24 }
 0x17b   : > { %v7997_v5 = vpop.permute.xlu0 %1181  ;;  %v581_v16 = vpop.permute.xlu1 %580 }
 0x17f   : > { %v579_v17 = vpop.permute.xlu0 %578  ;;  %v585_v60 = vpop.permute.xlu1 %584 }
 0x180   : > { %v593_v62 = vsel %vm592_vm0, %v579_v17, %v581_v16 }
 0x181   : > { %v606_v33 = vadd.f32 %v593_v62, %v550_v25 }
 0x183   : > { %v583_v63 = vpop.permute.xlu0 %582  ;;  %v637_v2 = vpop.permute.xlu1 %636 }
 0x184   : > { %v594_v44 = vsel %vm592_vm0, %v581_v16, %v583_v63  ;;  %v595_v27 = vsel %vm592_vm0, %v583_v63, %v585_v60  ;;  %v554_v16 = vmul.f32 %v7767_v37, %v7995_v46  ;;  %v698_v37 = vrot.slane %v7822_v0, %v7752_v30 }
 0x185   : > { %v607_v31 = vadd.f32 %v594_v44, %v551_v51  ;;  %v608_v9 = vadd.f32 %v595_v27, %v552_v3  ;;  %v694_v51 = vrot.slane %v7822_v0, %v7749_v28 }
 0x187   : > { %v635_v12 = vpop.permute.xlu0 %634  ;;  %v641_v43 = vpop.permute.xlu1 %640 }
 0x188   : > { %v649_v29 = vsel %vm648_vm1, %v635_v12, %v637_v2 }
 0x189   : > { %v662_v42 = vadd.f32 %v649_v29, %v606_v33 }
 0x18b   : > { %v639_v18 = vpop.permute.xlu0 %638  ;;  %v589_v21 = vpop.permute.xlu1 %588  ;;  %v734_v63 = vmul.f32 %v8012_v32, %v662_v42 }
 0x18c   : > { %v650_v4 = vsel %vm648_vm1, %v637_v2, %v639_v18  ;;  %v651_v11 = vsel %vm648_vm1, %v639_v18, %v641_v43 }
 0x18d   : > { %v663_v2 = vadd.f32 %v650_v4, %v607_v31  ;;  %v664_v12 = vadd.f32 %v651_v11, %v608_v9 }
 0x18f   : > { %v587_v57 = vpop.permute.xlu0 %586  ;;  %v643_v38 = vpop.permute.xlu1 %642  ;;  %v735_v30 = vmul.f32 %v8025_v54, %v663_v2  ;;  %v736_v44 = vmul.f32 %v8036_v45, %v664_v12 }
 0x190   : > { %v596_v35 = vsel %vm592_vm0, %v585_v60, %v587_v57  ;;  %v597_v17 = vsel %vm592_vm0, %v587_v57, %v589_v21  ;;  %v652_v18 = vsel %vm648_vm1, %v641_v43, %v643_v38  ;;  %v556_v43 = vmul.f32 %v7807_v59, %v7995_v46 }
 0x191   : > { %v609_v49 = vadd.f32 %v596_v35, %v553_v50  ;;  %v610_v57 = vadd.f32 %v597_v17, %v554_v16  ;;  %v8081_v17 = vrot.slane %v694_v51, %v7740_v24 }
 0x193   : > { %v7999_v52 = vpop.permute.xlu0 %644  ;;  %v591_v1 = vpop.permute.xlu1 %590  ;;  %v665_v48 = vadd.f32 %v652_v18, %v609_v49 }
 0x194   : > { %v653_v62 = vsel %vm648_vm1, %v643_v38, %v7999_v52  ;;  %v598_v25 = vsel %vm592_vm0, %v589_v21, %v591_v1  ;;  %v612_v21 = vadd.f32 %v591_v1, %v556_v43 }
 0x195   : > { %v666_v41 = vadd.f32 %v653_v62, %v610_v57  ;;  %v737_v50 = vmul.f32 %v8039_v26, %v665_v48 }
 0x197   : > { %v8001_v55 = vpop.permute.xlu0 %646  ;;  %v738_v0 = vmul.f32 %v8052_v6, %v666_v41 }
 0x198   : > { %v654_v59 = vsel %vm648_vm1, %v7999_v52, %v8001_v55  ;;  %v668_v16 = vadd.f32 %v8001_v55, %v612_v21 }
 0x1b8   : > { %v873_v61 = vpop.permute.xlu1 %872 }
 0x1bc   : > { %v875_v58 = vpop.permute.xlu0 %874  ;;  %v877_v36 = vpop.permute.xlu1 %876 }
 0x1bd   : > { %v887_v60 = vsel %vm886_vm3, %v873_v61, %v875_v58  ;;  %v555_v61 = vmul.f32 %v7801_v56, %v7995_v46  ;;  %v888_v38 = vsel %vm886_vm3, %v875_v58, %v877_v36 }
 0x1be   : > { %v900_v29 = vadd.f32 %v887_v60, %v734_v63  ;;  %v901_v46 = vadd.f32 %v888_v38, %v735_v30 }
 0x1bf   : > { %v611_v27 = vadd.f32 %v598_v25, %v555_v61 }
 0x1c0   : > { %v879_v39 = vpop.permute.xlu0 %878 }
 0x1c1   : > { %v889_v40 = vsel %vm886_vm3, %v877_v36, %v879_v39  ;;  %v667_v9 = vadd.f32 %v654_v59, %v611_v27 }
 0x1c2   : > { %v902_v58 = vadd.f32 %v889_v40, %v736_v44 }
 0x1d4   : > { %v881_v14 = vpop.permute.xlu1 %880  ;;  %v8041_v34 = vpop.permute.xlu0 %882 }
 0x1d5   : > { %v890_v4 = vsel %vm886_vm3, %v879_v39, %v881_v14  ;;  %v891_v1 = vsel %vm886_vm3, %v881_v14, %v8041_v34  ;;  %v8084_v39 = vrot.slane %v698_v37, %v7740_v24 }
 0x1d6   : > { %v903_v60 = vadd.f32 %v890_v4, %v737_v50  ;;  %v904_v14 = vadd.f32 %v891_v1, %v738_v0 }
 0x1d7   : > { %v740_v25 = vmul.f32 %v8084_v39, %v668_v16 }
 0x1d8   : > { %v1146_v33 = vpop.permute.xlu1 %1145  ;;  %v1144_v35 = vpop.permute.xlu0 %1143 }
 0x1d9   : > { %v1158_v47 = vsel %vm1157_vm4, %v1144_v35, %v1146_v33 }
 0x1da   : > { %v1171_v56 = vadd.f32 %v1158_v47, %v900_v29 }
 0x1dc   : > { %v1150_v36 = vpop.permute.xlu1 %1149  ;;  %v1148_v3 = vpop.permute.xlu0 %1147  ;;  %v1184_v42 = vadd.f32 %v7997_v5, %v1171_v56 }
 0x1dd   : > { %v1159_v11 = vsel %vm1157_vm4, %v1146_v33, %v1148_v3  ;;  %v1160_v49 = vsel %vm1157_vm4, %v1148_v3, %v1150_v36  ;;  %v739_v33 = vmul.f32 %v8081_v17, %v667_v9 }
 0x1de   : > { %v1172_v53 = vadd.f32 %v1159_v11, %v901_v46  ;;  %v1173_v31 = vadd.f32 %v1160_v49, %v902_v58  ;;  %v1191_v52 = vmax.f32 %v1184_v42, 0.0  ;;  %v7485_v58 = vmov 0.0  }
 0x1df   : > { %1336 = vmatprep.mubr.f32.mxu1 %v7485_v58  ;;  %1478 = vmatprep.mubr.f32.mxu0 %v7485_v58 }
 0x1e0   : > { %v1152_v63 = vpop.permute.xlu1 %1151  ;;  %v1154_v2 = vpop.permute.xlu0 %1153  ;;  %1205 = vrot.lane.b32.xlu1 %v1191_v52, %s7484_s27  ;;  %v1185_v12 = vadd.f32 %v7997_v5, %v1172_v53  ;;  %v1186_v18 = vadd.f32 %v7997_v5, %v1173_v31 }
 0x1e1   : > { %v1161_v48 = vsel %vm1157_vm4, %v1150_v36, %v1152_v63  ;;  %v1162_v55 = vsel %vm1157_vm4, %v1152_v63, %v1154_v2 }
 0x1e2   : > { %v1174_v62 = vadd.f32 %v1161_v48, %v903_v60  ;;  %v1175_v57 = vadd.f32 %v1162_v55, %v904_v14  ;;  %v1192_v61 = vmax.f32 %v1185_v12, 0.0  ;;  %v1193_v37 = vmax.f32 %v1186_v18, 0.0  ;;  %v4099_v60 = vld [vmem:[%s9113_s4] sm:$0xff]  ;;  %v6724_v18 = vld [vmem:[%s9112_s3 + $0x18] sm:$0xff] }
 0x1e4   : > { %v885_v29 = vpop.permute.xlu1 %884  ;;  %v1156_v35 = vpop.permute.xlu0 %1155  ;;  %1207 = vrot.lane.b32.xlu0 %v1192_v61, %s7484_s27  ;;  %1209 = vrot.lane.b32.xlu1 %v1193_v37, %s7484_s27  ;;  %v1187_v43 = vadd.f32 %v7997_v5, %v1174_v62  ;;  %v1188_v38 = vadd.f32 %v7997_v5, %v1175_v57 }
 0x1e5   : > { %v892_v40 = vsel %vm886_vm3, %v8041_v34, %v885_v29  ;;  %v906_v47 = vadd.f32 %v885_v29, %v740_v25  ;;  %v1163_v56 = vsel %vm1157_vm4, %v1154_v2, %v1156_v35 }
 0x1e6   : > { %v905_v41 = vadd.f32 %v892_v40, %v739_v33  ;;  %v1194_v30 = vmax.f32 %v1187_v43, 0.0  ;;  %v1195_v44 = vmax.f32 %v1188_v38, 0.0 }
 0x1e7   : > { %v1177_v27 = vadd.f32 %v1156_v35, %v906_v47 }
 0x1e8   : > { %v1176_v21 = vadd.f32 %v1163_v56, %v905_v41  ;;  %1211 = vrot.lane.b32.xlu0 %v1194_v30, %s7484_s27  ;;  %1213 = vrot.lane.b32.xlu1 %v1195_v44, %s7484_s27 }
 0x1e9   : > { %v1190_v50 = vadd.f32 %v7997_v5, %v1177_v27 }
 0x1ea   : > { %v1189_v51 = vadd.f32 %v7997_v5, %v1176_v21 }
 0x1eb   : > { %v1197_v59 = vmax.f32 %v1190_v50, 0.0 }
 0x1ec   : > { %v1196_v46 = vmax.f32 %v1189_v51, 0.0 }
 0x1ed   : > { %1217 = vrot.lane.b32.xlu1 %v1197_v59, %s7484_s27 }
 0x1ee   : > { %1215 = vrot.lane.b32.xlu0 %v1196_v46, %s7484_s27  ;;  %s7492_s27 = smov 113  }
 0x252   : > { %v8106_v34 = vpop.permute.xlu1 %1205 }
 0x253   : > { %v8123_v1 = vsel %vm1219_vm5, 0.0, %v8106_v34 }
 0x256   : > { %v1208_v36 = vpop.permute.xlu0 %1207  ;;  %v1210_v3 = vpop.permute.xlu1 %1209 }
 0x257   : > { %v8112_v42 = vsel %vm1219_vm5, %v8106_v34, %v1208_v36  ;;  %v8115_v5 = vsel %vm1219_vm5, %v1208_v36, %v1210_v3 }
 0x258   : > { %1243 = vrot.lane.b32.xlu0 %v8112_v42, %s7480_s29  ;;  %1245 = vrot.lane.b32.xlu1 %v8115_v5, %s7480_s29 }
 0x25a   : > { %v1212_v4 = vpop.permute.xlu0 %1211  ;;  %v1214_v49 = vpop.permute.xlu1 %1213 }
 0x25b   : > { %v8126_v11 = vsel %vm1219_vm5, %v1210_v3, %v1212_v4  ;;  %v8133_v0 = vsel %vm1219_vm5, %v1212_v4, %v1214_v49 }
 0x25c   : > { %1241 = vrot.lane.b32.xlu0 %v8123_v1, %s7480_s29  ;;  %1247 = vrot.lane.b32.xlu1 %v8126_v11, %s7480_s29 }
 0x25f   : > { %v1218_v52 = vpop.permute.xlu1 %1217 }
 0x260   : > { %v1216_v53 = vpop.permute.xlu0 %1215  ;;  %1249 = vrot.lane.b32.xlu0 %v8133_v0, %s7480_s29 }
 0x261   : > { %v8138_v31 = vsel %vm1219_vm5, %v1214_v49, %v1216_v53  ;;  %v8171_v9 = vsel %vm1219_vm5, %v1216_v53, %v1218_v52  ;;  %vm5497_vm5 = vcmask 121856  }
 0x262   : > { %1251 = vrot.lane.b32.xlu1 %v8138_v31, %s7480_s29  ;;  %v1235_v16 = vsel %vm1234_vm6, %v8171_v9, 0.0 }
 0x264   : > { %1847 = vrot.lane.b32.xlu0 %v8115_v5, %s7481_s23 }
 0x266   : > { %1845 = vrot.lane.b32.xlu1 %v8112_v42, %s7481_s23 }
 0x268   : > { %1851 = vrot.lane.b32.xlu0 %v8133_v0, %s7481_s23 }
 0x26a   : > { %1849 = vrot.lane.b32.xlu1 %v8126_v11, %s7481_s23 }
 0x26c   : > { %1853 = vrot.lane.b32.xlu0 %v8138_v31, %s7481_s23 }
 0x26e   : > { %1843 = vrot.lane.b32.xlu1 %v8123_v1, %s7481_s23 }
 0x270   : > { %2176 = vrot.lane.b32.xlu0 %v8112_v42, %s9134_s30 }
 0x272   : > { %2178 = vrot.lane.b32.xlu1 %v8115_v5, %s9134_s30 }
 0x274   : > { %2180 = vrot.lane.b32.xlu0 %v8126_v11, %s9134_s30 }
 0x276   : > { %2182 = vrot.lane.b32.xlu1 %v8133_v0, %s9134_s30 }
 0x278   : > { %2174 = vrot.lane.b32.xlu0 %v8123_v1, %s9134_s30 }
 0x27a   : > { %2184 = vrot.lane.b32.xlu1 %v8138_v31, %s9134_s30 }
 0x27c   : > { %2492 = vrot.lane.b32.xlu0 %v8115_v5, %s7482_s20 }
 0x27e   : > { %2490 = vrot.lane.b32.xlu1 %v8112_v42, %s7482_s20 }
 0x280   : > { %2496 = vrot.lane.b32.xlu0 %v8133_v0, %s7482_s20 }
 0x282   : > { %2494 = vrot.lane.b32.xlu1 %v8126_v11, %s7482_s20 }
 0x284   : > { %1253 = vrot.lane.b32.xlu0 %v1235_v16, %s7480_s29 }
 0x286   : > { %2488 = vrot.lane.b32.xlu1 %v8123_v1, %s7482_s20 }
 0x288   : > { %2498 = vrot.lane.b32.xlu0 %v8138_v31, %s7482_s20 }
 0x28a   : > { %2807 = vrot.lane.b32.xlu1 %v8115_v5, %s7487_s17 }
 0x28c   : > { %2805 = vrot.lane.b32.xlu0 %v8112_v42, %s7487_s17 }
 0x28e   : > { %2811 = vrot.lane.b32.xlu1 %v8133_v0, %s7487_s17 }
 0x290   : > { %2809 = vrot.lane.b32.xlu0 %v8126_v11, %s7487_s17 }
 0x292   : > { %1855 = vrot.lane.b32.xlu1 %v1235_v16, %s7481_s23  ;;  %s7489_s23 = smov 70  }
 0x294   : > { %2803 = vrot.lane.b32.xlu0 %v8123_v1, %s7487_s17 }
 0x296   : > { %2813 = vrot.lane.b32.xlu1 %v8138_v31, %s7487_s17 }
 0x298   : > { %3139 = vrot.lane.b32.xlu0 %v8115_v5, %s9136_s16 }
 0x29a   : > { %3137 = vrot.lane.b32.xlu1 %v8112_v42, %s9136_s16 }
 0x29c   : > { %2186 = vrot.lane.b32.xlu0 %v1235_v16, %s9134_s30 }
 0x29e   : > { %3141 = vrot.lane.b32.xlu1 %v8126_v11, %s9136_s16 }
 0x2a0   : > { %3143 = vrot.lane.b32.xlu0 %v8133_v0, %s9136_s16 }
 0x2a2   : > { %2500 = vrot.lane.b32.xlu1 %v1235_v16, %s7482_s20 }
 0x2a4   : > { %3145 = vrot.lane.b32.xlu0 %v8138_v31, %s9136_s16 }
 0x2a6   : > { %3135 = vrot.lane.b32.xlu1 %v8123_v1, %s9136_s16 }
 0x2a8   : > { %3451 = vrot.lane.b32.xlu0 %v8112_v42, %s7483_s18 }
 0x2aa   : > { %3453 = vrot.lane.b32.xlu1 %v8115_v5, %s7483_s18 }
 0x2ac   : > { %2815 = vrot.lane.b32.xlu0 %v1235_v16, %s7487_s17  ;;  %s7493_s17 = smov 112  }
 0x2ae   : > { %3457 = vrot.lane.b32.xlu1 %v8133_v0, %s7483_s18 }
 0x2b0   : > { %3455 = vrot.lane.b32.xlu0 %v8126_v11, %s7483_s18 }
 0x2b2   : > { %3147 = vrot.lane.b32.xlu1 %v1235_v16, %s9136_s16 }
 0x2b4   : > { %3449 = vrot.lane.b32.xlu0 %v8123_v1, %s7483_s18 }
 0x2b6   : > { %3459 = vrot.lane.b32.xlu1 %v8138_v31, %s7483_s18 }
 0x2b8   : > { %3768 = vrot.lane.b32.xlu0 %v8115_v5, %s7489_s23 }
 0x2ba   : > { %3766 = vrot.lane.b32.xlu1 %v8112_v42, %s7489_s23 }
 0x2bc   : > { %3461 = vrot.lane.b32.xlu0 %v1235_v16, %s7483_s18 }
 0x2be   : > { %3770 = vrot.lane.b32.xlu1 %v8126_v11, %s7489_s23 }
 0x2c0   : > { %3772 = vrot.lane.b32.xlu0 %v8133_v0, %s7489_s23 }
 0x2c2   : > { %3764 = vrot.lane.b32.xlu1 %v8123_v1, %s7489_s23  ;;  %v1236_v1 = vld [vmem:[%s9112_s3] sm:$0xff] }
 0x2c4   : > { %3774 = vrot.lane.b32.xlu0 %v8138_v31, %s7489_s23 }
 0x2c6   : > { %3776 = vrot.lane.b32.xlu1 %v1235_v16, %s7489_s23  ;;  %s7499_s23 = smov 117  }
 0x2c8   : > { %4102 = vperm.xlu0 %7352, %v4099_v60  }
 0x2ca   : > { %v1244_v14 = vpop.permute.xlu0 %1243  ;;  %v1246_v63 = vpop.permute.xlu1 %1245 }
 0x2cb   : > { %v1256_v2 = vsel %vm592_vm0, %v1244_v14, %v1246_v63 }
 0x2cc   : > { %1272 = vmatprep.subr.mxu1 %v1256_v2 }
 0x2ce   : > { %v1242_v12 = vpop.permute.xlu0 %1241  ;;  %v1248_v55 = vpop.permute.xlu1 %1247 }
 0x2cf   : > { %v1255_v48 = vsel %vm592_vm0, %v1242_v12, %v1244_v14  ;;  %v1257_v37 = vsel %vm592_vm0, %v1246_v63, %v1248_v55 }
 0x2d0   : > { %1273 = vmatpush1.msra.mxu1 %v1255_v48 }
 0x2d1   : > { %6725 = vmatmul.mubr.msk.f32.vlgmr.msra.gmra.mrb[0].mxu1 %vm1268_vm7, %v6724_v18 }
 0x2d2   : > { %v1250_v62 = vpop.permute.xlu0 %1249  ;;  %1407 = vmatprep.mubr.f32.mxu1 %v7485_v58 }
 0x2d3   : > { %v1258_v57 = vsel %vm592_vm0, %v1248_v55, %v1250_v62  ;;  %v6742_v55 = vld [vmem:[%s9112_s3 + $0x20] sm:$0xff] }
 0x2d4   : > { %1343 = vmatprep.subr.mxu1 %v1258_v57  ;;  %v1252_v61 = vpop.permute.xlu1 %1251 }
 0x2d5   : > { %1344 = vmatpush1.msra.mxu1 %v1257_v37  ;;  %v1259_v3 = vsel %vm592_vm0, %v1250_v62, %v1252_v61 }
 0x2d6   : > { %v1848_v25 = vpop.permute.xlu0 %1847  ;;  %6726 = vmatmul.mubr.msk.f32.vlgmr.msra.gmra.mrb[2].mxu1 %vm1268_vm7, %v6724_v18  ;;  %6868 = vmatprep.subr.mxu1 %v7485_v58 }
 0x2d7   : > { %6870 = vmatprep.mubr.msk.f32.mxu1 %vm7490_vm8, %v7485_v58 }
 0x2d8   : > { %v1846_v29 = vpop.permute.xlu1 %1845 }
 0x2da   : > { %v8241_v33 = vpop.permute.xlu0 %1851 }
 0x2dc   : > { %v1850_v35 = vpop.permute.xlu1 %1849 }
 0x2dd   : > { %v1859_v53 = vsel %vm648_vm1, %v1848_v25, %v1850_v35 }
 0x2de   : > { %v8243_v43 = vpop.permute.xlu0 %1853 }
 0x2df   : > { %v1861_v63 = vsel %vm648_vm1, %v8241_v33, %v8243_v43 }
 0x2e0   : > { %v1844_v38 = vpop.permute.xlu1 %1843 }
 0x2e1   : > { %v1857_v52 = vsel %vm648_vm1, %v1844_v38, %v1846_v29 }
 0x2e2   : > { %v8245_v40 = vpop.permute.xlu0 %2176 }
 0x2e4   : > { %v8247_v47 = vpop.permute.xlu1 %2178 }
 0x2e5   : > { %v2190_v2 = vsel %vm2188_vm10, %v8245_v40, %v8247_v47 }
 0x2e6   : > { %v8249_v41 = vpop.permute.xlu0 %2180 }
 0x2e8   : > { %v8251_v30 = vpop.permute.xlu1 %2182 }
 0x2e9   : > { %v2192_v14 = vsel %vm2188_vm10, %v8249_v41, %v8251_v30 }
 0x2ea   : > { %v8253_v44 = vpop.permute.xlu0 %2174 }
 0x2eb   : > { %v2189_v62 = vsel %vm2188_vm10, %v8253_v44, %v8245_v40  ;;  %v6741_v40 = vld [vmem:[%s9112_s3 + $0x8] sm:$0xff] }
 0x2ec   : > { %v8255_v56 = vpop.permute.xlu1 %2184 }
 0x2ee   : > { %v8257_v27 = vpop.permute.xlu0 %2492 }
 0x2f0   : > { %v8259_v21 = vpop.permute.xlu1 %2490 }
 0x2f1   : > { %v2503_v38 = vsel %vm886_vm3, %v8259_v21, %v8257_v27 }
 0x2f2   : > { %v8261_v50 = vpop.permute.xlu0 %2496 }
 0x2f4   : > { %v8263_v51 = vpop.permute.xlu1 %2494 }
 0x2f6   : > { %v1254_v59 = vpop.permute.xlu0 %1253 }
 0x2f7   : > { %6869 = vmatpush3.msra.mxu1 %v1254_v59  ;;  %v1260_v46 = vsel %vm592_vm0, %v1252_v61, %v1254_v59 }
 0x2f8   : > { %1414 = vmatprep.subr.mxu0 %v1260_v46  ;;  %6871 = vmatmul.mubr.msk.f32.vlgmr.msra.gmra.mrb[4].mxu1 %vm1268_vm7, %v6724_v18  ;;  %v8267_v36 = vpop.permute.xlu1 %2488 }
 0x2f9   : > { %1629 = vmatprep.subr.mxu1 %v8126_v11  ;;  %1415 = vmatpush1.msra.mxu0 %v1259_v3 }
 0x2fa   : > { %1630 = vmatpush1.msra.mxu1 %v8115_v5  ;;  %v8273_v4 = vpop.permute.xlu0 %2498  ;;  %6727 = vmatmul.mubr.msk.f32.vlgmr.msra.gmra.mrb[0].mxu0 %vm1268_vm7, %v6724_v18  ;;  %v2191_v18 = vsel %vm2188_vm10, %v8247_v47, %v8249_v41  ;;  %v2502_v47 = vsel %vm886_vm3, %v8267_v36, %v8259_v21  ;;  %v6751_v36 = vld [vmem:[%s9112_s3 + $0x38] sm:$0xff] }
 0x2fb   : > { %1558 = vmatprep.subr.mxu0 %v8112_v42  ;;  %1693 = vmatprep.mubr.f32.mxu1 %v7485_v58  ;;  %v1860_v42 = vsel %vm648_vm1, %v1850_v35, %v8241_v33  ;;  %v2504_v35 = vsel %vm886_vm3, %v8257_v27, %v8263_v51 }
 0x2fc   : > { %6730 = vmatpush1.msk.msra.mxu0 %vm6729_vm9, %v8106_v34  ;;  %6873 = vmatprep.subr.mxu1 %v7485_v58  ;;  %v8283_v11 = vpop.permute.xlu1 %2807  ;;  %v1858_v34 = vsel %vm648_vm1, %v1846_v29, %v1848_v25  ;;  %v2505_v25 = vsel %vm886_vm3, %v8263_v51, %v8261_v50  ;;  %v2193_v29 = vsel %vm2188_vm10, %v8251_v30, %v8255_v56  ;;  %vm6424_vm9 = vcmask 400384  }
 0x2fd   : > { %6732 = vmatmul.mubr.msk.f32.vlgmr.msra.gmra.mrb[2].mxu1 %vm1268_vm7, %v1236_v1  ;;  %1700 = vmatprep.subr.mxu0 %v8138_v31 }
 0x2fe   : > { %6874 = vmatpush3.msk.msra.mxu1 %vm1234_vm6, %v8171_v9  ;;  %1622 = vmatprep.mubr.f32.mxu0 %v7485_v58  ;;  %v8292_v5 = vpop.permute.xlu0 %2805  ;;  %vm5502_vm6 = vcmask 678912  }
 0x2ff   : > { %1944 = vmatprep.subr.mxu1 %v1860_v42  ;;  %6731 = vmatmul.mubr.msk.f32.vlgmr.msra.gmra.mrb[2].mxu0 %vm1268_vm7, %v1236_v1  ;;  %v2819_v21 = vsel %vm2817_vm11, %v8292_v5, %v8283_v11 }
 0x300   : > { %1701 = vmatpush1.msra.mxu0 %v8133_v0  ;;  %6875 = vmatprep.mubr.msk.f32.mxu1 %vm7490_vm8, %v7485_v58  ;;  %v8299_v49 = vpop.permute.xlu1 %2811  ;;  %v6736_v0 = vld [vmem:[%s9112_s3 + $0x30] sm:$0xff] }
 0x301   : > { %1873 = vmatprep.subr.mxu0 %v1858_v34  ;;  %6876 = vmatmul.mubr.msk.f32.vlgmr.msra.gmra.mrb[4].mxu1 %vm1268_vm7, %v1236_v1 }
 0x302   : > { %1945 = vmatpush1.msra.mxu1 %v1859_v53  ;;  %1764 = vmatprep.mubr.f32.mxu0 %v7485_v58  ;;  %v8304_v31 = vpop.permute.xlu0 %2809 }
 0x303   : > { %6733 = vmatmul.mubr.msk.f32.vlgmr.msra.gmra.mrb[0].mxu0 %vm1268_vm7, %v1236_v1  ;;  %2008 = vmatprep.mubr.f32.mxu1 %v7485_v58  ;;  %v2821_v27 = vsel %vm2817_vm11, %v8304_v31, %v8299_v49 }
 0x304   : > { %1874 = vmatpush1.msra.mxu0 %v1857_v52  ;;  %6878 = vmatprep.subr.mxu1 %v7485_v58  ;;  %v1856_v9 = vpop.permute.xlu1 %1855 }
 0x305   : > { %6738 = vmatmul.mubr.msk.f32.vlgmr.msra.gmra.mrb[2].mxu1 %vm1268_vm7, %v6736_v0  ;;  %1937 = vmatprep.mubr.f32.mxu0 %v7485_v58  ;;  %v1862_v16 = vsel %vm648_vm1, %v8243_v43, %v1856_v9  ;;  %vm4961_vm1 = vcmask 924672  }
 0x306   : > { %6879 = vmatpush3.msra.mxu1 %v1856_v9  ;;  %v8317_v60 = vpop.permute.xlu0 %2803  ;;  %2015 = vmatprep.subr.mxu0 %v1862_v16 }
 0x307   : > { %6737 = vmatmul.mubr.msk.f32.vlgmr.msra.gmra.mrb[2].mxu0 %vm1268_vm7, %v6736_v0  ;;  %2276 = vmatprep.subr.mxu1 %v2192_v14  ;;  %v2818_v46 = vsel %vm2817_vm11, %v8317_v60, %v8292_v5 }
 0x308   : > { %2016 = vmatpush1.msra.mxu0 %v1861_v63  ;;  %6880 = vmatprep.mubr.msk.f32.mxu1 %vm7490_vm8, %v7485_v58  ;;  %v8331_v12 = vpop.permute.xlu1 %2813 }
 0x309   : > { %6881 = vmatmul.mubr.msk.f32.vlgmr.msra.gmra.mrb[4].mxu1 %vm1268_vm7, %v6736_v0  ;;  %2205 = vmatprep.subr.mxu0 %v2190_v2 }
 0x30a   : > { %2277 = vmatpush1.msra.mxu1 %v2191_v18  ;;  %2079 = vmatprep.mubr.f32.mxu0 %v7485_v58  ;;  %v8338_v48 = vpop.permute.xlu0 %3139 }
 0x30b   : > { %6739 = vmatmul.mubr.msk.f32.vlgmr.msra.gmra.mrb[0].mxu0 %vm1268_vm7, %v6736_v0  ;;  %2340 = vmatprep.mubr.f32.mxu1 %v7485_v58 }
 0x30c   : > { %2206 = vmatpush1.msra.mxu0 %v2189_v62  ;;  %v8348_v57 = vpop.permute.xlu1 %3137  ;;  %2269 = vmatprep.mubr.f32.mxu0 %v7485_v58 }
 0x30d   : > { %6744 = vmatmul.mubr.msk.f32.vlgmr.msra.gmra.mrb[6].mxu1 %vm1268_vm7, %v6742_v55  ;;  %6883 = vmatprep.subr.mxu1 %v7485_v58 }
 0x30e   : > { %v2187_v61 = vpop.permute.xlu0 %2186  ;;  %6885 = vmatprep.mubr.msk.f32.mxu1 %vm7490_vm8, %v7485_v58 }
 0x30f   : > { %6743 = vmatmul.mubr.msk.f32.vlgmr.msra.gmra.mrb[4].mxu0 %vm1268_vm7, %v6742_v55  ;;  %6884 = vmatpush3.msra.mxu1 %v2187_v61  ;;  %v2194_v37 = vsel %vm2188_vm10, %v8255_v56, %v2187_v61  ;;  %v2506_v56 = vsel %vm886_vm3, %v8261_v50, %v8273_v4  ;;  %v2820_v50 = vsel %vm2817_vm11, %v8283_v11, %v8304_v31  ;;  %v6757_v31 = vld [vmem:[%s9112_s3 + $0x28] sm:$0xff] }
 0x310   : > { %2347 = vmatprep.subr.mxu0 %v2194_v37  ;;  %2589 = vmatprep.subr.mxu1 %v2505_v25  ;;  %v3142_v33 = vpop.permute.xlu1 %3141  ;;  %v2822_v11 = vsel %vm2817_vm11, %v8299_v49, %v8331_v12  ;;  %v3151_v49 = vsel %vm3149_vm12, %v8348_v57, %v8338_v48 }
 0x311   : > { %6886 = vmatmul.mubr.msk.f32.vlgmr.msra.gmra.mrb[8].mxu1 %vm1268_vm7, %v6742_v55  ;;  %2348 = vmatpush1.msra.mxu0 %v2193_v29  ;;  %v3152_v34 = vsel %vm3149_vm12, %v8338_v48, %v3142_v33  ;;  %v6756_v48 = vld [vmem:[%s9112_s3 + $0x10] sm:$0xff] }
 0x312   : > { %2411 = vmatprep.mubr.f32.mxu0 %v7485_v58  ;;  %2590 = vmatpush1.msra.mxu1 %v2504_v35  ;;  %v8369_v43 = vpop.permute.xlu0 %3143 }
 0x313   : > { %6745 = vmatmul.mubr.msk.f32.vlgmr.msra.gmra.mrb[6].mxu0 %vm1268_vm7, %v6742_v55  ;;  %2518 = vmatprep.subr.mxu0 %v2503_v38  ;;  %v3153_v42 = vsel %vm3149_vm12, %v3142_v33, %v8369_v43 }
 0x314   : > { %2519 = vmatpush1.msra.mxu0 %v2502_v47  ;;  %2653 = vmatprep.mubr.f32.mxu1 %v7485_v58  ;;  %v2501_v41 = vpop.permute.xlu1 %2500 }
 0x315   : > { %6748 = vmatmul.mubr.msk.f32.vlgmr.msra.gmra.mrb[6].mxu1 %vm1268_vm7, %v6741_v40  ;;  %6888 = vmatprep.subr.mxu1 %v7485_v58  ;;  %v2507_v30 = vsel %vm886_vm3, %v8273_v4, %v2501_v41 }
 0x316   : > { %2582 = vmatprep.mubr.f32.mxu0 %v7485_v58  ;;  %6889 = vmatpush3.msra.mxu1 %v2501_v41  ;;  %v3146_v44 = vpop.permute.xlu0 %3145 }
 0x317   : > { %6747 = vmatmul.mubr.msk.f32.vlgmr.msra.gmra.mrb[4].mxu0 %vm1268_vm7, %v6741_v40  ;;  %2660 = vmatprep.subr.mxu0 %v2507_v30  ;;  %v3154_v14 = vsel %vm3149_vm12, %v8369_v43, %v3146_v44  ;;  %v6766_v43 = vld [vmem:[%s9112_s3 + $0x40] sm:$0xff] }
 0x318   : > { %2905 = vmatprep.subr.mxu1 %v2821_v27  ;;  %2661 = vmatpush1.msra.mxu0 %v2506_v56  ;;  %v3136_v51 = vpop.permute.xlu1 %3135 }
 0x319   : > { %6890 = vmatprep.mubr.msk.f32.mxu1 %vm7490_vm8, %v7485_v58  ;;  %2834 = vmatprep.subr.mxu0 %v2819_v21  ;;  %v3150_v0 = vsel %vm3149_vm12, %v3136_v51, %v8348_v57 }
 0x31a   : > { %6891 = vmatmul.mubr.msk.f32.vlgmr.msra.gmra.mrb[10].mxu1 %vm1268_vm7, %v6741_v40  ;;  %2724 = vmatprep.mubr.f32.mxu0 %v7485_v58  ;;  %v3452_v59 = vpop.permute.xlu0 %3451 }
 0x31b   : > { %2906 = vmatpush1.msra.mxu1 %v2820_v50  ;;  %6749 = vmatmul.mubr.msk.f32.vlgmr.msra.gmra.mrb[6].mxu0 %vm1268_vm7, %v6741_v40 }
 0x31c   : > { %2835 = vmatpush1.msra.mxu0 %v2818_v46  ;;  %2969 = vmatprep.mubr.f32.mxu1 %v7485_v58  ;;  %v3454_v3 = vpop.permute.xlu1 %3453 }
 0x31d   : > { %2898 = vmatprep.mubr.f32.mxu0 %v7485_v58  ;;  %6893 = vmatprep.subr.mxu1 %v7485_v58  ;;  %v3464_v2 = vsel %vm1157_vm4, %v3452_v59, %v3454_v3 }
 0x31e   : > { %6753 = vmatmul.mubr.msk.f32.vlgmr.msra.gmra.mrb[6].mxu1 %vm1268_vm7, %v6751_v36  ;;  %v2816_v4 = vpop.permute.xlu0 %2815 }
 0x31f   : > { %6752 = vmatmul.mubr.msk.f32.vlgmr.msra.gmra.mrb[4].mxu0 %vm1268_vm7, %v6751_v36  ;;  %6894 = vmatpush3.msra.mxu1 %v2816_v4  ;;  %v2823_v1 = vsel %vm2817_vm11, %v8331_v12, %v2816_v4  ;;  %vm6434_vm11 = vcmask 711680  }
 0x320   : > { %6895 = vmatprep.mubr.msk.f32.mxu1 %vm7490_vm8, %v7485_v58  ;;  %2976 = vmatprep.subr.mxu0 %v2823_v1  ;;  %v3458_v5 = vpop.permute.xlu1 %3457 }
 0x321   : > { %3237 = vmatprep.subr.mxu1 %v3153_v42  ;;  %2977 = vmatpush1.msra.mxu0 %v2822_v11 }
 0x322   : > { %6896 = vmatmul.mubr.msk.f32.vlgmr.msra.gmra.mrb[12].mxu1 %vm1268_vm7, %v6751_v36  ;;  %3040 = vmatprep.mubr.f32.mxu0 %v7485_v58  ;;  %v3456_v53 = vpop.permute.xlu0 %3455 }
 0x323   : > { %3238 = vmatpush1.msra.mxu1 %v3152_v34  ;;  %6754 = vmatmul.mubr.msk.f32.vlgmr.msra.gmra.mrb[6].mxu0 %vm1268_vm7, %v6751_v36  ;;  %v3466_v60 = vsel %vm1157_vm4, %v3456_v53, %v3458_v5  ;;  %v3465_v12 = vsel %vm1157_vm4, %v3454_v3, %v3456_v53 }
 0x324   : > { %3166 = vmatprep.subr.mxu0 %v3151_v49  ;;  %3301 = vmatprep.mubr.f32.mxu1 %v7485_v58  ;;  %v3148_v52 = vpop.permute.xlu1 %3147 }
 0x325   : > { %3167 = vmatpush1.msra.mxu0 %v3150_v0  ;;  %6898 = vmatprep.subr.mxu1 %v7485_v58  ;;  %v3155_v9 = vsel %vm3149_vm12, %v3146_v44, %v3148_v52 }
 0x326   : > { %6759 = vmatmul.mubr.msk.f32.vlgmr.msra.gmra.mrb[14].mxu1 %vm1268_vm7, %v6757_v31  ;;  %3230 = vmatprep.mubr.f32.mxu0 %v7485_v58  ;;  %v3450_v16 = vpop.permute.xlu0 %3449 }
 0x327   : > { %6899 = vmatpush3.msra.mxu1 %v3148_v52  ;;  %6758 = vmatmul.mubr.msk.f32.vlgmr.msra.gmra.mrb[8].mxu0 %vm1268_vm7, %v6757_v31  ;;  %v3463_v55 = vsel %vm1157_vm4, %v3450_v16, %v3452_v59 }
 0x328   : > { %3308 = vmatprep.subr.mxu0 %v3155_v9  ;;  %3550 = vmatprep.subr.mxu1 %v3466_v60  ;;  %v3460_v63 = vpop.permute.xlu1 %3459 }
 0x329   : > { %3309 = vmatpush1.msra.mxu0 %v3154_v14  ;;  %6900 = vmatprep.mubr.msk.f32.mxu1 %vm7490_vm8, %v7485_v58  ;;  %v3467_v37 = vsel %vm1157_vm4, %v3458_v5, %v3460_v63 }
 0x32a   : > { %6901 = vmatmul.mubr.msk.f32.vlgmr.msra.gmra.mrb[16].mxu1 %vm1268_vm7, %v6757_v31  ;;  %3479 = vmatprep.subr.mxu0 %v3464_v2  ;;  %v3769_v18 = vpop.permute.xlu0 %3768 }
 0x32b   : > { %3551 = vmatpush1.msra.mxu1 %v3465_v12  ;;  %3372 = vmatprep.mubr.f32.mxu0 %v7485_v58 }
 0x32c   : > { %6760 = vmatmul.mubr.msk.f32.vlgmr.msra.gmra.mrb[10].mxu0 %vm1268_vm7, %v6757_v31  ;;  %v3767_v62 = vpop.permute.xlu1 %3766  ;;  %3614 = vmatprep.mubr.f32.mxu1 %v7485_v58 }
 0x32d   : > { %3480 = vmatpush1.msra.mxu0 %v3463_v55  ;;  %3543 = vmatprep.mubr.f32.mxu0 %v7485_v58  ;;  %v3780_v29 = vsel %vm3778_vm13, %v3767_v62, %v3769_v18 }
 0x32e   : > { %v3462_v57 = vpop.permute.xlu0 %3461  ;;  %6763 = vmatmul.mubr.msk.f32.vlgmr.msra.gmra.mrb[14].mxu1 %vm1268_vm7, %v6756_v48  ;;  %6903 = vmatprep.subr.mxu1 %v7485_v58 }
 0x32f   : > { %6904 = vmatpush3.msra.mxu1 %v3462_v57  ;;  %v3468_v61 = vsel %vm1157_vm4, %v3460_v63, %v3462_v57  ;;  %6905 = vmatprep.mubr.msk.f32.mxu1 %vm7490_vm8, %v7485_v58 }
 0x330   : > { %6762 = vmatmul.mubr.msk.f32.vlgmr.msra.gmra.mrb[8].mxu0 %vm1268_vm7, %v6756_v48  ;;  %3621 = vmatprep.subr.mxu0 %v3468_v61  ;;  %v3771_v25 = vpop.permute.xlu1 %3770 }
 0x331   : > { %3622 = vmatpush1.msra.mxu0 %v3467_v37  ;;  %3685 = vmatprep.mubr.f32.mxu0 %v7485_v58  ;;  %v3781_v38 = vsel %vm3778_vm13, %v3769_v18, %v3771_v25 }
 0x332   : > { %v3773_v33 = vpop.permute.xlu0 %3772  ;;  %6906 = vmatmul.mubr.msk.f32.vlgmr.msra.gmra.mrb[16].mxu1 %vm1268_vm7, %v6756_v48  ;;  %3795 = vmatprep.subr.mxu0 %v3780_v29 }
 0x333   : > { %v3782_v35 = vsel %vm3778_vm13, %v3771_v25, %v3773_v33  ;;  %3930 = vmatprep.mubr.f32.mxu1 %v7485_v58 }
 0x334   : > { %6764 = vmatmul.mubr.msk.f32.vlgmr.msra.gmra.mrb[10].mxu0 %vm1268_vm7, %v6756_v48  ;;  %3866 = vmatprep.subr.mxu1 %v3782_v35  ;;  %v3765_v40 = vpop.permute.xlu1 %3764 }
 0x335   : > { %v3779_v47 = vsel %vm3778_vm13, %v3765_v40, %v3767_v62  ;;  %3867 = vmatpush1.msra.mxu1 %v3781_v38  ;;  %3859 = vmatprep.mubr.f32.mxu0 %v7485_v58 }
 0x336   : > { %3796 = vmatpush1.msra.mxu0 %v3779_v47  ;;  %6768 = vmatmul.mubr.msk.f32.vlgmr.msra.gmra.mrb[14].mxu1 %vm1268_vm7, %v6766_v43  ;;  %v3775_v41 = vpop.permute.xlu0 %3774 }
 0x337   : > { %6908 = vmatprep.subr.mxu1 %v7485_v58  ;;  %6910 = vmatprep.mubr.msk.f32.mxu1 %vm7490_vm8, %v7485_v58  ;;  %v3783_v56 = vsel %vm3778_vm13, %v3773_v33, %v3775_v41  ;;  %vm6792_vm8 = vmneg %vm5497_vm5 }
 0x338   : > { %6767 = vmatmul.mubr.msk.f32.vlgmr.msra.gmra.mrb[8].mxu0 %vm1268_vm7, %v6766_v43  ;;  %v3777_v30 = vpop.permute.xlu1 %3776 }
 0x339   : > { %6909 = vmatpush3.msra.mxu1 %v3777_v30  ;;  %v3784_v44 = vsel %vm3778_vm13, %v3775_v41, %v3777_v30  ;;  %4001 = vmatprep.mubr.f32.mxu0 %v7485_v58 }
 0x33a   : > { %3937 = vmatprep.subr.mxu0 %v3784_v44  ;;  %6911 = vmatmul.mubr.msk.f32.vlgmr.msra.gmra.mrb[16].mxu1 %vm1268_vm7, %v6766_v43 }
 0x33b   : > { %3938 = vmatpush1.msra.mxu0 %v3783_v56  ;;  %4766 = vmatprep.mubr.f32.mxu1 %v7485_v58 }
 0x33c   : > { %6769 = vmatmul.mubr.msk.f32.vlgmr.msra.gmra.mrb[10].mxu0 %vm1268_vm7, %v6766_v43 }
 0x347   : > { %v8501_v56 = vpop.permute.xlu0 %4102 }
 0x3a4   : > { %v1338_v27 = vpop.f32.mrb[0].mxu1 }
 0x3a5   : > { %v1340_v21 = vpop.f32.mrb[1].mxu1 }
 0x3d8   : > { %v2010_v51 = vpop.f32.mrb[2].mxu1 }
 0x3d9   : > { %v2012_v50 = vpop.f32.mrb[3].mxu1  ;;  %v2165_v0 = vmul.f32 %v2010_v51, %v8036_v45 }
 0x3da   : > { %v1939_v59 = vpop.f32.mrb[2].mxu0  ;;  %v2166_v52 = vmul.f32 %v2012_v50, %v8039_v26 }
 0x3db   : > { %v7201_v46 = vadd.f32 %v1939_v59, %v1338_v27  ;;  %v1941_v36 = vpop.f32.mrb[3].mxu0 }
 0x3dc   : > { %v7202_v3 = vadd.f32 %v1941_v36, %v1340_v21  ;;  %v2152_v4 = vpop.f32.mrb[4].mxu1 }
 0x3dd   : > { %v6882_v1 = vpop.f32.mrb[5].mxu1  ;;  %v2163_v16 = vmul.f32 %v7201_v46, %v8012_v32  ;;  %v2169_v61 = vmul.f32 %v2152_v4, %v8084_v39 }
 0x3de   : > { %v2081_v11 = vpop.f32.mrb[0].mxu0  ;;  %v2164_v2 = vmul.f32 %v7202_v3, %v8025_v54 }
 0x3df   : > { %v2083_v42 = vpop.f32.mrb[1].mxu0  ;;  %v2167_v62 = vmul.f32 %v2081_v11, %v8052_v6 }
 0x3e0   : > { %v2168_v45 = vmul.f32 %v2083_v42, %v8081_v17 }
 0x3e4   : > { %v2484_v5 = vpop.f32.mrb[8].mxu1 }
 0x3e5   : > { %v6887_v34 = vpop.f32.mrb[9].mxu1 }
 0x3ed   : > { %v2797_v53 = vpop.f32.mrb[10].mxu1 }
 0x3ee   : > { %v2798_v49 = vadd.f32 %v2797_v53, %v2484_v5  ;;  %v6892_v31 = vpop.f32.mrb[11].mxu1  ;;  %v4204_v53 = vld [vmem:[#allocation2 + $0x8] sm:$0xff] }
 0x3ef   : > { %v4203_v31 = vld [vmem:[#allocation2] sm:$0xff] }
 0x3f1   : > { %v2971_v9 = vpop.f32.mrb[6].mxu1 }
 0x3f2   : > { %v3126_v60 = vadd.f32 %v2971_v9, %v2165_v0  ;;  %v2973_v14 = vpop.f32.mrb[7].mxu1  ;;  %v2900_v63 = vpop.f32.mrb[4].mxu0  ;;  %v4208_v9 = vld [vmem:[#allocation2 + $0x28] sm:$0xff] }
 0x3f3   : > { %v3127_v12 = vadd.f32 %v2973_v14, %v2166_v52  ;;  %v3124_v18 = vadd.f32 %v2900_v63, %v2163_v16  ;;  %v2902_v48 = vpop.f32.mrb[5].mxu0  ;;  %v4205_v52 = vld [vmem:[#allocation2 + $0x10] sm:$0xff]  ;;  %v4210_v16 = vld [vmem:[#allocation2 + $0x38] sm:$0xff]  ;;  %v4207_v63 = vld [vmem:[#allocation2 + $0x20] sm:$0xff] }
 0x3f4   : > { %v3125_v55 = vadd.f32 %v2902_v48, %v2164_v2  ;;  %v6917_v14 = vpack.c.bf16 %v4210_v16, %v4208_v9  ;;  %v4209_v2 = vld [vmem:[#allocation2 + $0x30] sm:$0xff]  ;;  %v4240_v16 = vld [vmem:[#allocation2 + $0x128] sm:$0xff] }
 0x3f5   : > { %v3113_v57 = vpop.f32.mrb[12].mxu1  ;;  %v6919_v48 = vpack.c.bf16 %v4209_v2, %v4207_v63  ;;  %v4237_v9 = vld [vmem:[#allocation2 + $0x110] sm:$0xff]  ;;  %v4239_v2 = vld [vmem:[#allocation2 + $0x120] sm:$0xff] }
 0x3f6   : > { %v3123_v26 = vadd.f32 %v3113_v57, %v2798_v49  ;;  %v3042_v37 = vpop.f32.mrb[6].mxu0  ;;  %v6897_v25 = vpop.f32.mrb[13].mxu1  ;;  %v4206_v49 = vld [vmem:[#allocation2 + $0x18] sm:$0xff]  ;;  %v4213_v57 = vld [vmem:[#allocation2 + $0x50] sm:$0xff] }
 0x3f7   : > { %v3128_v32 = vadd.f32 %v3042_v37, %v2167_v62  ;;  %v3044_v29 = vpop.f32.mrb[7].mxu0  ;;  %v6913_v0 = vpack.c.bf16 %v4206_v49, %v4204_v53  ;;  %v4211_v62 = vld [vmem:[#allocation2 + $0x40] sm:$0xff]  ;;  %v4236_v53 = vld [vmem:[#allocation2 + $0x108] sm:$0xff]  ;;  %v4238_v49 = vld [vmem:[#allocation2 + $0x118] sm:$0xff] }
 0x3f8   : > { %v3130_v33 = vadd.f32 %v3123_v26, %v2169_v61  ;;  %v3129_v35 = vadd.f32 %v3044_v29, %v2168_v45  ;;  %v4216_v61 = vld [vmem:[#allocation2 + $0x68] sm:$0xff]  ;;  %v4218_v45 = vld [vmem:[#allocation2 + $0x78] sm:$0xff]  ;;  %v6923_v26 = vpack.c.bf16 %v4213_v57, %v4211_v62  ;;  %v4215_v25 = vld [vmem:[#allocation2 + $0x60] sm:$0xff] }
 0x3f9   : > { %6914 = vmatprep.subr.bf16.mxu0 %v6913_v0  ;;  %v6925_v37 = vpack.c.bf16 %v4218_v45, %v4216_v61  ;;  %v4220_v29 = vld [vmem:[#allocation2 + $0x88] sm:$0xff]  ;;  %v6945_v0 = vpack.c.bf16 %v4238_v49, %v4236_v53  ;;  %v4243_v57 = vld [vmem:[#allocation2 + $0x140] sm:$0xff]  ;;  %v4245_v61 = vld [vmem:[#allocation2 + $0x150] sm:$0xff] }
 0x3fa   : > { %v4248_v45 = vld [vmem:[#allocation2 + $0x168] sm:$0xff]  ;;  %v4265_v53 = vld [vmem:[#allocation2 + $0x1f0] sm:$0xff] }
 0x409   : > { %v3932_v43 = vpop.f32.mrb[14].mxu1 }
 0x40a   : > { %v4087_v54 = vmul.f32 %v3932_v43, %v7725_v22  ;;  %v3934_v38 = vpop.f32.mrb[15].mxu1 }
 0x40b   : > { %v3861_v40 = vpop.f32.mrb[8].mxu0  ;;  %v4088_v47 = vmul.f32 %v3934_v38, %v7728_v23  ;;  %v4221_v38 = vld [vmem:[#allocation2 + $0x90] sm:$0xff] }
 0x40c   : > { %v4094_v6 = vadd.f32 %v4087_v54, %v3126_v60  ;;  %v4085_v41 = vmul.f32 %v3861_v40, %v7714_v19  ;;  %v3863_v39 = vpop.f32.mrb[9].mxu0  ;;  %v6915_v60 = vpack.c.bf16 %v4205_v52, %v4203_v31  ;;  %v4219_v54 = vld [vmem:[#allocation2 + $0x80] sm:$0xff]  ;;  %v4224_v40 = vld [vmem:[#allocation2 + $0xa8] sm:$0xff] }
 0x40d   : > { %v4095_v30 = vadd.f32 %v4088_v47, %v3127_v12  ;;  %v4086_v17 = vmul.f32 %v3863_v39, %v7717_v20  ;;  %v4074_v44 = vpop.f32.mrb[16].mxu1  ;;  %v4212_v12 = vld [vmem:[#allocation2 + $0x48] sm:$0xff]  ;;  %v4226_v47 = vld [vmem:[#allocation2 + $0xb8] sm:$0xff]  ;;  %v4223_v39 = vld [vmem:[#allocation2 + $0xa0] sm:$0xff] }
 0x40e   : > { %v4092_v27 = vadd.f32 %v4085_v41, %v3124_v18  ;;  %v4091_v21 = vmul.f32 %v4074_v44, %v7849_v15  ;;  %v6912_v51 = vpop.f32.mrb[17].mxu1  ;;  %v8505_v22 = vadd.f32 %v8501_v56, %v4094_v6  ;;  %v4214_v18 = vld [vmem:[#allocation2 + $0x58] sm:$0xff]  ;;  %6916 = vmatpush1.bf16.msra.mxu0 %v6915_v60  ;;  %v6931_v6 = vpack.c.bf16 %v4221_v38, %v4219_v54  ;;  %v4235_v52 = vld [vmem:[#allocation2 + $0x100] sm:$0xff] }
 0x40f   : > { %v8508_v50 = vadd.f32 %v8501_v56, %v4095_v30  ;;  %v4093_v23 = vadd.f32 %v4086_v17, %v3125_v55  ;;  %v4003_v59 = vpop.f32.mrb[10].mxu0  ;;  %6918 = vmatprep.subr.bf16.mxu0 %v6917_v14  ;;  %v6921_v55 = vpack.c.bf16 %v4214_v18, %v4212_v12  ;;  %v6933_v41 = vpack.c.bf16 %v4226_v47, %v4224_v40  ;;  %v4225_v30 = vld [vmem:[#allocation2 + $0xb0] sm:$0xff]  ;;  %v4228_v17 = vld [vmem:[#allocation2 + $0xc8] sm:$0xff]  ;;  %v4230_v44 = vld [vmem:[#allocation2 + $0xd8] sm:$0xff] }
 0x410   : > { %v8511_v19 = vadd.f32 %v8501_v56, %v4092_v27  ;;  %v8513_v46 = vadd.f32 %v4091_v21, %v3130_v33  ;;  %v4089_v20 = vmul.f32 %v4003_v59, %v7840_v13  ;;  %v4005_v36 = vpop.f32.mrb[11].mxu0  ;;  %v4114_v42 = vmax.f32 %v8505_v22, 0.0  ;;  %v4222_v33 = vld [vmem:[#allocation2 + $0x98] sm:$0xff]  ;;  %v4227_v51 = vld [vmem:[#allocation2 + $0xc0] sm:$0xff]  ;;  %v4232_v59 = vld [vmem:[#allocation2 + $0xe8] sm:$0xff] }
 0x411   : > { %v4115_v3 = vmax.f32 %v8508_v50, 0.0  ;;  %v8518_v15 = vadd.f32 %v8501_v56, %v4093_v23  ;;  %v4090_v4 = vmul.f32 %v4005_v36, %v7837_v10  ;;  %v6929_v43 = vpack.c.bf16 %v4222_v33, %v4220_v29  ;;  %v4229_v23 = vld [vmem:[#allocation2 + $0xd0] sm:$0xff]  ;;  %v4242_v60 = vld [vmem:[#allocation2 + $0x138] sm:$0xff]  ;;  %v4244_v18 = vld [vmem:[#allocation2 + $0x148] sm:$0xff] }
 0x412   : > { %v4112_v1 = vmax.f32 %v8511_v19, 0.0  ;;  %v8522_v11 = vadd.f32 %v4089_v20, %v3128_v32  ;;  %6920 = vmatpush1.bf16.msra.mxu0 %v6919_v48  ;;  %v4217_v32 = vld [vmem:[#allocation2 + $0x70] sm:$0xff]  ;;  %v6935_v27 = vpack.c.bf16 %v4225_v30, %v4223_v39  ;;  %v6937_v21 = vpack.c.bf16 %v4230_v44, %v4228_v17  ;;  %v4234_v20 = vld [vmem:[#allocation2 + $0xf8] sm:$0xff]  ;;  %v4252_v33 = vld [vmem:[#allocation2 + $0x188] sm:$0xff] }
 0x413   : > { %v4113_v5 = vmax.f32 %v8518_v15, 0.0  ;;  %v8526_v34 = vadd.f32 %v4090_v4, %v3129_v35  ;;  %6922 = vmatprep.subr.bf16.mxu0 %v6921_v55  ;;  %v6927_v35 = vpack.c.bf16 %v4217_v32, %v4215_v25  ;;  %v6939_v36 = vpack.c.bf16 %v4229_v23, %v4227_v51  ;;  %v4241_v12 = vld [vmem:[#allocation2 + $0x130] sm:$0xff]  ;;  %v4246_v48 = vld [vmem:[#allocation2 + $0x158] sm:$0xff]  ;;  %v4247_v32 = vld [vmem:[#allocation2 + $0x160] sm:$0xff] }
 0x414   : > { %v7359_v13 = vpack.i.bf16 %v4112_v1, %v4115_v3  ;;  %v6941_v4 = vpack.c.bf16 %v4234_v20, %v4232_v59  ;;  %v6947_v14 = vpack.c.bf16 %v4237_v9, %v4235_v52  ;;  %v6949_v63 = vpack.c.bf16 %v4242_v60, %v4240_v16  ;;  %v4249_v29 = vld [vmem:[#allocation2 + $0x170] sm:$0xff]  ;;  %v4251_v38 = vld [vmem:[#allocation2 + $0x180] sm:$0xff]  ;;  %v4256_v47 = vld [vmem:[#allocation2 + $0x1a8] sm:$0xff] }
 0x415   : > { %v7354_v10 = vpack.i.bf16 %v4114_v42, %v4113_v5  ;;  %v6951_v55 = vpack.c.bf16 %v4241_v12, %v4239_v2  ;;  %v6953_v62 = vpack.c.bf16 %v4246_v48, %v4244_v18  ;;  %v4253_v40 = vld [vmem:[#allocation2 + $0x190] sm:$0xff]  ;;  %v4255_v30 = vld [vmem:[#allocation2 + $0x1a0] sm:$0xff] }
 0x416   : > { %7360 = vrot.lane.b32.xlu0 %v7359_v13, %s7482_s20  ;;  %6924 = vmatpush1.bf16.msra.mxu0 %v6923_v26  ;;  %v4231_v13 = vld [vmem:[#allocation2 + $0xe0] sm:$0xff]  ;;  %v4250_v26 = vld [vmem:[#allocation2 + $0x178] sm:$0xff]  ;;  %v4257_v17 = vld [vmem:[#allocation2 + $0x1b0] sm:$0xff] }
 0x417   : > { %7355 = vrot.lane.b32.xlu1 %v7354_v10, %s7482_s20  ;;  %6926 = vmatprep.subr.bf16.mxu0 %v6925_v37  ;;  %v4233_v10 = vld [vmem:[#allocation2 + $0xf0] sm:$0xff]  ;;  %v6955_v37 = vpack.c.bf16 %v4245_v61, %v4243_v57  ;;  %v6957_v25 = vpack.c.bf16 %v4250_v26, %v4248_v45  ;;  %v6967_v44 = vpack.c.bf16 %v4257_v17, %v4255_v30  ;;  %v4259_v51 = vld [vmem:[#allocation2 + $0x1c0] sm:$0xff]  ;;  %v4270_v45 = vld [vmem:[#allocation2 + $0x218] sm:$0xff] }
 0x418   : > { %v6943_v31 = vpack.c.bf16 %v4233_v10, %v4231_v13  ;;  %v4261_v59 = vld [vmem:[#allocation2 + $0x1d0] sm:$0xff]  ;;  %v4263_v10 = vld [vmem:[#allocation2 + $0x1e0] sm:$0xff]  ;;  %v4111_v61 = vadd.f32 %v8501_v56, %v8513_v46  ;;  %v4276_v17 = vld [vmem:[#allocation2 + $0x248] sm:$0xff] }
 0x419   : > { %v6971_v20 = vpack.c.bf16 %v4261_v59, %v4259_v51  ;;  %v6975_v49 = vpack.c.bf16 %v4265_v53, %v4263_v10  ;;  %v4267_v46 = vld [vmem:[#allocation2 + $0x200] sm:$0xff]  ;;  %v4273_v30 = vld [vmem:[#allocation2 + $0x230] sm:$0xff] }
 0x41a   : > { %6928 = vmatpush1.bf16.msra.mxu0 %v6927_v35  ;;  %v4254_v35 = vld [vmem:[#allocation2 + $0x198] sm:$0xff]  ;;  %v4118_v19 = vmax.f32 %v4111_v61, 0.0  ;;  %v4277_v10 = vld [vmem:[#allocation2 + $0x250] sm:$0xff]  ;;  %v4287_v61 = vld [vmem:[#allocation2 + $0x2a0] sm:$0xff] }
 0x41b   : > { %6930 = vmatprep.subr.bf16.mxu0 %v6929_v43  ;;  %v6959_v43 = vpack.c.bf16 %v4249_v29, %v4247_v32  ;;  %v6961_v54 = vpack.c.bf16 %v4254_v35, %v4252_v33  ;;  %v4272_v32 = vld [vmem:[#allocation2 + $0x228] sm:$0xff]  ;;  %v4274_v29 = vld [vmem:[#allocation2 + $0x238] sm:$0xff] }
 0x41c   : > { %v4120_v15 = vsel %vm4119_vm14, %v4118_v19, 0.0 }
 0x41e   : > { %6932 = vmatpush1.bf16.msra.mxu0 %v6931_v6  ;;  %v4258_v6 = vld [vmem:[#allocation2 + $0x1b8] sm:$0xff] }
 0x41f   : > { %6934 = vmatprep.subr.bf16.mxu0 %v6933_v41  ;;  %v6963_v41 = vpack.c.bf16 %v4253_v40, %v4251_v38  ;;  %v6965_v39 = vpack.c.bf16 %v4258_v6, %v4256_v47 }
 0x422   : > { %6936 = vmatpush1.bf16.msra.mxu0 %v6935_v27  ;;  %v4260_v27 = vld [vmem:[#allocation2 + $0x1c8] sm:$0xff] }
 0x423   : > { %6938 = vmatprep.subr.bf16.mxu0 %v6937_v21  ;;  %v4262_v21 = vld [vmem:[#allocation2 + $0x1d8] sm:$0xff] }
 0x424   : > { %v6969_v23 = vpack.c.bf16 %v4262_v21, %v4260_v27 }
 0x426   : > { %6940 = vmatpush1.bf16.msra.mxu0 %v6939_v36  ;;  %v4264_v36 = vld [vmem:[#allocation2 + $0x1e8] sm:$0xff] }
 0x427   : > { %6942 = vmatprep.subr.bf16.mxu0 %v6941_v4  ;;  %v4266_v4 = vld [vmem:[#allocation2 + $0x1f8] sm:$0xff] }
 0x428   : > { %v6973_v13 = vpack.c.bf16 %v4266_v4, %v4264_v36 }
 0x42a   : > { %6944 = vmatpush1.bf16.msra.mxu0 %v6943_v31 }
 0x42b   : > { %6946 = vmatprep.subr.bf16.mxu0 %v6945_v0 }
 0x42e   : > { %6948 = vmatpush1.bf16.msra.mxu0 %v6947_v14  ;;  %v4109_v14 = vadd.f32 %v8501_v56, %v8522_v11 }
 0x42f   : > { %6950 = vmatprep.subr.bf16.mxu0 %v6949_v63  ;;  %v8542_v63 = vadd.f32 %v8501_v56, %v8526_v34 }
 0x431   : > { %v4117_v34 = vmax.f32 %v8542_v63, 0.0 }
 0x432   : > { %6952 = vmatpush1.bf16.msra.mxu0 %v6951_v55 }
 0x433   : > { %6954 = vmatprep.subr.bf16.mxu0 %v6953_v62  ;;  %v4116_v62 = vmax.f32 %v4109_v14, 0.0  ;;  %v4286_v14 = vld [vmem:[#allocation2 + $0x298] sm:$0xff] }
 0x435   : > { %v7369_v22 = vpack.i.bf16 %v4117_v34, %v4116_v62 }
 0x436   : > { %6956 = vmatpush1.bf16.msra.mxu0 %v6955_v37  ;;  %v4269_v37 = vld [vmem:[#allocation2 + $0x210] sm:$0xff] }
 0x437   : > { %6958 = vmatprep.subr.bf16.mxu0 %v6957_v25  ;;  %v6979_v40 = vpack.c.bf16 %v4269_v37, %v4267_v46  ;;  %v4298_v46 = vld [vmem:[#allocation2 + $0x2f8] sm:$0xff] }
 0x43a   : > { %6960 = vmatpush1.bf16.msra.mxu0 %v6959_v43 }
 0x43b   : > { %6962 = vmatprep.subr.bf16.mxu0 %v6961_v54 }
 0x43e   : > { %6964 = vmatpush1.bf16.msra.mxu0 %v6963_v41  ;;  %v6981_v41 = vpack.c.bf16 %v4274_v29, %v4272_v32  ;;  %v4295_v32 = vld [vmem:[#allocation2 + $0x2e0] sm:$0xff]  ;;  %v4297_v29 = vld [vmem:[#allocation2 + $0x2f0] sm:$0xff] }
 0x43f   : > { %6966 = vmatprep.subr.bf16.mxu0 %v6965_v39  ;;  %v4271_v39 = vld [vmem:[#allocation2 + $0x220] sm:$0xff] }
 0x442   : > { %6968 = vmatpush1.bf16.msra.mxu0 %v6967_v44  ;;  %v4278_v44 = vld [vmem:[#allocation2 + $0x258] sm:$0xff] }
 0x443   : > { %6970 = vmatprep.subr.bf16.mxu0 %v6969_v23  ;;  %v6985_v4 = vpack.c.bf16 %v4278_v44, %v4276_v17  ;;  %v4305_v17 = vld [vmem:[#allocation2 + $0x330] sm:$0xff]  ;;  %v4308_v44 = vld [vmem:[#allocation2 + $0x348] sm:$0xff] }
 0x446   : > { %6972 = vmatpush1.bf16.msra.mxu0 %v6971_v20  ;;  %v6983_v20 = vpack.c.bf16 %v4273_v30, %v4271_v39  ;;  %v4303_v30 = vld [vmem:[#allocation2 + $0x320] sm:$0xff] }
 0x447   : > { %6974 = vmatprep.subr.bf16.mxu0 %v6973_v13  ;;  %v4275_v13 = vld [vmem:[#allocation2 + $0x240] sm:$0xff] }
 0x44a   : > { %6976 = vmatpush1.bf16.msra.mxu0 %v6975_v49  ;;  %v4280_v49 = vld [vmem:[#allocation2 + $0x268] sm:$0xff] }
 0x488   : > { %v7361_v31 = vpop.permute.xlu0 %7360 }
 0x489   : > { %v7363_v0 = vunpack.i.h.bf16 %v7361_v31  ;;  %v7362_v52 = vunpack.i.l.bf16 %v7361_v31  ;;  %v7356_v9 = vpop.permute.xlu1 %7355  ;;  %v4282_v31 = vld [vmem:[#allocation2 + $0x278] sm:$0xff] }
 0x48a   : > { %v7358_v16 = vunpack.i.h.bf16 %v7356_v9  ;;  %v7357_v60 = vunpack.i.l.bf16 %v7356_v9  ;;  %v4281_v9 = vld [vmem:[#allocation2 + $0x270] sm:$0xff] }
 0x48c   : > { %v4144_v2 = vsel %vm886_vm3, %v7358_v16, %v7362_v52  ;;  %v4142_v12 = vsel %vm886_vm3, %v7363_v0, %v7357_v60  ;;  %v4143_v18 = vsel %vm886_vm3, %v7357_v60, %v7358_v16  ;;  %v6989_v0 = vpack.c.bf16 %v4282_v31, %v4280_v49  ;;  %v4284_v60 = vld [vmem:[#allocation2 + $0x288] sm:$0xff]  ;;  %v4311_v31 = vld [vmem:[#allocation2 + $0x360] sm:$0xff] }
 0x48d   : > { %v8549_v48 = vmax.f32 %v4114_v42, %v4144_v2  ;;  %v4155_v55 = vmax.f32 %v4112_v1, %v4142_v12  ;;  %v4156_v11 = vmax.f32 %v4113_v5, %v4143_v18  ;;  %v4268_v42 = vld [vmem:[#allocation2 + $0x208] sm:$0xff]  ;;  %v6993_v2 = vpack.c.bf16 %v4286_v14, %v4284_v60  ;;  %v4283_v12 = vld [vmem:[#allocation2 + $0x280] sm:$0xff]  ;;  %v4285_v18 = vld [vmem:[#allocation2 + $0x290] sm:$0xff] }
 0x48e   : > { %v6977_v1 = vpack.c.bf16 %v4270_v45, %v4268_v42  ;;  %v4294_v42 = vld [vmem:[#allocation2 + $0x2d8] sm:$0xff]  ;;  %v4315_v60 = vld [vmem:[#allocation2 + $0x380] sm:$0xff]  ;;  %v4317_v14 = vld [vmem:[#allocation2 + $0x390] sm:$0xff] }
 0x48f   : > { %4169 = vrot.lane.b32.xlu0 %v4155_v55, %s7480_s29  ;;  %v7364_v57 = vpack.i.bf16 %v8549_v48, %v4156_v11 }
 0x490   : > { %6978 = vmatprep.subr.bf16.mxu0 %v6977_v1  ;;  %v4291_v1 = vld [vmem:[#allocation2 + $0x2c0] sm:$0xff] }
 0x491   : > { %7365 = vrot.lane.b32.xlu1 %v7364_v57, %s7480_s29 }
 0x495   : > { %7370 = vrot.lane.b32.xlu1 %v7369_v22, %s7482_s20  ;;  %v4292_v22 = vld [vmem:[#allocation2 + $0x2c8] sm:$0xff] }
 0x496   : > { %v7001_v19 = vpack.c.bf16 %v4294_v42, %v4292_v22  ;;  %v4323_v22 = vld [vmem:[#allocation2 + $0x3c0] sm:$0xff]  ;;  %v4325_v42 = vld [vmem:[#allocation2 + $0x3d0] sm:$0xff] }
 0x499   : > { %4140 = vrot.lane.b32.xlu1 %v4120_v15, %s7482_s20 }
 0x501   : > { %v4170_v25 = vpop.permute.xlu0 %4169 }
 0x503   : > { %v8564_v5 = vpop.permute.xlu1 %7365 }
 0x504   : > { %v7368_v26 = vunpack.i.h.bf16 %v8564_v5  ;;  %v7367_v56 = vunpack.i.l.bf16 %v8564_v5 }
 0x506   : > { %v4183_v33 = vsel %vm592_vm0, %v4170_v25, %v7367_v56  ;;  %v4184_v35 = vsel %vm592_vm0, %v7367_v56, %v7368_v26  ;;  %v4296_v56 = vld [vmem:[#allocation2 + $0x2e8] sm:$0xff] }
 0x507   : > { %v4196_v43 = vmax.f32 %v4155_v55, %v4183_v33  ;;  %v7371_v54 = vpop.permute.xlu1 %7370  ;;  %v4197_v38 = vmax.f32 %v4156_v11, %v4184_v35  ;;  %v4288_v55 = vld [vmem:[#allocation2 + $0x2a8] sm:$0xff]  ;;  %v4290_v11 = vld [vmem:[#allocation2 + $0x2b8] sm:$0xff]  ;;  %v7005_v25 = vpack.c.bf16 %v4298_v46, %v4296_v56  ;;  %v4327_v56 = vld [vmem:[#allocation2 + $0x3e0] sm:$0xff] }
 0x508   : > { %v7373_v47 = vunpack.i.h.bf16 %v7371_v54  ;;  %v7372_v6 = vunpack.i.l.bf16 %v7371_v54  ;;  %v6997_v57 = vpack.c.bf16 %v4290_v11, %v4288_v55  ;;  %v4300_v33 = vld [vmem:[#allocation2 + $0x308] sm:$0xff]  ;;  %v4302_v35 = vld [vmem:[#allocation2 + $0x318] sm:$0xff]  ;;  %v4319_v55 = vld [vmem:[#allocation2 + $0x3a0] sm:$0xff] }
 0x509   : > { %4466 = vmatprep.mubr.f32.mxu0 %v4197_v38  ;;  %v7009_v54 = vpack.c.bf16 %v4302_v35, %v4300_v33  ;;  %v4299_v38 = vld [vmem:[#allocation2 + $0x300] sm:$0xff]  ;;  %v4321_v11 = vld [vmem:[#allocation2 + $0x3b0] sm:$0xff] }
 0x50a   : > { %v4145_v27 = vsel %vm886_vm3, %v7362_v52, %v7372_v6  ;;  %v4146_v21 = vsel %vm886_vm3, %v7372_v6, %v7373_v47  ;;  %4467 = vmatmul.mubr.f32.vlgmr.msra.gmra.mrb[12].mxu0 %v4196_v43  ;;  %v4279_v52 = vld [vmem:[#allocation2 + $0x260] sm:$0xff]  ;;  %v7007_v43 = vpack.c.bf16 %v4297_v29, %v4295_v32  ;;  %v4306_v6 = vld [vmem:[#allocation2 + $0x338] sm:$0xff]  ;;  %v4329_v46 = vld [vmem:[#allocation2 + $0x3f0] sm:$0xff] }
 0x50b   : > { %v8576_v51 = vmax.f32 %v4115_v3, %v4145_v27  ;;  %v8578_v23 = vmax.f32 %v4116_v62, %v4146_v21  ;;  %v4141_v59 = vpop.permute.xlu1 %4140  ;;  %6980 = vmatpush1.bf16.msra.mxu0 %v6979_v40  ;;  %v6987_v3 = vpack.c.bf16 %v4277_v10, %v4275_v13  ;;  %v6991_v63 = vpack.c.bf16 %v4281_v9, %v4279_v52  ;;  %v4301_v40 = vld [vmem:[#allocation2 + $0x310] sm:$0xff]  ;;  %v4310_v27 = vld [vmem:[#allocation2 + $0x358] sm:$0xff]  ;;  %v4312_v13 = vld [vmem:[#allocation2 + $0x368] sm:$0xff] }
 0x50c   : > { %v8580_v36 = vmax.f32 %v4120_v15, %v4141_v59  ;;  %6982 = vmatprep.subr.bf16.mxu0 %v6981_v41  ;;  %v4147_v50 = vsel %vm886_vm3, %v7373_v47, %v4141_v59  ;;  %v6995_v62 = vpack.c.bf16 %v4285_v18, %v4283_v12  ;;  %v4293_v15 = vld [vmem:[#allocation2 + $0x2d0] sm:$0xff]  ;;  %v4304_v47 = vld [vmem:[#allocation2 + $0x328] sm:$0xff]  ;;  %v7011_v41 = vpack.c.bf16 %v4301_v40, %v4299_v38  ;;  %v4314_v10 = vld [vmem:[#allocation2 + $0x378] sm:$0xff] }
 0x50d   : > { %v7374_v53 = vpack.i.bf16 %v8578_v23, %v8576_v51  ;;  %v8588_v16 = vmax.f32 %v4117_v34, %v4147_v50  ;;  %v4289_v34 = vld [vmem:[#allocation2 + $0x2b0] sm:$0xff]  ;;  %v7003_v37 = vpack.c.bf16 %v4293_v15, %v4291_v1  ;;  %v7013_v39 = vpack.c.bf16 %v4306_v6, %v4304_v47  ;;  %v4336_v40 = vld [vmem:[#allocation2 + $0x428] sm:$0xff]  ;;  %v4338_v47 = vld [vmem:[#allocation2 + $0x438] sm:$0xff] }
 0x50e   : > { %4181 = vrot.lane.b32.xlu1 %v8580_v36, %s7480_s29  ;;  %v6999_v45 = vpack.c.bf16 %v4289_v34, %v4287_v61  ;;  %v7015_v21 = vpack.c.bf16 %v4305_v17, %v4303_v30  ;;  %v7017_v59 = vpack.c.bf16 %v4310_v27, %v4308_v44  ;;  %v7021_v49 = vpack.c.bf16 %v4314_v10, %v4312_v13  ;;  %v4313_v50 = vld [vmem:[#allocation2 + $0x370] sm:$0xff]  ;;  %v4342_v13 = vld [vmem:[#allocation2 + $0x458] sm:$0xff] }
 0x50f   : > { %7375 = vrot.lane.b32.xlu0 %v7374_v53, %s7480_s29  ;;  %6984 = vmatpush1.bf16.msra.mxu0 %v6983_v20  ;;  %v4307_v20 = vld [vmem:[#allocation2 + $0x340] sm:$0xff]  ;;  %v7023_v52 = vpack.c.bf16 %v4313_v50, %v4311_v31  ;;  %v7027_v12 = vpack.c.bf16 %v4317_v14, %v4315_v60  ;;  %v7031_v61 = vpack.c.bf16 %v4321_v11, %v4319_v55  ;;  %v4333_v38 = vld [vmem:[#allocation2 + $0x410] sm:$0xff]  ;;  %v4346_v31 = vld [vmem:[#allocation2 + $0x478] sm:$0xff] }
 0x510   : > { %6986 = vmatprep.subr.bf16.mxu0 %v6985_v4  ;;  %v4309_v4 = vld [vmem:[#allocation2 + $0x350] sm:$0xff]  ;;  %v7035_v1 = vpack.c.bf16 %v4325_v42, %v4323_v22  ;;  %v7039_v32 = vpack.c.bf16 %v4329_v46, %v4327_v56  ;;  %v7045_v5 = vpack.c.bf16 %v4338_v47, %v4336_v40  ;;  %v4368_v47 = vld [vmem:[#allocation2 + $0x528] sm:$0xff] }
 0x511   : > { %v7019_v53 = vpack.c.bf16 %v4309_v4, %v4307_v20  ;;  %v4340_v4 = vld [vmem:[#allocation2 + $0x448] sm:$0xff]  ;;  %v4365_v40 = vld [vmem:[#allocation2 + $0x510] sm:$0xff] }
 0x512   : > { %v7049_v10 = vpack.c.bf16 %v4342_v13, %v4340_v4  ;;  %v4373_v4 = vld [vmem:[#allocation2 + $0x550] sm:$0xff]  ;;  %v4376_v13 = vld [vmem:[#allocation2 + $0x568] sm:$0xff] }
 0x513   : > { %4179 = vrot.lane.b32.xlu0 %v8588_v16, %s7480_s29  ;;  %6988 = vmatpush1.bf16.msra.mxu0 %v6987_v3  ;;  %v4316_v3 = vld [vmem:[#allocation2 + $0x388] sm:$0xff] }
 0x514   : > { %6990 = vmatprep.subr.bf16.mxu0 %v6989_v0  ;;  %v4318_v0 = vld [vmem:[#allocation2 + $0x398] sm:$0xff] }
 0x515   : > { %v7025_v9 = vpack.c.bf16 %v4318_v0, %v4316_v3  ;;  %v4343_v0 = vld [vmem:[#allocation2 + $0x460] sm:$0xff] }
 0x517   : > { %6992 = vmatpush1.bf16.msra.mxu0 %v6991_v63  ;;  %v4320_v63 = vld [vmem:[#allocation2 + $0x3a8] sm:$0xff] }
 0x518   : > { %6994 = vmatprep.subr.bf16.mxu0 %v6993_v2  ;;  %v4322_v2 = vld [vmem:[#allocation2 + $0x3b8] sm:$0xff] }
 0x519   : > { %v7029_v18 = vpack.c.bf16 %v4322_v2, %v4320_v63  ;;  %v4347_v63 = vld [vmem:[#allocation2 + $0x480] sm:$0xff]  ;;  %v4349_v2 = vld [vmem:[#allocation2 + $0x490] sm:$0xff] }
 0x51a   : > { %v7059_v55 = vpack.c.bf16 %v4349_v2, %v4347_v63  ;;  %v4383_v2 = vld [vmem:[#allocation2 + $0x5a0] sm:$0xff] }
 0x51b   : > { %6996 = vmatpush1.bf16.msra.mxu0 %v6995_v62  ;;  %v4324_v62 = vld [vmem:[#allocation2 + $0x3c8] sm:$0xff] }
 0x51c   : > { %6998 = vmatprep.subr.bf16.mxu0 %v6997_v57  ;;  %v4326_v57 = vld [vmem:[#allocation2 + $0x3d8] sm:$0xff] }
 0x51d   : > { %v7033_v34 = vpack.c.bf16 %v4326_v57, %v4324_v62  ;;  %v4351_v62 = vld [vmem:[#allocation2 + $0x4a0] sm:$0xff]  ;;  %v4353_v57 = vld [vmem:[#allocation2 + $0x4b0] sm:$0xff] }
 0x51e   : > { %v7063_v22 = vpack.c.bf16 %v4353_v57, %v4351_v62  ;;  %v4387_v57 = vld [vmem:[#allocation2 + $0x5c0] sm:$0xff] }
 0x51f   : > { %7000 = vmatpush1.bf16.msra.mxu0 %v6999_v45  ;;  %v4328_v45 = vld [vmem:[#allocation2 + $0x3e8] sm:$0xff] }
 0x520   : > { %7002 = vmatprep.subr.bf16.mxu0 %v7001_v19  ;;  %v4330_v19 = vld [vmem:[#allocation2 + $0x3f8] sm:$0xff] }
 0x521   : > { %v7037_v15 = vpack.c.bf16 %v4330_v19, %v4328_v45  ;;  %v4355_v45 = vld [vmem:[#allocation2 + $0x4c0] sm:$0xff]  ;;  %v4357_v19 = vld [vmem:[#allocation2 + $0x4d0] sm:$0xff] }
 0x522   : > { %v7067_v56 = vpack.c.bf16 %v4357_v19, %v4355_v45  ;;  %v4391_v19 = vld [vmem:[#allocation2 + $0x5e0] sm:$0xff] }
 0x523   : > { %7004 = vmatpush1.bf16.msra.mxu0 %v7003_v37  ;;  %v4332_v37 = vld [vmem:[#allocation2 + $0x408] sm:$0xff] }
 0x524   : > { %7006 = vmatprep.subr.bf16.mxu0 %v7005_v25  ;;  %v4334_v25 = vld [vmem:[#allocation2 + $0x418] sm:$0xff] }
 0x525   : > { %v7041_v29 = vpack.c.bf16 %v4334_v25, %v4332_v37  ;;  %v4359_v37 = vld [vmem:[#allocation2 + $0x4e0] sm:$0xff]  ;;  %v4361_v25 = vld [vmem:[#allocation2 + $0x4f0] sm:$0xff] }
 0x527   : > { %7008 = vmatpush1.bf16.msra.mxu0 %v7007_v43 }
 0x528   : > { %7010 = vmatprep.subr.bf16.mxu0 %v7009_v54  ;;  %v4331_v54 = vld [vmem:[#allocation2 + $0x400] sm:$0xff] }
 0x529   : > { %v7043_v27 = vpack.c.bf16 %v4333_v38, %v4331_v54  ;;  %v4363_v38 = vld [vmem:[#allocation2 + $0x500] sm:$0xff] }
 0x52b   : > { %7012 = vmatpush1.bf16.msra.mxu0 %v7011_v41 }
 0x52c   : > { %7014 = vmatprep.subr.bf16.mxu0 %v7013_v39 }
 0x52f   : > { %7016 = vmatpush1.bf16.msra.mxu0 %v7015_v21 }
 0x530   : > { %7018 = vmatprep.subr.bf16.mxu0 %v7017_v59  ;;  %v4335_v59 = vld [vmem:[#allocation2 + $0x420] sm:$0xff] }
 0x533   : > { %7020 = vmatpush1.bf16.msra.mxu0 %v7019_v53  ;;  %v4341_v53 = vld [vmem:[#allocation2 + $0x450] sm:$0xff] }
 0x534   : > { %7022 = vmatprep.subr.bf16.mxu0 %v7021_v49  ;;  %v4344_v49 = vld [vmem:[#allocation2 + $0x468] sm:$0xff] }
 0x535   : > { %v7053_v3 = vpack.c.bf16 %v4346_v31, %v4344_v49  ;;  %v4377_v49 = vld [vmem:[#allocation2 + $0x570] sm:$0xff]  ;;  %v4380_v31 = vld [vmem:[#allocation2 + $0x588] sm:$0xff] }
 0x537   : > { %7024 = vmatpush1.bf16.msra.mxu0 %v7023_v52  ;;  %v4345_v52 = vld [vmem:[#allocation2 + $0x470] sm:$0xff] }
 0x538   : > { %7026 = vmatprep.subr.bf16.mxu0 %v7025_v9  ;;  %v4350_v9 = vld [vmem:[#allocation2 + $0x498] sm:$0xff]  ;;  %v7055_v60 = vpack.c.bf16 %v4345_v52, %v4343_v0  ;;  %v4379_v52 = vld [vmem:[#allocation2 + $0x580] sm:$0xff] }
 0x53b   : > { %7028 = vmatpush1.bf16.msra.mxu0 %v7027_v12  ;;  %v4352_v12 = vld [vmem:[#allocation2 + $0x4a8] sm:$0xff] }
 0x53c   : > { %7030 = vmatprep.subr.bf16.mxu0 %v7029_v18  ;;  %v4354_v18 = vld [vmem:[#allocation2 + $0x4b8] sm:$0xff] }
 0x53d   : > { %v7061_v11 = vpack.c.bf16 %v4354_v18, %v4352_v12  ;;  %v4385_v12 = vld [vmem:[#allocation2 + $0x5b0] sm:$0xff]  ;;  %v4388_v18 = vld [vmem:[#allocation2 + $0x5c8] sm:$0xff] }
 0x53f   : > { %7032 = vmatpush1.bf16.msra.mxu0 %v7031_v61  ;;  %v4356_v61 = vld [vmem:[#allocation2 + $0x4c8] sm:$0xff] }
 0x540   : > { %7034 = vmatprep.subr.bf16.mxu0 %v7033_v34  ;;  %v4358_v34 = vld [vmem:[#allocation2 + $0x4d8] sm:$0xff] }
 0x541   : > { %v7065_v42 = vpack.c.bf16 %v4358_v34, %v4356_v61  ;;  %v4389_v61 = vld [vmem:[#allocation2 + $0x5d0] sm:$0xff]  ;;  %v4392_v34 = vld [vmem:[#allocation2 + $0x5e8] sm:$0xff] }
 0x543   : > { %7036 = vmatpush1.bf16.msra.mxu0 %v7035_v1  ;;  %v4360_v1 = vld [vmem:[#allocation2 + $0x4e8] sm:$0xff] }
 0x544   : > { %7038 = vmatprep.subr.bf16.mxu0 %v7037_v15  ;;  %v4362_v15 = vld [vmem:[#allocation2 + $0x4f8] sm:$0xff] }
 0x545   : > { %v7069_v46 = vpack.c.bf16 %v4362_v15, %v4360_v1  ;;  %v4393_v1 = vld [vmem:[#allocation2 + $0x5f0] sm:$0xff]  ;;  %v4396_v15 = vld [vmem:[#allocation2 + $0x608] sm:$0xff] }
 0x547   : > { %7040 = vmatpush1.bf16.msra.mxu0 %v7039_v32  ;;  %v4364_v32 = vld [vmem:[#allocation2 + $0x508] sm:$0xff] }
 0x548   : > { %7042 = vmatprep.subr.bf16.mxu0 %v7041_v29  ;;  %v4366_v29 = vld [vmem:[#allocation2 + $0x518] sm:$0xff] }
 0x549   : > { %v7073_v54 = vpack.c.bf16 %v4366_v29, %v4364_v32  ;;  %v4397_v32 = vld [vmem:[#allocation2 + $0x610] sm:$0xff] }
 0x580   : > { %v8602_v39 = vpop.permute.xlu1 %4181 }
 0x581   : > { %v8592_v33 = vpop.permute.xlu0 %7375 }
 0x582   : > { %v7378_v35 = vunpack.i.h.bf16 %v8592_v33  ;;  %v7377_v43 = vunpack.i.l.bf16 %v8592_v33 }
 0x584   : > { %v4185_v6 = vsel %vm592_vm0, %v7368_v26, %v7377_v43  ;;  %v4186_v41 = vsel %vm592_vm0, %v7377_v43, %v7378_v35  ;;  %v4337_v26 = vld [vmem:[#allocation2 + $0x430] sm:$0xff]  ;;  %v7071_v43 = vpack.c.bf16 %v4361_v25, %v4359_v37  ;;  %v4395_v25 = vld [vmem:[#allocation2 + $0x600] sm:$0xff] }
 0x585   : > { %v4198_v30 = vmax.f32 %v8549_v48, %v4185_v6  ;;  %v8605_v17 = vpop.permute.xlu0 %4179  ;;  %v4199_v44 = vmax.f32 %v8576_v51, %v4186_v41  ;;  %v7047_v48 = vpack.c.bf16 %v4337_v26, %v4335_v59  ;;  %v4339_v51 = vld [vmem:[#allocation2 + $0x440] sm:$0xff]  ;;  %v4370_v6 = vld [vmem:[#allocation2 + $0x538] sm:$0xff]  ;;  %v7075_v41 = vpack.c.bf16 %v4365_v40, %v4363_v38 }
 0x586   : > { %v4188_v21 = vsel %vm592_vm0, %v8605_v17, %v8602_v39  ;;  %v7051_v50 = vpack.c.bf16 %v4341_v53, %v4339_v51  ;;  %v4375_v53 = vld [vmem:[#allocation2 + $0x560] sm:$0xff]  ;;  %v4187_v29 = vsel %vm592_vm0, %v7378_v35, %v8605_v17  ;;  %v4202_v38 = vmax.f32 %v8580_v36, %v8602_v39  ;;  %v6772_v39 = vld [vmem:[%s9114_s5 + $0x18] sm:$0xff] }
 0x587   : > { %v4201_v20 = vmax.f32 %v8588_v16, %v4188_v21  ;;  %4537 = vmatprep.mubr.f32.mxu0 %v4199_v44  ;;  %v4348_v16 = vld [vmem:[#allocation2 + $0x488] sm:$0xff]  ;;  %v4367_v44 = vld [vmem:[#allocation2 + $0x520] sm:$0xff] }
 0x588   : > { %4538 = vmatmul.mubr.f32.vlgmr.msra.gmra.mrb[12].mxu0 %v4198_v30  ;;  %v7057_v14 = vpack.c.bf16 %v4350_v9, %v4348_v16  ;;  %v7077_v30 = vpack.c.bf16 %v4370_v6, %v4368_v47  ;;  %v4372_v21 = vld [vmem:[#allocation2 + $0x548] sm:$0xff]  ;;  %v4381_v16 = vld [vmem:[#allocation2 + $0x590] sm:$0xff] }
 0x589   : > { %7044 = vmatpush1.bf16.msra.mxu0 %v7043_v27  ;;  %4608 = vmatprep.mubr.f32.mxu0 %v4201_v20  ;;  %v4369_v27 = vld [vmem:[#allocation2 + $0x530] sm:$0xff]  ;;  %v4371_v20 = vld [vmem:[#allocation2 + $0x540] sm:$0xff]  ;;  %v4384_v9 = vld [vmem:[#allocation2 + $0x5a8] sm:$0xff] }
 0x58a   : > { %7046 = vmatprep.subr.bf16.mxu0 %v7045_v5  ;;  %v4374_v5 = vld [vmem:[#allocation2 + $0x558] sm:$0xff]  ;;  %v7079_v59 = vpack.c.bf16 %v4369_v27, %v4367_v44 }
 0x58b   : > { %v7081_v26 = vpack.c.bf16 %v4374_v5, %v4372_v21  ;;  %v6775_v21 = vld [vmem:[%s9114_s5 + $0x30] sm:$0xff] }
 0x58d   : > { %7048 = vmatpush1.bf16.msra.mxu0 %v7047_v48  ;;  %v4378_v48 = vld [vmem:[#allocation2 + $0x578] sm:$0xff] }
 0x58e   : > { %7050 = vmatprep.subr.bf16.mxu0 %v7049_v10  ;;  %v7083_v10 = vpack.c.bf16 %v4373_v4, %v4371_v20  ;;  %v7085_v51 = vpack.c.bf16 %v4378_v48, %v4376_v13  ;;  %v6778_v20 = vld [vmem:[%s9114_s5 + $0x20] sm:$0xff] }
 0x591   : > { %7052 = vmatpush1.bf16.msra.mxu0 %v7051_v50  ;;  %v4382_v50 = vld [vmem:[#allocation2 + $0x598] sm:$0xff] }
 0x592   : > { %7054 = vmatprep.subr.bf16.mxu0 %v7053_v3  ;;  %v7087_v3 = vpack.c.bf16 %v4377_v49, %v4375_v53  ;;  %v7089_v0 = vpack.c.bf16 %v4382_v50, %v4380_v31  ;;  %v6781_v31 = vld [vmem:[%s9114_s5 + $0x38] sm:$0xff] }
 0x595   : > { %7056 = vmatpush1.bf16.msra.mxu0 %v7055_v60  ;;  %v4386_v60 = vld [vmem:[#allocation2 + $0x5b8] sm:$0xff] }
 0x596   : > { %7058 = vmatprep.subr.bf16.mxu0 %v7057_v14  ;;  %v7091_v14 = vpack.c.bf16 %v4381_v16, %v4379_v52  ;;  %v7093_v63 = vpack.c.bf16 %v4386_v60, %v4384_v9  ;;  %v6784_v52 = vld [vmem:[%s9114_s5 + $0x28] sm:$0xff] }
 0x599   : > { %7060 = vmatpush1.bf16.msra.mxu0 %v7059_v55  ;;  %v4390_v55 = vld [vmem:[#allocation2 + $0x5d8] sm:$0xff] }
 0x59a   : > { %7062 = vmatprep.subr.bf16.mxu0 %v7061_v11  ;;  %v7095_v11 = vpack.c.bf16 %v4385_v12, %v4383_v2  ;;  %v7097_v62 = vpack.c.bf16 %v4390_v55, %v4388_v18  ;;  %v6787_v2 = vld [vmem:[%s9114_s5 + $0x40] sm:$0xff] }
 0x59b   : > { %v506_v55 = vld [vmem:[%s9123_s14] sm:$0xf] }
 0x59d   : > { %7064 = vmatpush1.bf16.msra.mxu0 %v7063_v22  ;;  %v4394_v22 = vld [vmem:[#allocation2 + $0x5f8] sm:$0xff] }
 0x59e   : > { %7066 = vmatprep.subr.bf16.mxu0 %v7065_v42  ;;  %v7099_v42 = vpack.c.bf16 %v4389_v61, %v4387_v57  ;;  %v7101_v45 = vpack.c.bf16 %v4394_v22, %v4392_v34 }
 0x5a1   : > { %7068 = vmatpush1.bf16.msra.mxu0 %v7067_v56  ;;  %v4398_v56 = vld [vmem:[#allocation2 + $0x618] sm:$0xff] }
 0x5a2   : > { %7070 = vmatprep.subr.bf16.mxu0 %v7069_v46  ;;  %v7103_v46 = vpack.c.bf16 %v4393_v1, %v4391_v19  ;;  %v7105_v37 = vpack.c.bf16 %v4398_v56, %v4396_v15  ;;  %v5462_v15 = vrot.slane %v506_v55, %v7681_v7  ;;  %v5466_v56 = vrot.slane %v506_v55, %v7684_v8 }
 0x5a5   : > { %7072 = vmatpush1.bf16.msra.mxu0 %v7071_v43  ;;  %v7107_v43 = vpack.c.bf16 %v4397_v32, %v4395_v25 }
 0x5a6   : > { %7074 = vmatprep.subr.bf16.mxu0 %v7073_v54  ;;  %v4200_v54 = vmax.f32 %v8578_v23, %v4187_v29  ;;  %v5481_v23 = vld [vmem:[%s9115_s6] sm:$0xff] }
 0x5a9   : > { %7076 = vmatpush1.bf16.msra.mxu0 %v7075_v41  ;;  %v4686_v41 = vld [vmem:[%s9114_s5] sm:$0xff] }
 0x5aa   : > { %7078 = vmatprep.subr.bf16.mxu0 %v7077_v30 }
 0x5ad   : > { %7080 = vmatpush1.bf16.msra.mxu0 %v7079_v59 }
 0x5ae   : > { %7082 = vmatprep.subr.bf16.mxu0 %v7081_v26 }
 0x5b1   : > { %7084 = vmatpush1.bf16.msra.mxu0 %v7083_v10  ;;  %v6777_v10 = vld [vmem:[%s9114_s5 + $0x8] sm:$0xff] }
 0x5b2   : > { %7086 = vmatprep.subr.bf16.mxu0 %v7085_v51 }
 0x5b5   : > { %7088 = vmatpush1.bf16.msra.mxu0 %v7087_v3 }
 0x5b6   : > { %7090 = vmatprep.subr.bf16.mxu0 %v7089_v0 }
 0x5b9   : > { %7092 = vmatpush1.bf16.msra.mxu0 %v7091_v14  ;;  %v6783_v14 = vld [vmem:[%s9114_s5 + $0x10] sm:$0xff] }
 0x5ba   : > { %7094 = vmatprep.subr.bf16.mxu0 %v7093_v63 }
 0x5bd   : > { %7096 = vmatpush1.bf16.msra.mxu0 %v7095_v11  ;;  %v4936_v11 = vrot.slane %v506_v55, %v7740_v24 }
 0x5be   : > { %7098 = vmatprep.subr.bf16.mxu0 %v7097_v62  ;;  %v4940_v62 = vrot.slane %v506_v55, %v7749_v28  ;;  %v8709_v28 = vrot.slane %v5462_v15, %v7681_v7 }
 0x5bf   : > { %v8699_v57 = vrot.slane %v4936_v11, %v7740_v24  ;;  %v6807_v11 = vld [vmem:[%s9116_s7 + $0x40] sm:$0xff] }
 0x5c0   : > { %v8702_v61 = vrot.slane %v4940_v62, %v7740_v24 }
 0x5c1   : > { %7100 = vmatpush1.bf16.msra.mxu0 %v7099_v42 }
 0x5c2   : > { %7102 = vmatprep.subr.bf16.mxu0 %v7101_v45 }
 0x5c5   : > { %7104 = vmatpush1.bf16.msra.mxu0 %v7103_v46  ;;  %v8712_v46 = vrot.slane %v5466_v56, %v7681_v7 }
 0x5c6   : > { %7106 = vmatprep.subr.bf16.mxu0 %v7105_v37 }
 0x5c8   : > { %4609 = vmatmul.mubr.f32.vlgmr.msra.gmra.mrb[12].mxu0 %v4200_v54 }
 0x5c9   : > { %7108 = vmatpush1.bf16.msra.mxu0 %v7107_v43  ;;  %4679 = vmatprep.mubr.f32.mxu0 %v7485_v58 }
 0x5d0   : > { %6771 = vmatmul.mubr.msk.f32.vlgmr.msra.gmra.mrb[12].mxu0 %vm4119_vm14, %v4202_v38 }
 0x6a3   : > { %v4681_v40 = vpop.f32.mrb[12].mxu0 }
 0x6a4   : > { %4691 = vrot.lane.b32.xlu0 %v4681_v40, %s7491_s26  ;;  %v4683_v33 = vpop.f32.mrb[13].mxu0 }
 0x6a5   : > { %4693 = vrot.lane.b32.xlu1 %v4683_v33, %s7491_s26 }
 0x6a8   : > { %4849 = vrot.lane.b32.xlu0 %v4681_v40, %s7480_s29 }
 0x6a9   : > { %4851 = vrot.lane.b32.xlu1 %v4683_v33, %s7480_s29 }
 0x6ac   : > { %4957 = vrot.lane.b32.xlu0 %v4681_v40, %s7492_s27 }
 0x6ad   : > { %4959 = vrot.lane.b32.xlu1 %v4683_v33, %s7492_s27 }
 0x6b0   : > { %5039 = vrot.lane.b32.xlu0 %v4681_v40, %s7482_s20 }
 0x6b1   : > { %5041 = vrot.lane.b32.xlu1 %v4683_v33, %s7482_s20 }
 0x6b4   : > { %5122 = vrot.lane.b32.xlu0 %v4681_v40, %s9134_s30 }
 0x6b5   : > { %5124 = vrot.lane.b32.xlu1 %v4683_v33, %s9134_s30 }
 0x6b8   : > { %5211 = vrot.lane.b32.xlu0 %v4681_v40, %s7493_s17 }
 0x6b9   : > { %5213 = vrot.lane.b32.xlu1 %v4683_v33, %s7493_s17 }
 0x6bc   : > { %5293 = vrot.lane.b32.xlu0 %v4681_v40, %s7483_s18 }
 0x6bd   : > { %5295 = vrot.lane.b32.xlu1 %v4683_v33, %s7483_s18 }
 0x6c0   : > { %5376 = vrot.lane.b32.xlu0 %v4681_v40, %s9136_s16 }
 0x6c1   : > { %5378 = vrot.lane.b32.xlu1 %v4683_v33, %s9136_s16  ;;  %s7494_s16 = smov 15  }
 0x6c4   : > { %5484 = vperm.xlu0 %7352, %v5481_v23  }
 0x716   : > { %v4692_v36 = vpop.permute.xlu0 %4691 }
 0x717   : > { %v4694_v35 = vpop.permute.xlu1 %4693 }
 0x718   : > { %v4696_v17 = vsel %vm4695_vm15, %v4692_v36, %v4694_v35  ;;  %4702 = vmatprep.subr.mxu1 %v4694_v35 }
 0x719   : > { %4703 = vmatpush1.msra.mxu1 %v4696_v17  ;;  %v6259_v17 = vld [vmem:[%s9117_s8] sm:$0xff] }
 0x71a   : > { %6773 = vmatmul.mubr.msk.f32.vlgmr.msra.gmra.mrb[18].mxu1 %vm1268_vm7, %v6772_v39  ;;  %4776 = vmatprep.subr.mxu1 %v4683_v33  ;;  %v4850_v6 = vpop.permute.xlu0 %4849 }
 0x71b   : > { %4777 = vmatpush1.msra.mxu1 %v4681_v40  ;;  %v4852_v47 = vpop.permute.xlu1 %4851  ;;  %4840 = vmatprep.mubr.f32.mxu1 %v7485_v58 }
 0x71c   : > { %4859 = vmatprep.subr.mxu1 %v4852_v47  ;;  %v4853_v30 = vsel %vm592_vm0, %v4850_v6, %v4852_v47 }
 0x71e   : > { %v4958_v27 = vpop.permute.xlu0 %4957 }
 0x71f   : > { %v4960_v44 = vpop.permute.xlu1 %4959 }
 0x720   : > { %v4962_v59 = vsel %vm4961_vm1, %v4958_v27, %v4960_v44  ;;  %v5504_v27 = vld [vmem:[%s9116_s7] sm:$0xff] }
 0x722   : > { %6774 = vmatmul.mubr.msk.f32.vlgmr.msra.gmra.mrb[18].mxu1 %vm1268_vm7, %v4686_v41  ;;  %v5040_v26 = vpop.permute.xlu0 %5039  ;;  %v6789_v41 = vld [vmem:[%s9116_s7 + $0x18] sm:$0xff] }
 0x723   : > { %4860 = vmatpush1.msra.mxu1 %v4853_v30  ;;  %4923 = vmatprep.mubr.f32.mxu1 %v7485_v58  ;;  %v5042_v5 = vpop.permute.xlu1 %5041 }
 0x724   : > { %4968 = vmatprep.subr.mxu1 %v4960_v44  ;;  %v5043_v4 = vsel %vm886_vm3, %v5040_v26, %v5042_v5 }
 0x726   : > { %v5123_v48 = vpop.permute.xlu0 %5122 }
 0x727   : > { %v5125_v13 = vpop.permute.xlu1 %5124 }
 0x728   : > { %v5126_v51 = vsel %vm2188_vm10, %v5123_v48, %v5125_v13  ;;  %v6798_v48 = vld [vmem:[%s9116_s7 + $0x20] sm:$0xff] }
 0x72a   : > { %6776 = vmatmul.mubr.msk.f32.vlgmr.msra.gmra.mrb[18].mxu1 %vm1268_vm7, %v6775_v21  ;;  %v5212_v49 = vpop.permute.xlu0 %5211 }
 0x72b   : > { %4969 = vmatpush1.msra.mxu1 %v4962_v59  ;;  %5032 = vmatprep.mubr.f32.mxu1 %v7485_v58  ;;  %v5214_v53 = vpop.permute.xlu1 %5213 }
 0x72c   : > { %5049 = vmatprep.subr.mxu1 %v5042_v5  ;;  %v5216_v3 = vsel %vm5215_vm2, %v5212_v49, %v5214_v53  ;;  %v6797_v49 = vld [vmem:[%s9116_s7 + $0x8] sm:$0xff] }
 0x72e   : > { %6779 = vmatmul.mubr.msk.f32.vlgmr.msra.gmra.mrb[20].mxu1 %vm1268_vm7, %v6778_v20  ;;  %v5294_v0 = vpop.permute.xlu0 %5293  ;;  %v6795_v20 = vld [vmem:[%s9116_s7 + $0x30] sm:$0xff] }
 0x72f   : > { %5050 = vmatpush1.msra.mxu1 %v5043_v4  ;;  %5113 = vmatprep.mubr.f32.mxu1 %v7485_v58  ;;  %v5296_v50 = vpop.permute.xlu1 %5295 }
 0x730   : > { %5132 = vmatprep.subr.mxu1 %v5125_v13  ;;  %v5297_v16 = vsel %vm1157_vm4, %v5294_v0, %v5296_v50 }
 0x732   : > { %v5377_v60 = vpop.permute.xlu0 %5376 }
 0x733   : > { %v5379_v9 = vpop.permute.xlu1 %5378 }
 0x734   : > { %v5380_v63 = vsel %vm3149_vm12, %v5377_v60, %v5379_v9  ;;  %v6804_v60 = vld [vmem:[%s9116_s7 + $0x28] sm:$0xff] }
 0x736   : > { %6780 = vmatmul.mubr.msk.f32.vlgmr.msra.gmra.mrb[20].mxu1 %vm1268_vm7, %v6777_v10 }
 0x737   : > { %5133 = vmatpush1.msra.mxu1 %v5126_v51  ;;  %5196 = vmatprep.mubr.f32.mxu1 %v7485_v58 }
 0x738   : > { %5222 = vmatprep.subr.mxu1 %v5214_v53 }
 0x73e   : > { %6782 = vmatmul.mubr.msk.f32.vlgmr.msra.gmra.mrb[20].mxu1 %vm1268_vm7, %v6781_v31 }
 0x73f   : > { %5223 = vmatpush1.msra.mxu1 %v5216_v3  ;;  %5286 = vmatprep.mubr.f32.mxu1 %v7485_v58 }
 0x740   : > { %5303 = vmatprep.subr.mxu1 %v5296_v50 }
 0x742   : > { %6785 = vmatmul.mubr.msk.f32.vlgmr.msra.gmra.mrb[22].mxu1 %vm1268_vm7, %v6784_v52  ;;  %v6801_v52 = vld [vmem:[%s9116_s7 + $0x38] sm:$0xff] }
 0x743   : > { %5304 = vmatpush1.msra.mxu1 %v5297_v16  ;;  %5367 = vmatprep.mubr.f32.mxu1 %v7485_v58  ;;  %v5485_v43 = vpop.permute.xlu0 %5484 }
 0x744   : > { %5386 = vmatprep.subr.mxu1 %v5379_v9 }
 0x74a   : > { %6786 = vmatmul.mubr.msk.f32.vlgmr.msra.gmra.mrb[22].mxu1 %vm1268_vm7, %v6783_v14 }
 0x74b   : > { %5387 = vmatpush1.msra.mxu1 %v5380_v63  ;;  %5450 = vmatprep.mubr.f32.mxu1 %v7485_v58 }
 0x752   : > { %6788 = vmatmul.mubr.msk.f32.vlgmr.msra.gmra.mrb[22].mxu1 %vm1268_vm7, %v6787_v2 }
 0x753   : > { %5583 = vmatprep.mubr.f32.mxu1 %v7485_v58 }
 0x7fd   : > { %v4925_v12 = vpop.f32.mrb[18].mxu1 }
 0x7fe   : > { %v4927_v18 = vpop.f32.mrb[19].mxu1  ;;  %v4951_v34 = vmul.f32 %v8699_v57, %v4925_v12  ;;  %v6803_v12 = vld [vmem:[%s9116_s7 + $0x10] sm:$0xff] }
 0x7ff   : > { %v4952_v22 = vmul.f32 %v8702_v61, %v4927_v18 }
 0x811   : > { %v5198_v42 = vpop.f32.mrb[20].mxu1 }
 0x812   : > { %v5205_v45 = vadd.f32 %v5198_v42, %v4951_v34  ;;  %v5200_v19 = vpop.f32.mrb[21].mxu1 }
 0x813   : > { %v5206_v1 = vadd.f32 %v5200_v19, %v4952_v22 }
 0x825   : > { %v5452_v24 = vpop.f32.mrb[22].mxu1 }
 0x826   : > { %v5477_v37 = vmul.f32 %v8709_v28, %v5452_v24  ;;  %v5454_v25 = vpop.f32.mrb[23].mxu1 }
 0x827   : > { %v5478_v32 = vmul.f32 %v8712_v46, %v5454_v25  ;;  %v6293_v25 = vld [vmem:[%s9121_s12] sm:$0xff] }
 0x828   : > { %v5479_v29 = vadd.f32 %v5477_v37, %v5205_v45 }
 0x829   : > { %v5480_v54 = vadd.f32 %v5478_v32, %v5206_v1  ;;  %v6294_v32 = vld [vmem:[%s9121_s12 + $0x8] sm:$0xff] }
 0x82a   : > { %v5487_v38 = vadd.f32 %v5485_v43, %v5479_v29  ;;  %v7495_v29 = vmov 0.0|0.0  }
 0x82b   : > { %v5488_v40 = vadd.f32 %v5485_v43, %v5480_v54  ;;  %v7110_v43 = vpack.c.bf16 %v6294_v32, %v6293_v25  ;;  %v6455_v25 = vld [vmem:[%s9118_s9 + $0x98] sm:$0xff] }
 0x82c   : > { %v5489_v33 = vmax.f32 %v5487_v38, 0.0 }
 0x82d   : > { %v5490_v23 = vmax.f32 %v5488_v40, 0.0 }
 0x82e   : > { %5493 = vrot.lane.b32.xlu1 %v5489_v33, %s7494_s16 }
 0x82f   : > { %5495 = vrot.lane.b32.xlu0 %v5490_v23, %s7494_s16  ;;  %s6812_s16 = sshll.u32 %s7604_s22, 4 }
 0x8a0   : > { %v5494_v8 = vpop.permute.xlu1 %5493 }
 0x8a1   : > { %v5501_v7 = vsel %vm5497_vm5, 0.0, %v5494_v8  ;;  %v5496_v36 = vpop.permute.xlu0 %5495 }
 0x8a2   : > { %v5498_v35 = vsel %vm5497_vm5, %v5494_v8, %v5496_v36  ;;  %5509 = vrot.lane.b32.xlu1 %v5501_v7, %s7491_s26 }
 0x8a3   : > { %v5503_v39 = vsel %vm5502_vm6, %v5498_v35, 0.0 }
 0x8a4   : > { %5511 = vrot.lane.b32.xlu0 %v5503_v39, %s7491_s26 }
 0x8a6   : > { %5666 = vrot.lane.b32.xlu1 %v5501_v7, %s7480_s29 }
 0x8a8   : > { %5668 = vrot.lane.b32.xlu0 %v5503_v39, %s7480_s29  ;;  %s9154_s29 = smov 98  }
 0x8aa   : > { %5755 = vrot.lane.b32.xlu1 %v5501_v7, %s7492_s27 }
 0x8ac   : > { %5757 = vrot.lane.b32.xlu0 %v5503_v39, %s7492_s27 }
 0x8ae   : > { %5836 = vrot.lane.b32.xlu1 %v5501_v7, %s7482_s20 }
 0x8b0   : > { %5838 = vrot.lane.b32.xlu0 %v5503_v39, %s7482_s20 }
 0x8b2   : > { %5919 = vrot.lane.b32.xlu1 %v5501_v7, %s9153_s24 }
 0x8b4   : > { %5921 = vrot.lane.b32.xlu0 %v5503_v39, %s9153_s24 }
 0x8b6   : > { %6008 = vrot.lane.b32.xlu1 %v5501_v7, %s7493_s17 }
 0x8b8   : > { %6010 = vrot.lane.b32.xlu0 %v5503_v39, %s7493_s17  ;;  %s7501_s17 = smov 87  }
 0x8ba   : > { %6089 = vrot.lane.b32.xlu1 %v5501_v7, %s7483_s18 }
 0x8bc   : > { %6091 = vrot.lane.b32.xlu0 %v5503_v39, %s7483_s18  ;;  %s7500_s18 = smov 38  }
 0x8be   : > { %6172 = vrot.lane.b32.xlu1 %v5501_v7, %s9154_s29 }
 0x8c0   : > { %6174 = vrot.lane.b32.xlu0 %v5503_v39, %s9154_s29 }
 0x8c2   : > { %6262 = vperm.xlu1 %7353, %v6259_v17   ;;  %v6299_v17 = vld [vmem:[%s9121_s12 + $0x30] sm:$0xff] }
 0x914   : > { %v5510_v47 = vpop.permute.xlu1 %5509 }
 0x916   : > { %v5512_v6 = vpop.permute.xlu0 %5511 }
 0x917   : > { %v5513_v30 = vsel %vm4695_vm15, %v5510_v47, %v5512_v6  ;;  %5519 = vmatprep.subr.mxu1 %v5512_v6  ;;  %v6300_v47 = vld [vmem:[%s9121_s12 + $0x38] sm:$0xff] }
 0x918   : > { %5520 = vmatpush1.msra.mxu1 %v5513_v30  ;;  %v5667_v21 = vpop.permute.xlu1 %5666  ;;  %v6301_v30 = vld [vmem:[%s9121_s12 + $0x40] sm:$0xff] }
 0x919   : > { %6790 = vmatmul.mubr.msk.f32.vlgmr.msra.gmra.mrb[24].mxu1 %vm1268_vm7, %v6789_v41  ;;  %6791 = vmatprep.subr.msk.mxu1 %vm5502_vm6, %v5498_v35  ;;  %v7119_v41 = vpack.c.bf16 %v6300_v47, %v6299_v17  ;;  %v6460_v17 = vld [vmem:[%s9118_s9 + $0xc0] sm:$0xff]  ;;  %v6461_v47 = vld [vmem:[%s9118_s9 + $0xc8] sm:$0xff] }
 0x91a   : > { %6793 = vmatpush1.msk.msra.mxu1 %vm6792_vm8, %v5494_v8  ;;  %v5669_v44 = vpop.permute.xlu0 %5668  ;;  %5657 = vmatprep.mubr.f32.mxu1 %v7485_v58  ;;  %v6298_v8 = vld [vmem:[%s9121_s12 + $0x28] sm:$0xff] }
 0x91b   : > { %5676 = vmatprep.subr.mxu1 %v5669_v44  ;;  %v5670_v5 = vsel %vm592_vm0, %v5667_v21, %v5669_v44  ;;  %vm6269_vm0 = vcmask 556032   ;;  %v6302_v44 = vld [vmem:[%s9121_s12 + $0x48] sm:$0xff]  ;;  %v6303_v21 = vld [vmem:[%s9121_s12 + $0x50] sm:$0xff] }
 0x91c   : > { %v5756_v26 = vpop.permute.xlu1 %5755 }
 0x91e   : > { %v5758_v59 = vpop.permute.xlu0 %5757 }
 0x91f   : > { %v5759_v13 = vsel %vm4961_vm1, %v5756_v26, %v5758_v59  ;;  %v6305_v26 = vld [vmem:[%s9121_s12 + $0x60] sm:$0xff] }
 0x920   : > { %v5837_v10 = vpop.permute.xlu1 %5836 }
 0x921   : > { %6794 = vmatmul.mubr.msk.f32.vlgmr.msra.gmra.mrb[24].mxu1 %vm1268_vm7, %v5504_v27  ;;  %v7122_v27 = vpack.c.bf16 %v6302_v44, %v6301_v30  ;;  %v6444_v30 = vld [vmem:[%s9118_s9 + $0x40] sm:$0xff]  ;;  %v6445_v44 = vld [vmem:[%s9118_s9 + $0x48] sm:$0xff] }
 0x922   : > { %5677 = vmatpush1.msra.mxu1 %v5670_v5  ;;  %5740 = vmatprep.mubr.f32.mxu1 %v7485_v58  ;;  %v5839_v4 = vpop.permute.xlu0 %5838  ;;  %v6304_v5 = vld [vmem:[%s9121_s12 + $0x58] sm:$0xff] }
 0x923   : > { %5765 = vmatprep.subr.mxu1 %v5758_v59  ;;  %v5840_v51 = vsel %vm886_vm3, %v5837_v10, %v5839_v4  ;;  %v7125_v59 = vpack.c.bf16 %v6304_v5, %v6303_v21  ;;  %v6463_v21 = vld [vmem:[%s9118_s9 + $0xd8] sm:$0xff]  ;;  %v7163_v5 = vpack.c.bf16 %v6445_v44, %v6444_v30  ;;  %v6482_v30 = vld [vmem:[%s9118_s9 + $0x170] sm:$0xff] }
 0x924   : > { %v5920_v31 = vpop.permute.xlu1 %5919  ;;  %v6483_v44 = vld [vmem:[%s9118_s9 + $0x178] sm:$0xff] }
 0x926   : > { %v5922_v53 = vpop.permute.xlu0 %5921 }
 0x927   : > { %v5923_v50 = vsel %vm2188_vm10, %v5920_v31, %v5922_v53  ;;  %v6311_v31 = vld [vmem:[%s9121_s12 + $0x90] sm:$0xff]  ;;  %vm6430_vm10 = vcmask 957440  }
 0x928   : > { %v6009_v0 = vpop.permute.xlu1 %6008 }
 0x929   : > { %6796 = vmatmul.mubr.msk.f32.vlgmr.msra.gmra.mrb[24].mxu1 %vm1268_vm7, %v6795_v20  ;;  %v6306_v20 = vld [vmem:[%s9121_s12 + $0x68] sm:$0xff] }
 0x92a   : > { %5766 = vmatpush1.msra.mxu1 %v5759_v13  ;;  %5829 = vmatprep.mubr.f32.mxu1 %v7485_v58  ;;  %v6011_v3 = vpop.permute.xlu0 %6010  ;;  %v6307_v13 = vld [vmem:[%s9121_s12 + $0x70] sm:$0xff] }
 0x92b   : > { %5846 = vmatprep.subr.mxu1 %v5839_v4  ;;  %v6012_v9 = vsel %vm5215_vm2, %v6009_v0, %v6011_v3  ;;  %v7128_v4 = vpack.c.bf16 %v6306_v20, %v6305_v26  ;;  %v6313_v0 = vld [vmem:[%s9121_s12 + $0xa0] sm:$0xff]  ;;  %v6446_v26 = vld [vmem:[%s9118_s9 + $0x50] sm:$0xff]  ;;  %v6447_v20 = vld [vmem:[%s9118_s9 + $0x58] sm:$0xff] }
 0x92c   : > { %v6090_v14 = vpop.permute.xlu1 %6089 }
 0x92d   : > { %6799 = vmatmul.mubr.msk.f32.vlgmr.msra.gmra.mrb[26].mxu1 %vm1268_vm7, %v6798_v48  ;;  %v6308_v48 = vld [vmem:[%s9121_s12 + $0x78] sm:$0xff] }
 0x92e   : > { %5847 = vmatpush1.msra.mxu1 %v5840_v51  ;;  %5910 = vmatprep.mubr.f32.mxu1 %v7485_v58  ;;  %v6092_v16 = vpop.permute.xlu0 %6091  ;;  %v7131_v10 = vpack.c.bf16 %v6308_v48, %v6307_v13  ;;  %v6309_v51 = vld [vmem:[%s9121_s12 + $0x80] sm:$0xff]  ;;  %v6465_v48 = vld [vmem:[%s9118_s9 + $0xe8] sm:$0xff] }
 0x92f   : > { %5929 = vmatprep.subr.mxu1 %v5922_v53  ;;  %v6093_v63 = vsel %vm1157_vm4, %v6090_v14, %v6092_v16  ;;  %v6310_v53 = vld [vmem:[%s9121_s12 + $0x88] sm:$0xff]  ;;  %vm6321_vm4 = vcmask 1043456   ;;  %v6464_v13 = vld [vmem:[%s9118_s9 + $0xe0] sm:$0xff] }
 0x930   : > { %v6173_v18 = vpop.permute.xlu1 %6172 }
 0x932   : > { %v6175_v2 = vpop.permute.xlu0 %6174 }
 0x933   : > { %v6176_v55 = vsel %vm3149_vm12, %v6173_v18, %v6175_v2 }
 0x935   : > { %6800 = vmatmul.mubr.msk.f32.vlgmr.msra.gmra.mrb[26].mxu1 %vm1268_vm7, %v6797_v49  ;;  %v7134_v49 = vpack.c.bf16 %v6310_v53, %v6309_v51  ;;  %v6448_v51 = vld [vmem:[%s9118_s9 + $0x60] sm:$0xff]  ;;  %v6449_v53 = vld [vmem:[%s9118_s9 + $0x68] sm:$0xff] }
 0x936   : > { %5930 = vmatpush1.msra.mxu1 %v5923_v50  ;;  %5993 = vmatprep.mubr.f32.mxu1 %v7485_v58  ;;  %v6312_v50 = vld [vmem:[%s9121_s12 + $0x98] sm:$0xff] }
 0x937   : > { %6018 = vmatprep.subr.mxu1 %v6011_v3  ;;  %v7137_v3 = vpack.c.bf16 %v6312_v50, %v6311_v31  ;;  %v6466_v31 = vld [vmem:[%s9118_s9 + $0xf0] sm:$0xff]  ;;  %v6467_v50 = vld [vmem:[%s9118_s9 + $0xf8] sm:$0xff] }
 0x93d   : > { %6802 = vmatmul.mubr.msk.f32.vlgmr.msra.gmra.mrb[26].mxu1 %vm1268_vm7, %v6801_v52  ;;  %v6314_v52 = vld [vmem:[%s9121_s12 + $0xa8] sm:$0xff] }
 0x93e   : > { %6019 = vmatpush1.msra.mxu1 %v6012_v9  ;;  %6082 = vmatprep.mubr.f32.mxu1 %v7485_v58  ;;  %v6315_v9 = vld [vmem:[%s9121_s12 + $0xb0] sm:$0xff] }
 0x93f   : > { %6099 = vmatprep.subr.mxu1 %v6092_v16  ;;  %v7140_v16 = vpack.c.bf16 %v6314_v52, %v6313_v0  ;;  %v6450_v0 = vld [vmem:[%s9118_s9 + $0x70] sm:$0xff]  ;;  %v6451_v52 = vld [vmem:[%s9118_s9 + $0x78] sm:$0xff] }
 0x941   : > { %6805 = vmatmul.mubr.msk.f32.vlgmr.msra.gmra.mrb[28].mxu1 %vm1268_vm7, %v6804_v60  ;;  %v6263_v38 = vpop.permute.xlu1 %6262  ;;  %v6316_v60 = vld [vmem:[%s9121_s12 + $0xb8] sm:$0xff] }
 0x942   : > { %6100 = vmatpush1.msra.mxu1 %v6093_v63  ;;  %6163 = vmatprep.mubr.f32.mxu1 %v7485_v58  ;;  %v7143_v14 = vpack.c.bf16 %v6316_v60, %v6315_v9  ;;  %v6317_v63 = vld [vmem:[%s9121_s12 + $0xc0] sm:$0xf] }
 0x943   : > { %6182 = vmatprep.subr.mxu1 %v6175_v2 }
 0x949   : > { %6806 = vmatmul.mubr.msk.f32.vlgmr.msra.gmra.mrb[28].mxu1 %vm1268_vm7, %v6803_v12 }
 0x94a   : > { %6183 = vmatpush1.msra.mxu1 %v6176_v55  ;;  %6246 = vmatprep.mubr.f32.mxu1 %v7485_v58 }
 0x94b   : > { %7109 = vmatprep.subr.bf16.mxu1 %v7495_v29 }
 0x951   : > { %6808 = vmatmul.mubr.msk.f32.vlgmr.msra.gmra.mrb[28].mxu1 %vm1268_vm7, %v6807_v11 }
 0x952   : > { %7111 = vmatpush1.bf16.msra.mxu1 %v7110_v43  ;;  %v6439_v43 = vld [vmem:[%s9118_s9 + $0x18] sm:$0xff] }
 0x953   : > { %7112 = vmatprep.subr.bf16.mxu1 %v7495_v29 }
 0x9fc   : > { %v5742_v62 = vpop.f32.mrb[24].mxu1 }
 0x9fd   : > { %v5744_v34 = vpop.f32.mrb[25].mxu1  ;;  %v5749_v22 = vmul.f32 %v5742_v62, %v8699_v57  ;;  %v6295_v57 = vld [vmem:[%s9121_s12 + $0x10] sm:$0xff] }
 0x9fe   : > { %v5750_v42 = vmul.f32 %v5744_v34, %v8702_v61 }
 0xa10   : > { %v5995_v45 = vpop.f32.mrb[26].mxu1 }
 0xa11   : > { %v6002_v19 = vadd.f32 %v5995_v45, %v5749_v22  ;;  %v5997_v1 = vpop.f32.mrb[27].mxu1 }
 0xa12   : > { %v6003_v15 = vadd.f32 %v5997_v1, %v5750_v42  ;;  %v6453_v1 = vld [vmem:[%s9118_s9 + $0x88] sm:$0xff] }
 0xa24   : > { %v6248_v56 = vpop.f32.mrb[28].mxu1 }
 0xa25   : > { %v6255_v24 = vmul.f32 %v6248_v56, %v8709_v28  ;;  %v6250_v37 = vpop.f32.mrb[29].mxu1  ;;  %v6296_v28 = vld [vmem:[%s9121_s12 + $0x18] sm:$0xff] }
 0xa26   : > { %v6256_v61 = vmul.f32 %v6250_v37, %v8712_v46  ;;  %v7113_v33 = vpack.c.bf16 %v6296_v28, %v6295_v57  ;;  %v6297_v46 = vld [vmem:[%s9121_s12 + $0x20] sm:$0xff]  ;;  %v6454_v37 = vld [vmem:[%s9118_s9 + $0x90] sm:$0xff] }
 0xa27   : > { %v6257_v54 = vadd.f32 %v6255_v24, %v6002_v19  ;;  %v7116_v39 = vpack.c.bf16 %v6298_v8, %v6297_v46  ;;  %v6452_v19 = vld [vmem:[%s9118_s9 + $0x80] sm:$0xff]  ;;  %v6437_v24 = vld [vmem:[%s9118_s9 + $0x8] sm:$0xff]  ;;  %v7149_v57 = vpack.c.bf16 %v6455_v25, %v6454_v37  ;;  %v6458_v46 = vld [vmem:[%s9118_s9 + $0xb0] sm:$0xff] }
 0xa28   : > { %v6258_v40 = vadd.f32 %v6256_v61, %v6003_v15  ;;  %7114 = vmatpush1.bf16.msra.mxu1 %v7113_v33  ;;  %v6436_v15 = vld [vmem:[%s9118_s9] sm:$0xff]  ;;  %v7145_v56 = vpack.c.bf16 %v6453_v1, %v6452_v19  ;;  %v6438_v61 = vld [vmem:[%s9118_s9 + $0x10] sm:$0xff]  ;;  %v6459_v8 = vld [vmem:[%s9118_s9 + $0xb8] sm:$0xff] }
 0xa29   : > { %v8809_v23 = vadd.f32 %v6263_v38, %v6257_v54  ;;  %7115 = vmatprep.subr.bf16.mxu1 %v7495_v29  ;;  %v7147_v32 = vpack.c.bf16 %v6437_v24, %v6436_v15  ;;  %v6456_v28 = vld [vmem:[%s9118_s9 + $0xa0] sm:$0xff]  ;;  %v6457_v54 = vld [vmem:[%s9118_s9 + $0xa8] sm:$0xff] }
 0xa2a   : > { %v6266_v7 = vadd.f32 %v6263_v38, %v6258_v40  ;;  %v7151_v38 = vpack.c.bf16 %v6439_v43, %v6438_v61  ;;  %v7153_v40 = vpack.c.bf16 %v6457_v54, %v6456_v28  ;;  %v6440_v33 = vld [vmem:[%s9118_s9 + $0x20] sm:$0xff]  ;;  %v6469_v19 = vld [vmem:[%s9118_s9 + $0x108] sm:$0xff] }
 0xa2b   : > { %v6267_v36 = vmax.f32 %v8809_v23, 0.0  ;;  %v6441_v23 = vld [vmem:[%s9118_s9 + $0x28] sm:$0xff]  ;;  %v6472_v54 = vld [vmem:[%s9118_s9 + $0x120] sm:$0xff] }
 0xa2c   : > { %v6268_v35 = vmax.f32 %v6266_v7, 0.0  ;;  %7117 = vmatpush1.bf16.msra.mxu1 %v7116_v39  ;;  %v7155_v7 = vpack.c.bf16 %v6441_v23, %v6440_v33  ;;  %v6443_v39 = vld [vmem:[%s9118_s9 + $0x38] sm:$0xff]  ;;  %v6474_v33 = vld [vmem:[%s9118_s9 + $0x130] sm:$0xff] }
 0xa2d   : > { %6273 = vrot.lane.b32.xlu0 %v6267_v36, %s7482_s20  ;;  %7118 = vmatprep.subr.bf16.mxu1 %v7495_v29  ;;  %v6475_v23 = vld [vmem:[%s9118_s9 + $0x138] sm:$0xff] }
 0xa2e   : > { %v6270_v6 = vsel %vm6269_vm0, %v6268_v35, 0.0  ;;  %v6442_v35 = vld [vmem:[%s9118_s9 + $0x30] sm:$0xff] }
 0xa2f   : > { %6275 = vrot.lane.b32.xlu1 %v6270_v6, %s7482_s20  ;;  %s7497_s20 = smov 68  }
 0xa30   : > { %7120 = vmatpush1.bf16.msra.mxu1 %v7119_v41  ;;  %v7161_v41 = vpack.c.bf16 %v6461_v47, %v6460_v17  ;;  %v6480_v47 = vld [vmem:[%s9118_s9 + $0x160] sm:$0xff] }
 0xa31   : > { %7121 = vmatprep.subr.bf16.mxu1 %v7495_v29 }
 0xa34   : > { %7123 = vmatpush1.bf16.msra.mxu1 %v7122_v27  ;;  %v6462_v27 = vld [vmem:[%s9118_s9 + $0xd0] sm:$0xff] }
 0xa35   : > { %7124 = vmatprep.subr.bf16.mxu1 %v7495_v29 }
 0xa38   : > { %7126 = vmatpush1.bf16.msra.mxu1 %v7125_v59  ;;  %v7165_v59 = vpack.c.bf16 %v6463_v21, %v6462_v27  ;;  %v7199_v27 = vpack.c.bf16 %v6483_v44, %v6482_v30 }
 0xa39   : > { %7127 = vmatprep.subr.bf16.mxu1 %v7495_v29 }
 0xa3c   : > { %7129 = vmatpush1.bf16.msra.mxu1 %v7128_v4  ;;  %v7167_v4 = vpack.c.bf16 %v6447_v20, %v6446_v26 }
 0xa3d   : > { %7130 = vmatprep.subr.bf16.mxu1 %v7495_v29 }
 0xa40   : > { %7132 = vmatpush1.bf16.msra.mxu1 %v7131_v10  ;;  %v7169_v10 = vpack.c.bf16 %v6465_v48, %v6464_v13 }
 0xa41   : > { %7133 = vmatprep.subr.bf16.mxu1 %v7495_v29 }
 0xa44   : > { %7135 = vmatpush1.bf16.msra.mxu1 %v7134_v49  ;;  %v7171_v49 = vpack.c.bf16 %v6449_v53, %v6448_v51 }
 0xa45   : > { %7136 = vmatprep.subr.bf16.mxu1 %v7495_v29 }
 0xa48   : > { %7138 = vmatpush1.bf16.msra.mxu1 %v7137_v3  ;;  %v7173_v3 = vpack.c.bf16 %v6467_v50, %v6466_v31 }
 0xa49   : > { %7139 = vmatprep.subr.bf16.mxu1 %v7495_v29 }
 0xa4c   : > { %7141 = vmatpush1.bf16.msra.mxu1 %v7140_v16  ;;  %v7175_v16 = vpack.c.bf16 %v6451_v52, %v6450_v0 }
 0xa4d   : > { %7142 = vmatprep.subr.bf16.mxu1 %v7495_v29 }
 0xa50   : > { %7144 = vmatpush1.bf16.msra.mxu1 %v7143_v14 }
 0xa51   : > { %6373 = vmatprep.subr.mxu1 %v7485_v58 }
 0xa54   : > { %6809 = vmatpush1.msk.msra.mxu1 %vm6321_vm4, %v6317_v63 }
 0xa55   : > { %7146 = vmatprep.subr.bf16.mxu1 %v7145_v56 }
 0xa9f   : > { %v6274_v2 = vpop.permute.xlu0 %6273 }
 0xaa1   : > { %v6276_v12 = vpop.permute.xlu1 %6275 }
 0xaa2   : > { %v6277_v18 = vsel %vm886_vm3, %v6274_v2, %v6276_v12  ;;  %v6281_v55 = vmax.f32 %v6270_v6, %v6276_v12  ;;  %v7159_v6 = vpack.c.bf16 %v6443_v39, %v6442_v35  ;;  %vm6427_vm3 = vcmask 154624   ;;  %v6478_v35 = vld [vmem:[%s9118_s9 + $0x150] sm:$0xff]  ;;  %v6479_v39 = vld [vmem:[%s9118_s9 + $0x158] sm:$0xff] }
 0xaa3   : > { %v6280_v11 = vmax.f32 %v6267_v36, %v6277_v18  ;;  %v7157_v36 = vpack.c.bf16 %v6459_v8, %v6458_v46  ;;  %v7187_v46 = vpack.c.bf16 %v6475_v23, %v6474_v33  ;;  %v6476_v8 = vld [vmem:[%s9118_s9 + $0x140] sm:$0xff]  ;;  %v7193_v17 = vpack.c.bf16 %v6479_v39, %v6478_v35 }
 0xaa4   : > { %6286 = vrot.lane.b32.xlu1 %v6281_v55, %s7491_s26 }
 0xaa5   : > { %6284 = vrot.lane.b32.xlu0 %v6280_v11, %s7491_s26 }
 0xb16   : > { %v6287_v62 = vpop.permute.xlu1 %6286 }
 0xb17   : > { %v6292_v34 = vmax.f32 %v6281_v55, %v6287_v62  ;;  %v6285_v22 = vpop.permute.xlu0 %6284 }
 0xb18   : > { %v6288_v42 = vsel %vm4695_vm15, %v6285_v22, %v6287_v62 }
 0xb19   : > { %v6291_v45 = vmax.f32 %v6280_v11, %v6288_v42  ;;  %6810 = vmatprep.mubr.msk.f32.mxu1 %vm6269_vm0, %v6292_v34 }
 0xb1b   : > { %6390 = vmatmul.mubr.f32.vlgmr.msra.gmra.mrb[30].mxu1 %v6291_v45  ;;  %v6468_v45 = vld [vmem:[%s9118_s9 + $0x100] sm:$0xff] }
 0xb1c   : > { %7148 = vmatpush3.bf16.msra.mxu1 %v7147_v32  ;;  %v7178_v37 = vpack.c.bf16 %v6469_v19, %v6468_v45  ;;  %v6470_v32 = vld [vmem:[%s9118_s9 + $0x110] sm:$0xff] }
 0xb1d   : > { %7150 = vmatprep.subr.bf16.mxu1 %v7149_v57  ;;  %v6471_v57 = vld [vmem:[%s9118_s9 + $0x118] sm:$0xff] }
 0xb1e   : > { %v7181_v28 = vpack.c.bf16 %v6471_v57, %v6470_v32 }
 0xb20   : > { %7152 = vmatpush3.bf16.msra.mxu1 %v7151_v38  ;;  %v6473_v38 = vld [vmem:[%s9118_s9 + $0x128] sm:$0xff] }
 0xb21   : > { %7154 = vmatprep.subr.bf16.mxu1 %v7153_v40  ;;  %v7184_v40 = vpack.c.bf16 %v6473_v38, %v6472_v54 }
 0xb24   : > { %7156 = vmatpush3.bf16.msra.mxu1 %v7155_v7  ;;  %v6477_v7 = vld [vmem:[%s9118_s9 + $0x148] sm:$0xff] }
 0xb25   : > { %7158 = vmatprep.subr.bf16.mxu1 %v7157_v36  ;;  %v7190_v36 = vpack.c.bf16 %v6477_v7, %v6476_v8 }
 0xb28   : > { %7160 = vmatpush3.bf16.msra.mxu1 %v7159_v6  ;;  %v6481_v6 = vld [vmem:[%s9118_s9 + $0x168] sm:$0xff] }
 0xb29   : > { %7162 = vmatprep.subr.bf16.mxu1 %v7161_v41  ;;  %v7196_v41 = vpack.c.bf16 %v6481_v6, %v6480_v47 }
 0xb2c   : > { %7164 = vmatpush3.bf16.msra.mxu1 %v7163_v5  ;;  %v6484_v5 = vld [vmem:[%s9118_s9 + $0x180] sm:$0xff] }
 0xb2d   : > { %7166 = vmatprep.subr.bf16.mxu1 %v7165_v59 }
 0xb30   : > { %7168 = vmatpush3.bf16.msra.mxu1 %v7167_v4 }
 0xb31   : > { %7170 = vmatprep.subr.bf16.mxu1 %v7169_v10 }
 0xb34   : > { %7172 = vmatpush3.bf16.msra.mxu1 %v7171_v49 }
 0xb35   : > { %7174 = vmatprep.subr.bf16.mxu1 %v7173_v3 }
 0xb38   : > { %7176 = vmatpush3.bf16.msra.mxu1 %v7175_v16 }
 0xb39   : > { %7177 = vmatprep.subr.bf16.mxu1 %v7495_v29 }
 0xbee   : > { %v6391_v9 = vpop.f32.mrb[30].mxu1 }
 0xbef   : > { %v6393_v60 = vpop.f32.mrb[31].mxu1  ;;  %v6404_v14 = vrot.slane %v6391_v9, 3  ;;  %v6400_v63 = vrot.slane %v6391_v9, 2  ;;  %v6408_v2 = vrot.slane %v6391_v9, 4  ;;  %v6396_v12 = vrot.slane %v6391_v9, 1 }
 0xbf0   : > { %v6412_v18 = vrot.slane %v6391_v9, 5  ;;  %v6416_v55 = vrot.slane %v6391_v9, 6  ;;  %v6420_v11 = vrot.slane %v6391_v9, 7 }
 0xbf1   : > { %6405 = vrot.lane.b32.xlu1 %v6404_v14, %s7496_s0  ;;  %6401 = vrot.lane.b32.xlu0 %v6400_v63, %s9154_s29  ;;  %s9067_s0 = scalar_lea.hbm %s9124_s15, %s6812_s16 }
 0xbf5   : > { %6409 = vrot.lane.b32.xlu0 %v6408_v2, %s7497_s20  ;;  %6397 = vrot.lane.b32.xlu1 %v6396_v12, %s7498_s25  ;;  %s7502_s25 = smov [#allocation5]  }
 0xbf9   : > { %6413 = vrot.lane.b32.xlu0 %v6412_v18, %s7499_s23  ;;  %6417 = vrot.lane.b32.xlu1 %v6416_v55, %s7500_s18  ;;  %s498_s18 = sand.u32 1, %s7465_s19   ;;  %s7411_s23 = sshll.u32 %s7502_s25, 4  ;;  %s7412_s23 = int_to_ptr.vmem [resolvable:$false] %s7411_s23 }
 0xbfa   : > { %s499_s24 = scalar_lea.vmem [#allocation5], %s498_s18  ;;  %s6631_s20 = scalar_lea.sflag [#allocation4], %s498_s18 }
 0xbfb   : > { %s6643_s26 = sshll.u32 %s499_s24, 4  ;;  %s9069_s26 = int_to_ptr.vmem [resolvable:$true] %s6643_s26 }
 0xbfc   : > { %s7407_s22 = scalar_lea.vmem %s9069_s26, 16  ;;  %p7414_p2 = scmp.lt.s32.totalorder %s9069_s26, %s7412_s23 }
 0xbfd   : > { %6421 = vrot.lane.b32.xlu0 %v6420_v11, %s7501_s17  ;;  %p7408_p6 = scmp.ne.s32.totalorder %s9069_s26, %s7407_s22  ;;  %s7413_s17 = scalar_lea.vmem %s7412_s23, 32 }
 0xbfe   : > { %p7415_p3 = scmp.lt.s32.totalorder %s7413_s17, %s7407_s22 }
 0xbff   : > { %p7409_p10 = pnand %p7408_p6, %p9155_p9 }
 0xc00   : > { %p7416_p4 = por %p7415_p3, %p7414_p2 }
 0xc01   : > { %p7410_p12 = pneg %p7409_p10 }
 0xc03   : > { %p7417_p7 = pnand %p7416_p4, %p7410_p12 }
 0xc63   : > { %v6406_v62 = vpop.permute.xlu1 %6405  ;;  %v6402_v34 = vpop.permute.xlu0 %6401 }
 0xc64   : > { %v6428_v1 = vsel %vm6427_vm3, %v6402_v34, %v6406_v62 }
 0xc67   : > { %v6410_v22 = vpop.permute.xlu0 %6409  ;;  %v6398_v42 = vpop.permute.xlu1 %6397 }
 0xc68   : > { %v6425_v15 = vsel %vm6424_vm9, %v6391_v9, %v6398_v42  ;;  %v6429_v56 = vsel %vm6269_vm0, %v6428_v1, %v6410_v22 }
 0xc69   : > { %v6426_v61 = vsel %vm3149_vm12, %v6425_v15, %v6402_v34  ;;  %vm6628_vm12 = vcmask 73728  }
 0xc6b   : > { %v6414_v24 = vpop.permute.xlu0 %6413  ;;  %v6418_v21 = vpop.permute.xlu1 %6417 }
 0xc6c   : > { %v6431_v25 = vsel %vm6430_vm10, %v6429_v56, %v6414_v24 }
 0xc6d   : > { %6552 = vmatprep.mubr.f32.mxu1 %v6431_v25 }
 0xc6e   : > { %6553 = vmatmul.mubr.f32.vlgmr.msra.gmra.mrb[32].mxu1 %v6426_v61 }
 0xc6f   : > { %7179 = vmatpush1.bf16.msra.mxu1 %v7178_v37  ;;  %v6422_v43 = vpop.permute.xlu0 %6421 }
 0xc70   : > { %6811 = vmatprep.mubr.msk.f32.mxu1 %vm1268_vm7, %v6422_v43  ;;  %7180 = vmatprep.subr.bf16.mxu1 %v7495_v29  ;;  %vm6432_vm7 = vcmask 310272  }
 0xc71   : > { %v6433_v59 = vsel %vm6432_vm7, %v6414_v24, %v6418_v21 }
 0xc72   : > { %v6435_v26 = vsel %vm6434_vm11, %v6433_v59, %v6422_v43 }
 0xc73   : > { %7182 = vmatpush1.bf16.msra.mxu1 %v7181_v28 }
 0xc74   : > { %7183 = vmatprep.subr.bf16.mxu1 %v7495_v29 }
 0xc77   : > { %7185 = vmatpush1.bf16.msra.mxu1 %v7184_v40 }
 0xc78   : > { %7186 = vmatprep.subr.bf16.mxu1 %v7495_v29 }
 0xc7b   : > { %7188 = vmatpush1.bf16.msra.mxu1 %v7187_v46 }
 0xc7c   : > { %7189 = vmatprep.subr.bf16.mxu1 %v7495_v29 }
 0xc7f   : > { %7191 = vmatpush1.bf16.msra.mxu1 %v7190_v36 }
 0xc80   : > { %7192 = vmatprep.subr.bf16.mxu1 %v7495_v29 }
 0xc83   : > { %7194 = vmatpush1.bf16.msra.mxu1 %v7193_v17 }
 0xc84   : > { %7195 = vmatprep.subr.bf16.mxu1 %v7495_v29 }
 0xc87   : > { %7197 = vmatpush1.bf16.msra.mxu1 %v7196_v41 }
 0xc88   : > { %7198 = vmatprep.subr.bf16.mxu1 %v7495_v29  ;;  %v6485_v29 = vld [vmem:[%s9119_s10] sm:$0x1] }
 0xc8b   : > { %7200 = vmatpush1.bf16.msra.mxu1 %v7199_v27 }
 0xc8c   : > { %6590 = vmatprep.subr.mxu1 %v7485_v58 }
 0xc8f   : > { %6591 = vmatpush1.msra.mxu1 %v6484_v5 }
 0xc90   : > { %6623 = vmatmul.mubr.f32.vlgmr.msra.gmra.mrb[34].mxu1 %v6435_v26 }
 0xd41   : > { %v6865_v20 = vpop.f32.mrb[32].mxu1 }
 0xd42   : > { %v6866_v4 = vpop.f32.mrb[33].mxu1 }
 0xd43   : > { %v6867_v13 = vadd.f32 %v6866_v4, %v6865_v20 }
 0xd45   : > { %v6555_v58 = vadd.f32 %v6867_v13, %v6485_v29 }
 0xd63   : > { %v6624_v48 = vpop.f32.mrb[34].mxu1 }
 0xd64   : > { %v6625_v10 = vadd.f32 %v6624_v48, %v6555_v58  ;;  %v6626_v51 = vpop.f32.mrb[35].mxu1 }
 0xd66   : > { %6629 = vst.msk [vmem:[%s499_s24] sm:$0x1] %vm6628_vm12, %v6625_v10 }
 0xd67   : > { %7420 = shalt.err (!%p7417_p7)
}
 0xd68   : > { %s7421_s18 = scalar_lea.hbm %s9067_s0, 16  ;;  %s7425_s24 = scalar_lea.hbm %s9124_s15, 32 }
 0xd69   : > { %p7422_p8 = scmp.ne.s32.totalorder %s9067_s0, %s7421_s18  ;;  %p7426_p1 = scmp.lt.u32.totalorder %s9067_s0, %s9124_s15 }
 0xd6a   : > { %p7427_p0 = scmp.lt.u32.totalorder %s7425_s24, %s7421_s18  ;;  %p7429_p6 = scmp.lt.u32.totalorder %s7421_s18, %s9067_s0 }
 0xd6b   : > { %p7423_p11 = pnand %p7422_p8, %p9155_p9 }
 0xd6c   : > { %p7428_p5 = por %p7427_p0, %p7426_p1 }
 0xd6d   : > { %p7424_p13 = pneg %p7423_p11 }
 0xd6e   : > { %p7430_p10 = por %p7429_p6, %p7428_p5 }
 0xd70   : > { %p7431_p12 = pnand %p7430_p10, %p7424_p13 }
 0xd72   : > { %7434 = shalt.err (!%p7431_p12)
}
 0xd73   : > { %7280 = dma.vmem_to_hbm [thread:$0]  (%p9155_p9), %s9069_s26, 16, %s9067_s0, %s6631_s20  }
 0xd74 PF: > { %s9156_s22 = sld [smem:[#allocation8_spill]]  ;;  %s9157_s25 = sld [smem:[#allocation12_spill]] }
 0xd75   : > { %p7292_p2 = scmp.ge.s32.totalorder %s7473_s21, 2 }
 0xd7a   : > { %s6655_s23 = sand.u32 1, %s9156_s22   ;;  %p9158_p3 = scmp.ne.s32.totalorder %s9157_s25, 0 }
 0xd7b   : > { %s6656_s17 = scalar_lea.sflag [#allocation4], %s6655_s23 }
 0xd7c   : > { %p7287_p4 = pnand %p7292_p2, %p9158_p3 }
 0xd7e   : > { %7456 = dma.done.wait (!%p7287_p4), %s6656_s17, 16  }
 0xd7f   : > { %7458 = vsyncadd (!%p7287_p4), %s6656_s17, 4294967280  ;;  %s9159_s21 = sld [smem:[#allocation10_spill]]  ;;  %s9160_s29 = sld [smem:[#allocation9_spill]] }
 0xd80   : > { %s9161_s20 = sld [smem:[#allocation11_spill]]  ;;  %s9162_s18 = smov %s7465_s19 }
 0xd85   : > { %p26_p7 = scmp.ge.s32.totalorder %s9159_s21, 4   ;;  %s9163_s19 = smov %s9160_s29 }
 0xd87   :  { %28 = sbr.rel (!%p26_p7) target bundleno = 6 (0x6), region = 152 }
 0xd8e   :  { %6660 = vsyncpa [#allocation3], 1 }
 0xd8f   :  { %6662 = vsyncpa [#allocation3 + $0x1], 1 }
 0xd90   :  { %6663 = vsyncpa [#allocation4], 1 }
 0xd91   :  { %6665 = vsyncpa [#allocation4 + $0x1], 1 }

</bundles_post_ra>
